<compile_context>
chip_gen: v5e
topology: v5e:2x2
jax: 0.10.0
libtpu: 0.0.40
codegen_flags: <defaults>
</compile_context>

<pallas_src>
import jax
import jax.numpy as jnp
from jax.experimental import pallas as pl
from jax.experimental.pallas import tpu as pltpu

K = 8
NCLASS = 7
C5 = 2048          # in-channels of conv5 feature (cls5 branch)
C4 = 1024          # in-channels of conv4 feature (conv6 branch)
KN = K * NCLASS
BN_EPS = 1e-5


def dfl_kernel(x5_ref, x4_ref, w5_ref, b5_ref, w6_ref, wps_ref, bps_ref,
               out_ref):
    # One grid step == B batch elements (B is the static leading block dim).
    B = x5_ref.shape[0]

    w5 = w5_ref[...]          # (NCLASS, C5)   bf16, BN-folded
    b5 = b5_ref[...]          # (NCLASS, 1)    f32,  BN-folded
    w6 = w6_ref[...]          # (KN, C4)       bf16
    wps = wps_ref[...]        # (2*NCLASS, KN) f32: rows [0:NCLASS]=cls6 conv,
    bps = bps_ref[...]        # (2*NCLASS, 1)       rows [NCLASS:]=ccpool avg
                              #                (conv6 bias already folded in)

    for b in range(B):        # short static unroll over the batch tile
        x5 = x5_ref[b].astype(jnp.bfloat16)    # (C5, S5)
        x4 = x4_ref[b].astype(jnp.bfloat16)    # (C4, S4)

        # ---- g branch: (BN-folded) 1x1 conv -> ReLU -> AdaptiveAvgPool(1,1)
        y5 = jnp.dot(w5, x5, preferred_element_type=jnp.float32) + b5
        g = jnp.mean(jnp.maximum(y5, 0.0), axis=-1)               # (NCLASS,)

        # ---- p / s branch: 1x1 conv -> AdaptiveMaxPool(1,1)
        # (per-channel conv6 bias commutes with the spatial max and is linear
        #  through the stacked matmul below -> folded into bps in the wrapper)
        y6 = jnp.dot(w6, x4, preferred_element_type=jnp.float32)  # (KN, S4)
        m = jnp.max(y6, axis=-1, keepdims=True)                   # (KN, 1)

        # cls6 conv (AdaptiveAvgPool over 1x1 is identity) + ccpool average,
        # fused into one stacked matmul on the pooled vector.
        ps = jnp.dot(wps, m, preferred_element_type=jnp.float32) + bps  # (2*NCLASS,1)

        out_ref[b, 0, :] = g.astype(out_ref.dtype)
        out_ref[b, 1, :] = ps[:NCLASS, 0].astype(out_ref.dtype)
        out_ref[b, 2, :] = ps[NCLASS:, 0].astype(out_ref.dtype)


def dfl_forward(conv4, conv5, params, *, batch_block=None):
    N, _, H5, W5 = conv5.shape
    _, _, H4, W4 = conv4.shape
    S5, S4 = H5 * W5, H4 * W4
    x5 = conv5.reshape(N, C5, S5)          # zero-copy (contiguous) reshape
    x4 = conv4.reshape(N, C4, S4)

    # Batch tile: amortize per-step pipeline overhead but keep grid >= 2
    # (megacore on v7x).  B=4 keeps VMEM ~17 MiB; B=2 ~9 MiB.
    if batch_block is None:
        batch_block = 1
        for cand in (4, 2):
            if N % cand == 0 and N // cand >= 2:
                batch_block = cand
                break
    B = batch_block
    assert N % B == 0, "batch_block must divide the batch size"
    grid = (N // B,)

    # ---- fold eval-mode BatchNorm into cls5 conv (exact), prep bf16 weights.
    inv_std = jax.lax.rsqrt(params["rvar"] + BN_EPS)               # (NCLASS, 1)
    scale = params["gamma"] * inv_std
    w5f = (scale * params["w5"]).astype(jnp.bfloat16)              # (NCLASS, C5)
    b5f = scale * (params["b5"] - params["rmean"]) + params["beta"]
    w6b = params["w6"].astype(jnp.bfloat16)                        # (KN, C4)

    # Stack cls6 conv weight and the ccpool grouped-average matrix, and fold
    # the conv6 bias (constant per channel, commutes with the spatial max)
    # into this stacked matmul's bias: wps @ (m + b6) + b = wps @ m + (wps@b6 + b).
    wps = jnp.concatenate([params["wc6"], params["avg"]], axis=0)  # (2*NCLASS, KN)
    bps = wps @ params["b6"] + jnp.concatenate(
        [params["bc6"], jnp.zeros((NCLASS, 1), jnp.float32)], axis=0)

    def wspec(shape):
        return pl.BlockSpec(shape, lambda n: (0, 0))

    flops = 2 * N * (NCLASS * C5 * S5 + KN * C4 * S4 + 2 * NCLASS * KN)
    bytes_accessed = (4 * N * (C5 * S5 + C4 * S4 + 3 * NCLASS)
                      + 2 * (NCLASS * C5 + KN * C4)
                      + 4 * (NCLASS + 2 * NCLASS * KN + 2 * NCLASS))

    out = pl.pallas_call(
        dfl_kernel,
        out_shape=jax.ShapeDtypeStruct((N, 3, NCLASS), jnp.float32),
        grid_spec=pltpu.PrefetchScalarGridSpec(
            num_scalar_prefetch=0,
            grid=grid,
            in_specs=[
                pl.BlockSpec((B, C5, S5), lambda n: (n, 0, 0)),  # conv5 feat
                pl.BlockSpec((B, C4, S4), lambda n: (n, 0, 0)),  # conv4 feat
                wspec((NCLASS, C5)),       # BN-folded cls5 conv weight (bf16)
                wspec((NCLASS, 1)),        # BN-folded cls5 conv bias
                wspec((KN, C4)),           # conv6 weight (bf16)
                wspec((2 * NCLASS, KN)),   # stacked [cls6 weight ; ccpool avg]
                wspec((2 * NCLASS, 1)),    # stacked bias (conv6 bias folded in)
            ],
            out_specs=pl.BlockSpec((B, 3, NCLASS), lambda n: (n, 0, 0)),
        ),
        compiler_params=pltpu.CompilerParams(
            dimension_semantics=("parallel",),
            vmem_limit_bytes=32 * 1024 * 1024),
        cost_estimate=pl.CostEstimate(
            flops=flops, transcendentals=0, bytes_accessed=bytes_accessed),
    )(x5, x4, w5f, b5f, w6b, wps, bps)

    return out[:, 0, :], out[:, 1, :], out[:, 2, :]


def dfl_reference(conv4, conv5, pr):
    # Pure-JAX reference matching the original PyTorch module (eval-mode BN).
    N = conv5.shape[0]
    x5 = conv5.reshape(N, C5, -1)
    x4 = conv4.reshape(N, C4, -1)

    y5 = jnp.einsum('oc,ncs->nos', pr["w5"], x5) + pr["b5"][None]
    y5 = (y5 - pr["rmean"][None]) / jnp.sqrt(pr["rvar"][None] + BN_EPS) \
         * pr["gamma"][None] + pr["beta"][None]
    y5 = jnp.maximum(y5, 0.0)
    g = jnp.mean(y5, axis=-1)

    y6 = jnp.einsum('oc,ncs->nos', pr["w6"], x4) + pr["b6"][None]
    m = jnp.max(y6, axis=-1)                                   # (N, KN)
    p = m @ pr["wc6"].T + pr["bc6"][:, 0][None]
    s = jnp.mean(m.reshape(N, NCLASS, K), axis=-1)
    return g, p, s


def make_params():
    key = jax.random.PRNGKey(0)
    ks = jax.random.split(key, 8)
    params = {
        "w5": jax.random.normal(ks[0], (NCLASS, C5), jnp.float32) * 0.02,
        "b5": jax.random.normal(ks[1], (NCLASS, 1), jnp.float32) * 0.02,
        "gamma": 1.0 + 0.1 * jax.random.normal(ks[2], (NCLASS, 1), jnp.float32),
        "beta": 0.05 * jax.random.normal(ks[3], (NCLASS, 1), jnp.float32),
        "rmean": jnp.zeros((NCLASS, 1), jnp.float32),
        "rvar": jnp.ones((NCLASS, 1), jnp.float32),
        "w6": jax.random.normal(ks[4], (KN, C4), jnp.float32) * 0.02,
        "b6": jax.random.normal(ks[5], (KN, 1), jnp.float32) * 0.02,
        "wc6": jax.random.normal(ks[6], (NCLASS, KN), jnp.float32) * 0.1,
        "bc6": jax.random.normal(ks[7], (NCLASS, 1), jnp.float32) * 0.1,
        # AvgPool1d(k, stride=k) over the KN channel axis as a matmul.
        "avg": (jnp.arange(KN)[None, :] // K
                == jnp.arange(NCLASS)[:, None]).astype(jnp.float32) / K,
    }
    return params


if __name__ == "__main__":
    params = make_params()
    key = jax.random.PRNGKey(0)
    k4, k5 = jax.random.split(key)
    # Small but representative shapes: batch 4 -> batch tile B=2, grid=(2,).
    conv5 = jax.random.normal(k5, (4, C5, 8, 8), jnp.float32)     # features[-1]
    conv4 = jax.random.normal(k4, (4, C4, 16, 16), jnp.float32)   # features[-2]

    g, p, s = dfl_forward(conv4, conv5, params)
    jax.block_until_ready((g, p, s))

    g_r, p_r, s_r = dfl_reference(conv4, conv5, params)
    assert g.shape == (4, NCLASS) and p.shape == (4, NCLASS) and s.shape == (4, NCLASS)
    # bf16 MXU operands (f32 accumulation) -> slightly looser atol than pure f32.
    assert jnp.allclose(g, g_r, rtol=5e-2, atol=2e-3), "g mismatch"
    assert jnp.allclose(p, p_r, rtol=5e-2, atol=2e-3), "p mismatch"
    assert jnp.allclose(s, s_r, rtol=5e-2, atol=2e-3), "s mismatch"
    print("KERNEL_OK")
</pallas_src>

<mosaic_0001>
module attributes {stable_mosaic.version = 11 : i64} {
  func.func @dfl_kernel(%arg0: i32, %arg1: memref<2x2048x64xf32, #tpu.memory_space<vmem>>, %arg2: memref<2x1024x256xf32, #tpu.memory_space<vmem>>, %arg3: memref<7x2048xbf16, #tpu.memory_space<vmem>>, %arg4: memref<7x1xf32, #tpu.memory_space<vmem>>, %arg5: memref<56x1024xbf16, #tpu.memory_space<vmem>>, %arg6: memref<14x56xf32, #tpu.memory_space<vmem>>, %arg7: memref<14x1xf32, #tpu.memory_space<vmem>>, %arg8: memref<2x3x7xf32, #tpu.memory_space<vmem>>) attributes {dimension_semantics = [#tpu.dimension_semantics<parallel>], iteration_bounds = array<i64: 2>, scalar_prefetch = 0 : i64, scratch_operands = 0 : i64, tpu.core_type = #tpu.core_type<tc>, window_params = [{transform_indices = @transform_0, window_bounds = array<i64: 2, 2048, 64>}, {transform_indices = @transform_1, window_bounds = array<i64: 2, 1024, 256>}, {pipeline_mode = #tpu.pipeline_mode<synchronous>, transform_indices = @transform_2, window_bounds = array<i64: 7, 2048>}, {pipeline_mode = #tpu.pipeline_mode<synchronous>, transform_indices = @transform_3, window_bounds = array<i64: 7, 1>}, {pipeline_mode = #tpu.pipeline_mode<synchronous>, transform_indices = @transform_4, window_bounds = array<i64: 56, 1024>}, {pipeline_mode = #tpu.pipeline_mode<synchronous>, transform_indices = @transform_5, window_bounds = array<i64: 14, 56>}, {pipeline_mode = #tpu.pipeline_mode<synchronous>, transform_indices = @transform_6, window_bounds = array<i64: 14, 1>}, {transform_indices = @transform_7, window_bounds = array<i64: 2, 3, 7>}]} {
    %c0 = arith.constant 0 : index
    %c0_0 = arith.constant 0 : index
    %0 = vector.load %arg3[%c0, %c0_0] : memref<7x2048xbf16, #tpu.memory_space<vmem>>, vector<7x2048xbf16>
    %c0_1 = arith.constant 0 : index
    %c0_2 = arith.constant 0 : index
    %1 = vector.load %arg4[%c0_1, %c0_2] : memref<7x1xf32, #tpu.memory_space<vmem>>, vector<7x1xf32>
    %c0_3 = arith.constant 0 : index
    %c0_4 = arith.constant 0 : index
    %2 = vector.load %arg5[%c0_3, %c0_4] : memref<56x1024xbf16, #tpu.memory_space<vmem>>, vector<56x1024xbf16>
    %c0_5 = arith.constant 0 : index
    %c0_6 = arith.constant 0 : index
    %3 = vector.load %arg6[%c0_5, %c0_6] : memref<14x56xf32, #tpu.memory_space<vmem>>, vector<14x56xf32>
    %c0_7 = arith.constant 0 : index
    %c0_8 = arith.constant 0 : index
    %4 = vector.load %arg7[%c0_7, %c0_8] : memref<14x1xf32, #tpu.memory_space<vmem>>, vector<14x1xf32>
    %c0_9 = arith.constant 0 : index
    %c0_10 = arith.constant 0 : index
    %c0_11 = arith.constant 0 : index
    %5 = vector.load %arg1[%c0_9, %c0_10, %c0_11] : memref<2x2048x64xf32, #tpu.memory_space<vmem>>, vector<1x2048x64xf32>
    %6 = vector.shape_cast %5 : vector<1x2048x64xf32> to vector<2048x64xf32>
    %7 = arith.truncf %6 : vector<2048x64xf32> to vector<2048x64xbf16>
    %c0_12 = arith.constant 0 : index
    %c0_13 = arith.constant 0 : index
    %c0_14 = arith.constant 0 : index
    %8 = vector.load %arg2[%c0_12, %c0_13, %c0_14] : memref<2x1024x256xf32, #tpu.memory_space<vmem>>, vector<1x1024x256xf32>
    %9 = vector.shape_cast %8 : vector<1x1024x256xf32> to vector<1024x256xf32>
    %10 = arith.truncf %9 : vector<1024x256xf32> to vector<1024x256xbf16>
    %cst = arith.constant dense<0.000000e+00> : vector<7x64xf32>
    %11 = tpu.matmul %0, %7, %cst {dimension_numbers = #tpu.dot_dimension_numbers<[1], [0], [0], [1], [0, 0, 1, 1], [], []>} : vector<7x2048xbf16>, vector<2048x64xbf16>, vector<7x64xf32> -> vector<7x64xf32>
    %12 = vector.broadcast %1 : vector<7x1xf32> to vector<7x64xf32>
    %13 = arith.addf %11, %12 : vector<7x64xf32>
    %cst_15 = arith.constant 0.000000e+00 : f32
    %14 = vector.broadcast %cst_15 : f32 to vector<7x64xf32>
    %15 = arith.maximumf %13, %14 : vector<7x64xf32>
    %cst_16 = arith.constant dense<0.000000e+00> : vector<7xf32>
    %16 = vector.multi_reduction <add>, %15, %cst_16 [1] : vector<7x64xf32> to vector<7xf32>
    %cst_17 = arith.constant 6.400000e+01 : f32
    %17 = vector.broadcast %cst_17 : f32 to vector<7xf32>
    %18 = arith.divf %16, %17 : vector<7xf32>
    %cst_18 = arith.constant dense<0.000000e+00> : vector<56x256xf32>
    %19 = tpu.matmul %2, %10, %cst_18 {dimension_numbers = #tpu.dot_dimension_numbers<[1], [0], [0], [1], [0, 0, 1, 1], [], []>} : vector<56x1024xbf16>, vector<1024x256xbf16>, vector<56x256xf32> -> vector<56x256xf32>
    %cst_19 = arith.constant dense<0xFF800000> : vector<56xf32>
    %20 = vector.multi_reduction <maximumf>, %19, %cst_19 [1] : vector<56x256xf32> to vector<56xf32>
    %21 = vector.shape_cast %20 : vector<56xf32> to vector<56x1xf32>
    %cst_20 = arith.constant dense<0.000000e+00> : vector<14x1xf32>
    %22 = tpu.matmul %3, %21, %cst_20 {dimension_numbers = #tpu.dot_dimension_numbers<[1], [0], [0], [1], [0, 0, 1, 1], [], []>} : vector<14x56xf32>, vector<56x1xf32>, vector<14x1xf32> -> vector<14x1xf32>
    %23 = arith.addf %22, %4 : vector<14x1xf32>
    %c0_21 = arith.constant 0 : index
    %c0_22 = arith.constant 0 : index
    %c0_23 = arith.constant 0 : index
    %24 = vector.load %arg8[%c0_21, %c0_22, %c0_23] : memref<2x3x7xf32, #tpu.memory_space<vmem>>, vector<1x1x7xf32>
    %25 = vector.shape_cast %24 : vector<1x1x7xf32> to vector<7xf32>
    %26 = vector.shape_cast %18 : vector<7xf32> to vector<1x1x7xf32>
    tpu.vector_store %arg8[%c0_21, %c0_22, %c0_23], %26 {strides = array<i32>} : memref<2x3x7xf32, #tpu.memory_space<vmem>>, vector<1x1x7xf32>,
    %27 = vector.extract_strided_slice %23 {offsets = [0, 0], sizes = [7, 1], strides = [1, 1]} : vector<14x1xf32> to vector<7x1xf32>
    %28 = vector.shape_cast %27 : vector<7x1xf32> to vector<7xf32>
    %c0_24 = arith.constant 0 : index
    %c1 = arith.constant 1 : index
    %c0_25 = arith.constant 0 : index
    %29 = vector.load %arg8[%c0_24, %c1, %c0_25] : memref<2x3x7xf32, #tpu.memory_space<vmem>>, vector<1x1x7xf32>
    %30 = vector.shape_cast %29 : vector<1x1x7xf32> to vector<7xf32>
    %31 = vector.shape_cast %28 : vector<7xf32> to vector<1x1x7xf32>
    tpu.vector_store %arg8[%c0_24, %c1, %c0_25], %31 {strides = array<i32>} : memref<2x3x7xf32, #tpu.memory_space<vmem>>, vector<1x1x7xf32>,
    %32 = vector.extract_strided_slice %23 {offsets = [7, 0], sizes = [7, 1], strides = [1, 1]} : vector<14x1xf32> to vector<7x1xf32>
    %33 = vector.shape_cast %32 : vector<7x1xf32> to vector<7xf32>
    %c0_26 = arith.constant 0 : index
    %c2 = arith.constant 2 : index
    %c0_27 = arith.constant 0 : index
    %34 = vector.load %arg8[%c0_26, %c2, %c0_27] : memref<2x3x7xf32, #tpu.memory_space<vmem>>, vector<1x1x7xf32>
    %35 = vector.shape_cast %34 : vector<1x1x7xf32> to vector<7xf32>
    %36 = vector.shape_cast %33 : vector<7xf32> to vector<1x1x7xf32>
    tpu.vector_store %arg8[%c0_26, %c2, %c0_27], %36 {strides = array<i32>} : memref<2x3x7xf32, #tpu.memory_space<vmem>>, vector<1x1x7xf32>,
    %c1_28 = arith.constant 1 : index
    %c0_29 = arith.constant 0 : index
    %c0_30 = arith.constant 0 : index
    %37 = vector.load %arg1[%c1_28, %c0_29, %c0_30] : memref<2x2048x64xf32, #tpu.memory_space<vmem>>, vector<1x2048x64xf32>
    %38 = vector.shape_cast %37 : vector<1x2048x64xf32> to vector<2048x64xf32>
    %39 = arith.truncf %38 : vector<2048x64xf32> to vector<2048x64xbf16>
    %c1_31 = arith.constant 1 : index
    %c0_32 = arith.constant 0 : index
    %c0_33 = arith.constant 0 : index
    %40 = vector.load %arg2[%c1_31, %c0_32, %c0_33] : memref<2x1024x256xf32, #tpu.memory_space<vmem>>, vector<1x1024x256xf32>
    %41 = vector.shape_cast %40 : vector<1x1024x256xf32> to vector<1024x256xf32>
    %42 = arith.truncf %41 : vector<1024x256xf32> to vector<1024x256xbf16>
    %cst_34 = arith.constant dense<0.000000e+00> : vector<7x64xf32>
    %43 = tpu.matmul %0, %39, %cst_34 {dimension_numbers = #tpu.dot_dimension_numbers<[1], [0], [0], [1], [0, 0, 1, 1], [], []>} : vector<7x2048xbf16>, vector<2048x64xbf16>, vector<7x64xf32> -> vector<7x64xf32>
    %44 = vector.broadcast %1 : vector<7x1xf32> to vector<7x64xf32>
    %45 = arith.addf %43, %44 : vector<7x64xf32>
    %cst_35 = arith.constant 0.000000e+00 : f32
    %46 = vector.broadcast %cst_35 : f32 to vector<7x64xf32>
    %47 = arith.maximumf %45, %46 : vector<7x64xf32>
    %cst_36 = arith.constant dense<0.000000e+00> : vector<7xf32>
    %48 = vector.multi_reduction <add>, %47, %cst_36 [1] : vector<7x64xf32> to vector<7xf32>
    %cst_37 = arith.constant 6.400000e+01 : f32
    %49 = vector.broadcast %cst_37 : f32 to vector<7xf32>
    %50 = arith.divf %48, %49 : vector<7xf32>
    %cst_38 = arith.constant dense<0.000000e+00> : vector<56x256xf32>
    %51 = tpu.matmul %2, %42, %cst_38 {dimension_numbers = #tpu.dot_dimension_numbers<[1], [0], [0], [1], [0, 0, 1, 1], [], []>} : vector<56x1024xbf16>, vector<1024x256xbf16>, vector<56x256xf32> -> vector<56x256xf32>
    %cst_39 = arith.constant dense<0xFF800000> : vector<56xf32>
    %52 = vector.multi_reduction <maximumf>, %51, %cst_39 [1] : vector<56x256xf32> to vector<56xf32>
    %53 = vector.shape_cast %52 : vector<56xf32> to vector<56x1xf32>
    %cst_40 = arith.constant dense<0.000000e+00> : vector<14x1xf32>
    %54 = tpu.matmul %3, %53, %cst_40 {dimension_numbers = #tpu.dot_dimension_numbers<[1], [0], [0], [1], [0, 0, 1, 1], [], []>} : vector<14x56xf32>, vector<56x1xf32>, vector<14x1xf32> -> vector<14x1xf32>
    %55 = arith.addf %54, %4 : vector<14x1xf32>
    %c1_41 = arith.constant 1 : index
    %c0_42 = arith.constant 0 : index
    %c0_43 = arith.constant 0 : index
    %56 = vector.load %arg8[%c1_41, %c0_42, %c0_43] : memref<2x3x7xf32, #tpu.memory_space<vmem>>, vector<1x1x7xf32>
    %57 = vector.shape_cast %56 : vector<1x1x7xf32> to vector<7xf32>
    %58 = vector.shape_cast %50 : vector<7xf32> to vector<1x1x7xf32>
    tpu.vector_store %arg8[%c1_41, %c0_42, %c0_43], %58 {strides = array<i32>} : memref<2x3x7xf32, #tpu.memory_space<vmem>>, vector<1x1x7xf32>,
    %59 = vector.extract_strided_slice %55 {offsets = [0, 0], sizes = [7, 1], strides = [1, 1]} : vector<14x1xf32> to vector<7x1xf32>
    %60 = vector.shape_cast %59 : vector<7x1xf32> to vector<7xf32>
    %c1_44 = arith.constant 1 : index
    %c1_45 = arith.constant 1 : index
    %c0_46 = arith.constant 0 : index
    %61 = vector.load %arg8[%c1_44, %c1_45, %c0_46] : memref<2x3x7xf32, #tpu.memory_space<vmem>>, vector<1x1x7xf32>
    %62 = vector.shape_cast %61 : vector<1x1x7xf32> to vector<7xf32>
    %63 = vector.shape_cast %60 : vector<7xf32> to vector<1x1x7xf32>
    tpu.vector_store %arg8[%c1_44, %c1_45, %c0_46], %63 {strides = array<i32>} : memref<2x3x7xf32, #tpu.memory_space<vmem>>, vector<1x1x7xf32>,
    %64 = vector.extract_strided_slice %55 {offsets = [7, 0], sizes = [7, 1], strides = [1, 1]} : vector<14x1xf32> to vector<7x1xf32>
    %65 = vector.shape_cast %64 : vector<7x1xf32> to vector<7xf32>
    %c1_47 = arith.constant 1 : index
    %c2_48 = arith.constant 2 : index
    %c0_49 = arith.constant 0 : index
    %66 = vector.load %arg8[%c1_47, %c2_48, %c0_49] : memref<2x3x7xf32, #tpu.memory_space<vmem>>, vector<1x1x7xf32>
    %67 = vector.shape_cast %66 : vector<1x1x7xf32> to vector<7xf32>
    %68 = vector.shape_cast %65 : vector<7xf32> to vector<1x1x7xf32>
    tpu.vector_store %arg8[%c1_47, %c2_48, %c0_49], %68 {strides = array<i32>} : memref<2x3x7xf32, #tpu.memory_space<vmem>>, vector<1x1x7xf32>,
    return
  }
  func.func @transform_0(%arg0: i32) -> (i32, i32, i32) {
    %c0_i32 = arith.constant 0 : i32
    %c0_i32_0 = arith.constant 0 : i32
    %c0_i32_1 = arith.constant 0 : i32
    return %arg0, %c0_i32, %c0_i32_0 : i32, i32, i32
  }
  func.func @transform_1(%arg0: i32) -> (i32, i32, i32) {
    %c0_i32 = arith.constant 0 : i32
    %c0_i32_0 = arith.constant 0 : i32
    %c0_i32_1 = arith.constant 0 : i32
    return %arg0, %c0_i32, %c0_i32_0 : i32, i32, i32
  }
  func.func @transform_2(%arg0: i32) -> (i32, i32) {
    %c0_i32 = arith.constant 0 : i32
    %c0_i32_0 = arith.constant 0 : i32
    %c0_i32_1 = arith.constant 0 : i32
    return %c0_i32, %c0_i32_0 : i32, i32
  }
  func.func @transform_3(%arg0: i32) -> (i32, i32) {
    %c0_i32 = arith.constant 0 : i32
    %c0_i32_0 = arith.constant 0 : i32
    %c0_i32_1 = arith.constant 0 : i32
    return %c0_i32, %c0_i32_0 : i32, i32
  }
  func.func @transform_4(%arg0: i32) -> (i32, i32) {
    %c0_i32 = arith.constant 0 : i32
    %c0_i32_0 = arith.constant 0 : i32
    %c0_i32_1 = arith.constant 0 : i32
    return %c0_i32, %c0_i32_0 : i32, i32
  }
  func.func @transform_5(%arg0: i32) -> (i32, i32) {
    %c0_i32 = arith.constant 0 : i32
    %c0_i32_0 = arith.constant 0 : i32
    %c0_i32_1 = arith.constant 0 : i32
    return %c0_i32, %c0_i32_0 : i32, i32
  }
  func.func @transform_6(%arg0: i32) -> (i32, i32) {
    %c0_i32 = arith.constant 0 : i32
    %c0_i32_0 = arith.constant 0 : i32
    %c0_i32_1 = arith.constant 0 : i32
    return %c0_i32, %c0_i32_0 : i32, i32
  }
  func.func @transform_7(%arg0: i32) -> (i32, i32, i32) {
    %c0_i32 = arith.constant 0 : i32
    %c0_i32_0 = arith.constant 0 : i32
    %c0_i32_1 = arith.constant 0 : i32
    return %arg0, %c0_i32, %c0_i32_0 : i32, i32, i32
  }
}

</mosaic_0001>

<bundles_post_ra>
// kernel: tpu_custom_call.1
= control target key start
LH: loop header
LB: loop body
LE: loop exit
PB: predicated region body
PF: predicated region fallthrough
CT: control target
= control target key end

     0   :  { %s4370_s24 = smov 0   ;;  %s6200_s0 = inlined_call_operand.vmem [shape: f32[4,2048,64], index: 0, kind: input, shape index: {}]   ;;  %s6201_s1 = inlined_call_operand.vmem [shape: f32[4,1024,256], index: 1, kind: input, shape index: {}]   ;;  %s6202_s2 = inlined_call_operand.vmem [shape: bf16[7,2048], index: 2, kind: input, shape index: {}]   ;;  %s6203_s3 = inlined_call_operand.vmem [shape: f32[7,1], index: 3, kind: input, shape index: {}]   ;;  %s6204_s4 = inlined_call_operand.vmem [shape: bf16[56,1024], index: 4, kind: input, shape index: {}]   ;;  %s6205_s5 = inlined_call_operand.vmem [shape: f32[14,56], index: 5, kind: input, shape index: {}]   ;;  %s6206_s6 = inlined_call_operand.vmem [shape: f32[14,1], index: 6, kind: input, shape index: {}]   ;;  %s6207_s7 = inlined_call_operand.vmem [shape: f32[4,3,7], index: 7, kind: output, shape index: {}]  }
   0x1 LB: > { %s3639_s25 = sadd.s32 4294967295, %s4326_s24   ;;  %p3643_p0 = scmp.ge.s32.totalorder %s4326_s24, 1  ;;  %s4326_s24 = sphi %s4370_s24, %s17_s24  }
   0x2   : > { %p251_p1 = scmp.lt.s32.totalorder %s4326_s24, 3 }
   0x4   : > { %p252_p2 = pnand %p3643_p0, %p251_p1 }
   0x6   : > { %255 = sbr.rel (%p252_p2) target bundleno = 1576 (0x628), region = 48 }
   0xb   : > { %s3644_s26 = sshll.u32 %s3639_s25, 1  ;;  %vm2018_vm0 = vcmask 457728   ;;  %vm1389_vm1 = vcmask 522240   ;;  %vm2053_vm3 = vcmask 49152   ;;  %vm2070_vm4 = vcmask 72712  }
   0xc   : > { %p291_p3 = scmp.lt.s32.totalorder %s3644_s26, 3  ;;  %vm2073_vm5 = vcmask 56327  }
   0xe   : > { %s6416_s26 = smov (!%p291_p3, %s3644_s26), 3 }
   0xf   : > { %s4269_s27 = sshll.u32 %s6416_s26, 11  ;;  %s3651_s9 = sshll.u32 %s6416_s26, 2 }
  0x10   : > { %s4386_s30 = scalar_lea.vmem %s6200_s0, %s4269_s27  ;;  %s4696_s22 = scalar_lea.vmem %s6201_s1, %s4269_s27 }
  0x11   : > { %v365_v0 = vld [vmem:[%s4386_s30 + $0x70] sm:$0xff]  ;;  %v366_v1 = vld [vmem:[%s4386_s30 + $0x78] sm:$0xff]  ;;  %v363_v11 = vld [vmem:[%s4386_s30 + $0x60] sm:$0xff]  ;;  %s308_s12 = scalar_lea.vmem %s6207_s7, %s3651_s9 }
  0x12   : > { %v381_v2 = vld [vmem:[%s4386_s30 + $0xf0] sm:$0xff]  ;;  %v614_v3 = vpack.c.bf16 %v366_v1, %v365_v0  ;;  %v382_v4 = vld [vmem:[%s4386_s30 + $0xf8] sm:$0xff]  ;;  %v364_v13 = vld [vmem:[%s4386_s30 + $0x68] sm:$0xff] }
  0x13   : > { %v397_v5 = vld [vmem:[%s4386_s30 + $0x170] sm:$0xff]  ;;  %v398_v6 = vld [vmem:[%s4386_s30 + $0x178] sm:$0xff]  ;;  %v622_v7 = vpack.c.bf16 %v382_v4, %v381_v2  ;;  %v379_v14 = vld [vmem:[%s4386_s30 + $0xe0] sm:$0xff]  ;;  %v613_v16 = vpack.c.bf16 %v364_v13, %v363_v11 }
  0x14   : > { %v630_v8 = vpack.c.bf16 %v398_v6, %v397_v5  ;;  %v413_v9 = vld [vmem:[%s4386_s30 + $0x1f0] sm:$0xff]  ;;  %v414_v10 = vld [vmem:[%s4386_s30 + $0x1f8] sm:$0xff]  ;;  %1180 = vmatpush.bf16.msra.mxu0 %v614_v3  ;;  %v380_v15 = vld [vmem:[%s4386_s30 + $0xe8] sm:$0xff] }
  0x15   : > { %v638_v12 = vpack.c.bf16 %v414_v10, %v413_v9  ;;  %1193 = vmatpush.bf16.msra.mxu1 %v622_v7  ;;  %v621_v17 = vpack.c.bf16 %v380_v15, %v379_v14  ;;  %v395_v18 = vld [vmem:[%s4386_s30 + $0x160] sm:$0xff]  ;;  %v396_v19 = vld [vmem:[%s4386_s30 + $0x168] sm:$0xff]  ;;  %v361_v23 = vld [vmem:[%s4386_s30 + $0x50] sm:$0xff] }
  0x16   : > { %1206 = vmatpush.bf16.msra.mxu2 %v630_v8  ;;  %v411_v20 = vld [vmem:[%s4386_s30 + $0x1e0] sm:$0xff]  ;;  %v629_v21 = vpack.c.bf16 %v396_v19, %v395_v18  ;;  %v412_v22 = vld [vmem:[%s4386_s30 + $0x1e8] sm:$0xff]  ;;  %v362_v24 = vld [vmem:[%s4386_s30 + $0x58] sm:$0xff] }
  0x17   : > { %1219 = vmatpush.bf16.msra.mxu3 %v638_v12  ;;  %v637_v25 = vpack.c.bf16 %v412_v22, %v411_v20  ;;  %v377_v26 = vld [vmem:[%s4386_s30 + $0xd0] sm:$0xff]  ;;  %v378_v27 = vld [vmem:[%s4386_s30 + $0xd8] sm:$0xff]  ;;  %v612_v29 = vpack.c.bf16 %v362_v24, %v361_v23  ;;  %v359_v35 = vld [vmem:[%s4386_s30 + $0x40] sm:$0xff] }
  0x18   : > { %v393_v28 = vld [vmem:[%s4386_s30 + $0x150] sm:$0xff]  ;;  %1181 = vmatpush.bf16.msra.mxu0 %v613_v16  ;;  %v394_v30 = vld [vmem:[%s4386_s30 + $0x158] sm:$0xff]  ;;  %v620_v33 = vpack.c.bf16 %v378_v27, %v377_v26  ;;  %v360_v36 = vld [vmem:[%s4386_s30 + $0x48] sm:$0xff] }
  0x19   : > { %v409_v31 = vld [vmem:[%s4386_s30 + $0x1d0] sm:$0xff]  ;;  %v410_v32 = vld [vmem:[%s4386_s30 + $0x1d8] sm:$0xff]  ;;  %1194 = vmatpush.bf16.msra.mxu1 %v621_v17  ;;  %v628_v34 = vpack.c.bf16 %v394_v30, %v393_v28  ;;  %v375_v37 = vld [vmem:[%s4386_s30 + $0xc0] sm:$0xff]  ;;  %v611_v44 = vpack.c.bf16 %v360_v36, %v359_v35 }
  0x1a   : > { %1207 = vmatpush.bf16.msra.mxu2 %v629_v21  ;;  %v636_v38 = vpack.c.bf16 %v410_v32, %v409_v31  ;;  %v376_v39 = vld [vmem:[%s4386_s30 + $0xc8] sm:$0xff]  ;;  %v391_v40 = vld [vmem:[%s4386_s30 + $0x140] sm:$0xff]  ;;  %v357_v47 = vld [vmem:[%s4386_s30 + $0x30] sm:$0xff] }
  0x1b   : > { %1220 = vmatpush.bf16.msra.mxu3 %v637_v25  ;;  %v392_v41 = vld [vmem:[%s4386_s30 + $0x148] sm:$0xff]  ;;  %v407_v42 = vld [vmem:[%s4386_s30 + $0x1c0] sm:$0xff]  ;;  %v619_v45 = vpack.c.bf16 %v376_v39, %v375_v37  ;;  %v358_v48 = vld [vmem:[%s4386_s30 + $0x38] sm:$0xff] }
  0x1c   : > { %v408_v43 = vld [vmem:[%s4386_s30 + $0x1c8] sm:$0xff]  ;;  %1182 = vmatpush.bf16.msra.mxu0 %v612_v29  ;;  %v627_v46 = vpack.c.bf16 %v392_v41, %v391_v40  ;;  %v373_v49 = vld [vmem:[%s4386_s30 + $0xb0] sm:$0xff]  ;;  %v374_v51 = vld [vmem:[%s4386_s30 + $0xb8] sm:$0xff]  ;;  %v610_v56 = vpack.c.bf16 %v358_v48, %v357_v47 }
  0x1d   : > { %1195 = vmatpush.bf16.msra.mxu1 %v620_v33  ;;  %v635_v50 = vpack.c.bf16 %v408_v43, %v407_v42  ;;  %v389_v52 = vld [vmem:[%s4386_s30 + $0x130] sm:$0xff]  ;;  %v390_v53 = vld [vmem:[%s4386_s30 + $0x138] sm:$0xff]  ;;  %v618_v57 = vpack.c.bf16 %v374_v51, %v373_v49  ;;  %v355_v59 = vld [vmem:[%s4386_s30 + $0x20] sm:$0xff] }
  0x1e   : > { %1208 = vmatpush.bf16.msra.mxu2 %v628_v34  ;;  %v405_v54 = vld [vmem:[%s4386_s30 + $0x1b0] sm:$0xff]  ;;  %v406_v55 = vld [vmem:[%s4386_s30 + $0x1b8] sm:$0xff]  ;;  %v626_v58 = vpack.c.bf16 %v390_v53, %v389_v52  ;;  %v356_v60 = vld [vmem:[%s4386_s30 + $0x28] sm:$0xff] }
  0x1f   : > { %1221 = vmatpush.bf16.msra.mxu3 %v636_v38  ;;  %v371_v61 = vld [vmem:[%s4386_s30 + $0xa0] sm:$0xff]  ;;  %v634_v62 = vpack.c.bf16 %v406_v55, %v405_v54  ;;  %v372_v63 = vld [vmem:[%s4386_s30 + $0xa8] sm:$0xff]  ;;  %v609_v4 = vpack.c.bf16 %v356_v60, %v355_v59  ;;  %v353_v7 = vld [vmem:[%s4386_s30 + $0x10] sm:$0xff] }
  0x20   : > { %1183 = vmatpush.bf16.msra.mxu0 %v611_v44  ;;  %v387_v0 = vld [vmem:[%s4386_s30 + $0x120] sm:$0xff]  ;;  %v388_v1 = vld [vmem:[%s4386_s30 + $0x128] sm:$0xff]  ;;  %v617_v5 = vpack.c.bf16 %v372_v63, %v371_v61  ;;  %v354_v8 = vld [vmem:[%s4386_s30 + $0x18] sm:$0xff] }
  0x21   : > { %1196 = vmatpush.bf16.msra.mxu1 %v619_v45  ;;  %v403_v2 = vld [vmem:[%s4386_s30 + $0x1a0] sm:$0xff]  ;;  %v404_v3 = vld [vmem:[%s4386_s30 + $0x1a8] sm:$0xff]  ;;  %v625_v6 = vpack.c.bf16 %v388_v1, %v387_v0  ;;  %v369_v9 = vld [vmem:[%s4386_s30 + $0x90] sm:$0xff]  ;;  %v608_v16 = vpack.c.bf16 %v354_v8, %v353_v7 }
  0x22   : > { %1209 = vmatpush.bf16.msra.mxu2 %v627_v46  ;;  %v633_v10 = vpack.c.bf16 %v404_v3, %v403_v2  ;;  %v370_v11 = vld [vmem:[%s4386_s30 + $0x98] sm:$0xff]  ;;  %v385_v12 = vld [vmem:[%s4386_s30 + $0x110] sm:$0xff]  ;;  %v351_v17 = vld [vmem:[%s4386_s30] sm:$0xff] }
  0x23   : > { %1222 = vmatpush.bf16.msra.mxu3 %v635_v50  ;;  %v386_v13 = vld [vmem:[%s4386_s30 + $0x118] sm:$0xff]  ;;  %v401_v14 = vld [vmem:[%s4386_s30 + $0x190] sm:$0xff]  ;;  %v352_v18 = vld [vmem:[%s4386_s30 + $0x8] sm:$0xff]  ;;  %v616_v19 = vpack.c.bf16 %v370_v11, %v369_v9 }
  0x24   : > { %1184 = vmatpush.bf16.msra.mxu0 %v610_v56  ;;  %v402_v15 = vld [vmem:[%s4386_s30 + $0x198] sm:$0xff]  ;;  %v624_v20 = vpack.c.bf16 %v386_v13, %v385_v12  ;;  %v367_v21 = vld [vmem:[%s4386_s30 + $0x80] sm:$0xff]  ;;  %v368_v22 = vld [vmem:[%s4386_s30 + $0x88] sm:$0xff]  ;;  %v607_v31 = vpack.c.bf16 %v352_v18, %v351_v17 }
  0x25   : > { %1197 = vmatpush.bf16.msra.mxu1 %v618_v57  ;;  %v383_v23 = vld [vmem:[%s4386_s30 + $0x100] sm:$0xff]  ;;  %v632_v24 = vpack.c.bf16 %v402_v15, %v401_v14  ;;  %v384_v25 = vld [vmem:[%s4386_s30 + $0x108] sm:$0xff]  ;;  %v429_v28 = vld [vmem:[%s4386_s30 + $0x270] sm:$0xff]  ;;  %v615_v35 = vpack.c.bf16 %v368_v22, %v367_v21 }
  0x26   : > { %1210 = vmatpush.bf16.msra.mxu2 %v626_v58  ;;  %v399_v26 = vld [vmem:[%s4386_s30 + $0x180] sm:$0xff]  ;;  %v400_v27 = vld [vmem:[%s4386_s30 + $0x188] sm:$0xff]  ;;  %v430_v29 = vld [vmem:[%s4386_s30 + $0x278] sm:$0xff]  ;;  %v623_v36 = vpack.c.bf16 %v384_v25, %v383_v23 }
  0x27   : > { %1223 = vmatpush.bf16.msra.mxu3 %v634_v62  ;;  %v445_v30 = vld [vmem:[%s4386_s30 + $0x2f0] sm:$0xff]  ;;  %v446_v32 = vld [vmem:[%s4386_s30 + $0x2f8] sm:$0xff]  ;;  %v631_v39 = vpack.c.bf16 %v400_v27, %v399_v26  ;;  %v646_v40 = vpack.c.bf16 %v430_v29, %v429_v28  ;;  %v427_v43 = vld [vmem:[%s4386_s30 + $0x260] sm:$0xff] }
  0x28   : > { %1185 = vmatpush.bf16.msra.mxu0 %v609_v4  ;;  %v461_v33 = vld [vmem:[%s4386_s30 + $0x370] sm:$0xff]  ;;  %v462_v34 = vld [vmem:[%s4386_s30 + $0x378] sm:$0xff]  ;;  %v654_v41 = vpack.c.bf16 %v446_v32, %v445_v30  ;;  %v428_v44 = vld [vmem:[%s4386_s30 + $0x268] sm:$0xff] }
  0x29   : > { %1198 = vmatpush.bf16.msra.mxu1 %v617_v5  ;;  %v477_v37 = vld [vmem:[%s4386_s30 + $0x3f0] sm:$0xff]  ;;  %v478_v38 = vld [vmem:[%s4386_s30 + $0x3f8] sm:$0xff]  ;;  %v662_v42 = vpack.c.bf16 %v462_v34, %v461_v33  ;;  %v443_v45 = vld [vmem:[%s4386_s30 + $0x2e0] sm:$0xff]  ;;  %v645_v52 = vpack.c.bf16 %v428_v44, %v427_v43 }
  0x2a   : > { %1211 = vmatpush.bf16.msra.mxu2 %v625_v6  ;;  %v670_v46 = vpack.c.bf16 %v478_v38, %v477_v37  ;;  %v444_v47 = vld [vmem:[%s4386_s30 + $0x2e8] sm:$0xff]  ;;  %v459_v48 = vld [vmem:[%s4386_s30 + $0x360] sm:$0xff]  ;;  %v425_v53 = vld [vmem:[%s4386_s30 + $0x250] sm:$0xff] }
  0x2b   : > { %1224 = vmatpush.bf16.msra.mxu3 %v633_v10  ;;  %v460_v49 = vld [vmem:[%s4386_s30 + $0x368] sm:$0xff]  ;;  %v475_v50 = vld [vmem:[%s4386_s30 + $0x3e0] sm:$0xff]  ;;  %v653_v54 = vpack.c.bf16 %v444_v47, %v443_v45  ;;  %v426_v56 = vld [vmem:[%s4386_s30 + $0x258] sm:$0xff] }
  0x2c   : > { %1186 = vmatpush.bf16.msra.mxu0 %v608_v16  ;;  %v476_v51 = vld [vmem:[%s4386_s30 + $0x3e8] sm:$0xff]  ;;  %v661_v55 = vpack.c.bf16 %v460_v49, %v459_v48  ;;  %v441_v57 = vld [vmem:[%s4386_s30 + $0x2d0] sm:$0xff]  ;;  %v442_v58 = vld [vmem:[%s4386_s30 + $0x2d8] sm:$0xff]  ;;  %v644_v0 = vpack.c.bf16 %v426_v56, %v425_v53 }
  0x2d   : > { %1199 = vmatpush.bf16.msra.mxu1 %v616_v19  ;;  %v669_v59 = vpack.c.bf16 %v476_v51, %v475_v50  ;;  %v457_v60 = vld [vmem:[%s4386_s30 + $0x350] sm:$0xff]  ;;  %v458_v61 = vld [vmem:[%s4386_s30 + $0x358] sm:$0xff]  ;;  %v652_v1 = vpack.c.bf16 %v442_v58, %v441_v57  ;;  %v311_v2 = vld [vmem:[%s6202_s2 + $0x8] sm:$0xff] }
  0x2e   : > { %1212 = vmatpush.bf16.msra.mxu2 %v624_v20  ;;  %v473_v62 = vld [vmem:[%s4386_s30 + $0x3d0] sm:$0xff]  ;;  %v474_v63 = vld [vmem:[%s4386_s30 + $0x3d8] sm:$0xff]  ;;  %v310_v3 = vld [vmem:[%s6202_s2] sm:$0xff]  ;;  %v660_v4 = vpack.c.bf16 %v458_v61, %v457_v60  ;;  %v1134_v8 = vunpack.c.l.b16 %v311_v2  ;;  %v1135_v10 = vunpack.c.h.b16 %v311_v2 }
  0x2f   : > { %1225 = vmatpush.bf16.msra.mxu3 %v632_v24  ;;  %v423_v5 = vld [vmem:[%s4386_s30 + $0x240] sm:$0xff]  ;;  %v424_v6 = vld [vmem:[%s4386_s30 + $0x248] sm:$0xff]  ;;  %v1132_v9 = vunpack.c.l.b16 %v310_v3  ;;  %v668_v11 = vpack.c.bf16 %v474_v63, %v473_v62  ;;  %v1133_v15 = vunpack.c.h.b16 %v310_v3  ;;  %v421_v25 = vld [vmem:[%s4386_s30 + $0x230] sm:$0xff] }
  0x30   : > { %1187 = vmatpush.bf16.msra.mxu0 %v607_v31  ;;  %v439_v7 = vld [vmem:[%s4386_s30 + $0x2c0] sm:$0xff]  ;;  %v440_v12 = vld [vmem:[%s4386_s30 + $0x2c8] sm:$0xff]  ;;  %v4490_v18 = vpack.c.b16 %v1134_v8, %v1134_v8  ;;  %v4494_v20 = vpack.c.b16 %v1135_v10, %v1135_v10  ;;  %v643_v21 = vpack.c.bf16 %v424_v6, %v423_v5  ;;  %v422_v26 = vld [vmem:[%s4386_s30 + $0x238] sm:$0xff] }
  0x31   : > { %1200 = vmatpush.bf16.msra.mxu1 %v615_v35  ;;  %v455_v13 = vld [vmem:[%s4386_s30 + $0x340] sm:$0xff]  ;;  %v456_v14 = vld [vmem:[%s4386_s30 + $0x348] sm:$0xff]  ;;  %v4492_v19 = vpack.c.b16 %v1132_v9, %v1132_v9  ;;  %v4496_v22 = vpack.c.b16 %v1133_v15, %v1133_v15  ;;  %v651_v23 = vpack.c.bf16 %v440_v12, %v439_v7  ;;  %v437_v27 = vld [vmem:[%s4386_s30 + $0x2b0] sm:$0xff]  ;;  %v642_v34 = vpack.c.bf16 %v422_v26, %v421_v25 }
  0x32   : > { %1213 = vmatpush.bf16.msra.mxu2 %v623_v36  ;;  %v471_v16 = vld [vmem:[%s4386_s30 + $0x3c0] sm:$0xff]  ;;  %v472_v17 = vld [vmem:[%s4386_s30 + $0x3c8] sm:$0xff]  ;;  %6287 = vst [vmem:[#allocation2_spill] sm:$0xff] %v4490_v18  ;;  %v659_v24 = vpack.c.bf16 %v456_v14, %v455_v13  ;;  %v438_v29 = vld [vmem:[%s4386_s30 + $0x2b8] sm:$0xff] }
  0x33   : > { %1226 = vmatpush.bf16.msra.mxu3 %v631_v39  ;;  %6288 = vst [vmem:[#allocation3_spill] sm:$0xff] %v4492_v19  ;;  %v667_v28 = vpack.c.bf16 %v472_v17, %v471_v16  ;;  %v453_v30 = vld [vmem:[%s4386_s30 + $0x330] sm:$0xff]  ;;  %v454_v31 = vld [vmem:[%s4386_s30 + $0x338] sm:$0xff]  ;;  %1188 = vmatmul.bf16.vlgmr.msra.gmra.mxu0 %v4492_v19  ;;  %v650_v35 = vpack.c.bf16 %v438_v29, %v437_v27  ;;  %v419_v37 = vld [vmem:[%s4386_s30 + $0x220] sm:$0xff] }
  0x34   : > { %1232 = vmatpush.bf16.msrb.mxu0 %v646_v40  ;;  %6289 = vst [vmem:[#allocation4_spill] sm:$0xff] %v4494_v20  ;;  %v469_v32 = vld [vmem:[%s4386_s30 + $0x3b0] sm:$0xff]  ;;  %v470_v33 = vld [vmem:[%s4386_s30 + $0x3b8] sm:$0xff]  ;;  %1201 = vmatmul.bf16.vlgmr.msra.gmra.mxu1 %v4496_v22  ;;  %v658_v36 = vpack.c.bf16 %v454_v31, %v453_v30  ;;  %v420_v38 = vld [vmem:[%s4386_s30 + $0x228] sm:$0xff] }
  0x35   : > { %1245 = vmatpush.bf16.msrb.mxu1 %v654_v41  ;;  %1214 = vmatmul.bf16.vlgmr.msra.gmra.mxu2 %v4490_v18  ;;  %v435_v39 = vld [vmem:[%s4386_s30 + $0x2a0] sm:$0xff]  ;;  %v666_v40 = vpack.c.bf16 %v470_v33, %v469_v32  ;;  %v436_v41 = vld [vmem:[%s4386_s30 + $0x2a8] sm:$0xff]  ;;  %v417_v49 = vld [vmem:[%s4386_s30 + $0x210] sm:$0xff] }
  0x36   : > { %1258 = vmatpush.bf16.msrb.mxu2 %v662_v42  ;;  %1227 = vmatmul.bf16.vlgmr.msra.gmra.mxu3 %v4494_v20  ;;  %v451_v42 = vld [vmem:[%s4386_s30 + $0x320] sm:$0xff]  ;;  %v452_v43 = vld [vmem:[%s4386_s30 + $0x328] sm:$0xff]  ;;  %v649_v47 = vpack.c.bf16 %v436_v41, %v435_v39  ;;  %v418_v50 = vld [vmem:[%s4386_s30 + $0x218] sm:$0xff] }
  0x37   : > { %1271 = vmatpush.bf16.msrb.mxu3 %v670_v46  ;;  %v467_v44 = vld [vmem:[%s4386_s30 + $0x3a0] sm:$0xff]  ;;  %v468_v45 = vld [vmem:[%s4386_s30 + $0x3a8] sm:$0xff]  ;;  %v641_v46 = vpack.c.bf16 %v420_v38, %v419_v37  ;;  %v657_v48 = vpack.c.bf16 %v452_v43, %v451_v42  ;;  %v433_v51 = vld [vmem:[%s4386_s30 + $0x290] sm:$0xff]  ;;  %v640_v58 = vpack.c.bf16 %v418_v50, %v417_v49 }
  0x38   : > { %1233 = vmatpush.bf16.msrb.mxu0 %v645_v52  ;;  %v665_v52 = vpack.c.bf16 %v468_v45, %v467_v44  ;;  %v434_v53 = vld [vmem:[%s4386_s30 + $0x298] sm:$0xff]  ;;  %v465_v56 = vld [vmem:[%s4386_s30 + $0x390] sm:$0xff]  ;;  %v416_v60 = vld [vmem:[%s4386_s30 + $0x208] sm:$0xff] }
  0x39   : > { %1246 = vmatpush.bf16.msrb.mxu1 %v653_v54  ;;  %v449_v54 = vld [vmem:[%s4386_s30 + $0x310] sm:$0xff]  ;;  %v466_v57 = vld [vmem:[%s4386_s30 + $0x398] sm:$0xff]  ;;  %v431_v61 = vld [vmem:[%s4386_s30 + $0x280] sm:$0xff]  ;;  %v648_v62 = vpack.c.bf16 %v434_v53, %v433_v51 }
  0x3a   : > { %1259 = vmatpush.bf16.msrb.mxu2 %v661_v55  ;;  %v450_v55 = vld [vmem:[%s4386_s30 + $0x318] sm:$0xff]  ;;  %v448_v2 = vld [vmem:[%s4386_s30 + $0x308] sm:$0xff]  ;;  %v664_v3 = vpack.c.bf16 %v466_v57, %v465_v56  ;;  %v493_v6 = vld [vmem:[%s4386_s30 + $0x470] sm:$0xff] }
  0x3b   : > { %1272 = vmatpush.bf16.msrb.mxu3 %v669_v59  ;;  %v415_v59 = vld [vmem:[%s4386_s30 + $0x200] sm:$0xff]  ;;  %v656_v63 = vpack.c.bf16 %v450_v55, %v449_v54  ;;  %v464_v5 = vld [vmem:[%s4386_s30 + $0x388] sm:$0xff]  ;;  %v494_v7 = vld [vmem:[%s4386_s30 + $0x478] sm:$0xff] }
  0x3c   : > { %1234 = vmatpush.bf16.msrb.mxu0 %v644_v0  ;;  %v432_v0 = vld [vmem:[%s4386_s30 + $0x288] sm:$0xff]  ;;  %v509_v8 = vld [vmem:[%s4386_s30 + $0x4f0] sm:$0xff]  ;;  %v510_v9 = vld [vmem:[%s4386_s30 + $0x4f8] sm:$0xff]  ;;  %v639_v10 = vpack.c.bf16 %v416_v60, %v415_v59 }
  0x3d   : > { %1247 = vmatpush.bf16.msrb.mxu1 %v652_v1  ;;  %v447_v1 = vld [vmem:[%s4386_s30 + $0x300] sm:$0xff]  ;;  %v526_v12 = vld [vmem:[%s4386_s30 + $0x578] sm:$0xff]  ;;  %v647_v13 = vpack.c.bf16 %v432_v0, %v431_v61  ;;  %v541_v15 = vld [vmem:[%s4386_s30 + $0x5f0] sm:$0xff] }
  0x3e   : > { %1260 = vmatpush.bf16.msrb.mxu2 %v660_v4  ;;  %v463_v4 = vld [vmem:[%s4386_s30 + $0x380] sm:$0xff]  ;;  %v655_v14 = vpack.c.bf16 %v448_v2, %v447_v1  ;;  %v542_v16 = vld [vmem:[%s4386_s30 + $0x5f8] sm:$0xff]  ;;  %v312_v25 = vld [vmem:[%s6202_s2 + $0x10] sm:$0xff] }
  0x3f   : > { %1273 = vmatpush.bf16.msrb.mxu3 %v668_v11  ;;  %v525_v11 = vld [vmem:[%s4386_s30 + $0x570] sm:$0xff]  ;;  %v663_v17 = vpack.c.bf16 %v464_v5, %v463_v4  ;;  %v491_v27 = vld [vmem:[%s4386_s30 + $0x460] sm:$0xff]  ;;  %v1136_v31 = vunpack.c.l.b16 %v312_v25  ;;  %v702_v33 = vpack.c.bf16 %v542_v16, %v541_v15  ;;  %v1137_v37 = vunpack.c.h.b16 %v312_v25  ;;  %v540_v39 = vld [vmem:[%s4386_s30 + $0x5e8] sm:$0xff] }
  0x40   : > { %1235 = vmatpush.bf16.msrb.mxu0 %v643_v21  ;;  %v678_v21 = vpack.c.bf16 %v494_v7, %v493_v6  ;;  %v694_v26 = vpack.c.bf16 %v526_v12, %v525_v11  ;;  %v507_v29 = vld [vmem:[%s4386_s30 + $0x4e0] sm:$0xff]  ;;  %v506_v51 = vld [vmem:[%s4386_s30 + $0x4d8] sm:$0xff]  ;;  %v537_v54 = vld [vmem:[%s4386_s30 + $0x5d0] sm:$0xff] }
  0x41   : > { %1248 = vmatpush.bf16.msrb.mxu1 %v651_v23  ;;  %v686_v23 = vpack.c.bf16 %v510_v9, %v509_v8  ;;  %v539_v38 = vld [vmem:[%s4386_s30 + $0x5e0] sm:$0xff]  ;;  %v4558_v41 = vpack.c.b16 %v1136_v31, %v1136_v31  ;;  %v4565_v49 = vpack.c.b16 %v1137_v37, %v1137_v37  ;;  %v522_v53 = vld [vmem:[%s4386_s30 + $0x558] sm:$0xff]  ;;  %v488_v60 = vld [vmem:[%s4386_s30 + $0x448] sm:$0xff] }
  0x42   : > { %1261 = vmatpush.bf16.msrb.mxu2 %v659_v24  ;;  %v313_v24 = vld [vmem:[%s6202_s2 + $0x18] sm:$0xff]  ;;  %v701_v50 = vpack.c.bf16 %v540_v39, %v539_v38  ;;  %v487_v59 = vld [vmem:[%s4386_s30 + $0x440] sm:$0xff]  ;;  %v520_v1 = vld [vmem:[%s4386_s30 + $0x548] sm:$0xff] }
  0x43   : > { %1274 = vmatpush.bf16.msrb.mxu3 %v667_v28  ;;  %v492_v28 = vld [vmem:[%s4386_s30 + $0x468] sm:$0xff]  ;;  %v1138_v30 = vunpack.c.l.b16 %v313_v24  ;;  %v1139_v32 = vunpack.c.h.b16 %v313_v24  ;;  %6291 = vst [vmem:[#allocation6_spill] sm:$0xff] %v4558_v41  ;;  %v538_v55 = vld [vmem:[%s4386_s30 + $0x5d8] sm:$0xff]  ;;  %v503_v61 = vld [vmem:[%s4386_s30 + $0x4c0] sm:$0xff]  ;;  %v675_v4 = vpack.c.bf16 %v488_v60, %v487_v59 }
  0x44   : > { %1236 = vmatpush.bf16.msrb.mxu0 %v642_v34  ;;  %v508_v34 = vld [vmem:[%s4386_s30 + $0x4e8] sm:$0xff]  ;;  %v677_v43 = vpack.c.bf16 %v492_v28, %v491_v27  ;;  %6293 = vst [vmem:[#allocation8_spill] sm:$0xff] %v4565_v49  ;;  %v519_v0 = vld [vmem:[%s4386_s30 + $0x540] sm:$0xff]  ;;  %v485_v7 = vld [vmem:[%s4386_s30 + $0x430] sm:$0xff] }
  0x45   : > { %1249 = vmatpush.bf16.msrb.mxu1 %v650_v35  ;;  %v523_v35 = vld [vmem:[%s4386_s30 + $0x560] sm:$0xff]  ;;  %v4560_v42 = vpack.c.b16 %v1139_v32, %v1139_v32  ;;  %v685_v44 = vpack.c.bf16 %v508_v34, %v507_v29  ;;  %v691_v6 = vpack.c.bf16 %v520_v1, %v519_v0  ;;  %v486_v8 = vld [vmem:[%s4386_s30 + $0x438] sm:$0xff]  ;;  %v501_v9 = vld [vmem:[%s4386_s30 + $0x4b0] sm:$0xff] }
  0x46   : > { %1262 = vmatpush.bf16.msrb.mxu2 %v658_v36  ;;  %v524_v36 = vld [vmem:[%s4386_s30 + $0x568] sm:$0xff]  ;;  %v535_v2 = vld [vmem:[%s4386_s30 + $0x5c0] sm:$0xff]  ;;  %v502_v11 = vld [vmem:[%s4386_s30 + $0x4b8] sm:$0xff]  ;;  %v674_v16 = vpack.c.bf16 %v486_v8, %v485_v7 }
  0x47   : > { %1275 = vmatpush.bf16.msrb.mxu3 %v666_v40  ;;  %v4556_v40 = vpack.c.b16 %v1138_v30, %v1138_v30  ;;  %6292 = vst [vmem:[#allocation7_spill] sm:$0xff] %v4560_v42  ;;  %v693_v45 = vpack.c.bf16 %v524_v36, %v523_v35  ;;  %v517_v12 = vld [vmem:[%s4386_s30 + $0x530] sm:$0xff]  ;;  %v534_v15 = vld [vmem:[%s4386_s30 + $0x5b8] sm:$0xff]  ;;  %v484_v24 = vld [vmem:[%s4386_s30 + $0x428] sm:$0xff] }
  0x48   : > { %1237 = vmatpush.bf16.msrb.mxu0 %v641_v46  ;;  %v489_v46 = vld [vmem:[%s4386_s30 + $0x450] sm:$0xff]  ;;  %v499_v25 = vld [vmem:[%s4386_s30 + $0x4a0] sm:$0xff]  ;;  %v500_v27 = vld [vmem:[%s4386_s30 + $0x4a8] sm:$0xff] }
  0x49   : > { %1250 = vmatpush.bf16.msrb.mxu1 %v649_v47  ;;  %6290 = vst [vmem:[#allocation5_spill] sm:$0xff] %v4556_v40  ;;  %v490_v47 = vld [vmem:[%s4386_s30 + $0x458] sm:$0xff]  ;;  %v515_v28 = vld [vmem:[%s4386_s30 + $0x520] sm:$0xff]  ;;  %v516_v29 = vld [vmem:[%s4386_s30 + $0x528] sm:$0xff] }
  0x4a   : > { %1263 = vmatpush.bf16.msrb.mxu2 %v657_v48  ;;  %v505_v48 = vld [vmem:[%s4386_s30 + $0x4d0] sm:$0xff]  ;;  %v676_v56 = vpack.c.bf16 %v490_v47, %v489_v46  ;;  %v531_v30 = vld [vmem:[%s4386_s30 + $0x5a0] sm:$0xff]  ;;  %v532_v31 = vld [vmem:[%s4386_s30 + $0x5a8] sm:$0xff]  ;;  %v689_v34 = vpack.c.bf16 %v516_v29, %v515_v28 }
  0x4b   : > { %1276 = vmatpush.bf16.msrb.mxu3 %v665_v52  ;;  %v521_v52 = vld [vmem:[%s4386_s30 + $0x550] sm:$0xff]  ;;  %v684_v57 = vpack.c.bf16 %v506_v51, %v505_v48  ;;  %v482_v36 = vld [vmem:[%s4386_s30 + $0x418] sm:$0xff]  ;;  %v697_v38 = vpack.c.bf16 %v532_v31, %v531_v30  ;;  %v479_v47 = vld [vmem:[%s4386_s30 + $0x400] sm:$0xff] }
  0x4c   : > { %1238 = vmatpush.bf16.msrb.mxu0 %v640_v58  ;;  %v692_v58 = vpack.c.bf16 %v522_v53, %v521_v52  ;;  %v481_v35 = vld [vmem:[%s4386_s30 + $0x410] sm:$0xff]  ;;  %v498_v39 = vld [vmem:[%s4386_s30 + $0x498] sm:$0xff]  ;;  %v495_v51 = vld [vmem:[%s4386_s30 + $0x480] sm:$0xff] }
  0x4d   : > { %1251 = vmatpush.bf16.msrb.mxu1 %v648_v62  ;;  %v700_v62 = vpack.c.bf16 %v538_v55, %v537_v54  ;;  %v497_v37 = vld [vmem:[%s4386_s30 + $0x490] sm:$0xff]  ;;  %v530_v46 = vld [vmem:[%s4386_s30 + $0x598] sm:$0xff]  ;;  %v672_v48 = vpack.c.bf16 %v482_v36, %v481_v35  ;;  %v496_v52 = vld [vmem:[%s4386_s30 + $0x488] sm:$0xff] }
  0x4e   : > { %1264 = vmatpush.bf16.msrb.mxu2 %v656_v63  ;;  %v504_v63 = vld [vmem:[%s4386_s30 + $0x4c8] sm:$0xff]  ;;  %v680_v53 = vpack.c.bf16 %v498_v39, %v497_v37  ;;  %v511_v55 = vld [vmem:[%s4386_s30 + $0x500] sm:$0xff]  ;;  %v573_v0 = vld [vmem:[%s4386_s30 + $0x6f0] sm:$0xff] }
  0x4f   : > { %1277 = vmatpush.bf16.msrb.mxu3 %v664_v3  ;;  %v536_v3 = vld [vmem:[%s4386_s30 + $0x5c8] sm:$0xff]  ;;  %v683_v5 = vpack.c.bf16 %v504_v63, %v503_v61  ;;  %v527_v59 = vld [vmem:[%s4386_s30 + $0x580] sm:$0xff]  ;;  %v558_v63 = vld [vmem:[%s4386_s30 + $0x678] sm:$0xff] }
  0x50   : > { %1239 = vmatpush.bf16.msrb.mxu0 %v639_v10  ;;  %v699_v10 = vpack.c.bf16 %v536_v3, %v535_v2  ;;  %v528_v60 = vld [vmem:[%s4386_s30 + $0x588] sm:$0xff]  ;;  %v314_v61 = vld [vmem:[%s6202_s2 + $0x20] sm:$0xff]  ;;  %v574_v2 = vld [vmem:[%s4386_s30 + $0x6f8] sm:$0xff] }
  0x51   : > { %1252 = vmatpush.bf16.msrb.mxu1 %v647_v13  ;;  %v518_v13 = vld [vmem:[%s4386_s30 + $0x538] sm:$0xff]  ;;  %v589_v3 = vld [vmem:[%s4386_s30 + $0x770] sm:$0xff]  ;;  %v603_v29 = vld [vmem:[%s4386_s30 + $0x7e0] sm:$0xff] }
  0x52   : > { %1265 = vmatpush.bf16.msrb.mxu2 %v655_v14  ;;  %v533_v14 = vld [vmem:[%s4386_s30 + $0x5b0] sm:$0xff]  ;;  %v604_v30 = vld [vmem:[%s4386_s30 + $0x7e8] sm:$0xff]  ;;  %v770_v20 = vld [vmem:[%s4696_s22 + $0x118] sm:$0xff] }
  0x53   : > { %1278 = vmatpush.bf16.msrb.mxu3 %v663_v17  ;;  %1240 = vmatmul.bf16.vlgmr.msrb.gmra.mxu0 %v4558_v41  ;;  %v682_v17 = vpack.c.bf16 %v502_v11, %v501_v9  ;;  %v605_v8 = vld [vmem:[%s4386_s30 + $0x7f0] sm:$0xff]  ;;  %v606_v9 = vld [vmem:[%s4386_s30 + $0x7f8] sm:$0xff] }
  0x54   : > { %1284 = vmatpush.bf16.msra.mxu0 %v678_v21  ;;  %1253 = vmatmul.bf16.vlgmr.msrb.gmra.mxu1 %v4565_v49  ;;  %v690_v21 = vpack.c.bf16 %v518_v13, %v517_v12  ;;  %v695_v12 = vpack.c.bf16 %v528_v60, %v527_v59  ;;  %v553_v37 = vld [vmem:[%s4386_s30 + $0x650] sm:$0xff]  ;;  %v584_v59 = vld [vmem:[%s4386_s30 + $0x748] sm:$0xff]  ;;  %v599_v60 = vld [vmem:[%s4386_s30 + $0x7c0] sm:$0xff] }
  0x55   : > { %1297 = vmatpush.bf16.msra.mxu1 %v686_v23  ;;  %1266 = vmatmul.bf16.vlgmr.msrb.gmra.mxu2 %v4556_v40  ;;  %v483_v23 = vld [vmem:[%s4386_s30 + $0x420] sm:$0xff]  ;;  %v569_v39 = vld [vmem:[%s4386_s30 + $0x6d0] sm:$0xff] }
  0x56   : > { %1310 = vmatpush.bf16.msra.mxu2 %v694_v26  ;;  %1279 = vmatmul.bf16.vlgmr.msrb.gmra.mxu3 %v4560_v42  ;;  %v698_v26 = vpack.c.bf16 %v534_v15, %v533_v14  ;;  %v673_v32 = vpack.c.bf16 %v484_v24, %v483_v23  ;;  %v1141_v14 = vunpack.c.h.b16 %v314_v61  ;;  %v718_v15 = vpack.c.bf16 %v574_v2, %v573_v0  ;;  %v571_v23 = vld [vmem:[%s4386_s30 + $0x6e0] sm:$0xff]  ;;  %v550_v2 = vld [vmem:[%s4386_s30 + $0x638] sm:$0xff] }
  0x57   : > { %1323 = vmatpush.bf16.msra.mxu3 %v702_v33  ;;  %v681_v33 = vpack.c.bf16 %v500_v27, %v499_v25  ;;  %v734_v24 = vpack.c.bf16 %v606_v9, %v605_v8  ;;  %v572_v25 = vld [vmem:[%s4386_s30 + $0x6e8] sm:$0xff]  ;;  %v597_v8 = vld [vmem:[%s4386_s30 + $0x7b0] sm:$0xff]  ;;  %v598_v9 = vld [vmem:[%s4386_s30 + $0x7b8] sm:$0xff] }
  0x58   : > { %1285 = vmatpush.bf16.msra.mxu0 %v677_v43  ;;  %v513_v43 = vld [vmem:[%s4386_s30 + $0x510] sm:$0xff]  ;;  %v588_v27 = vld [vmem:[%s4386_s30 + $0x768] sm:$0xff]  ;;  %v717_v35 = vpack.c.bf16 %v572_v25, %v571_v23 }
  0x59   : > { %1298 = vmatpush.bf16.msra.mxu1 %v685_v44  ;;  %v514_v44 = vld [vmem:[%s4386_s30 + $0x518] sm:$0xff]  ;;  %v580_v23 = vld [vmem:[%s4386_s30 + $0x728] sm:$0xff] }
  0x5a   : > { %1311 = vmatpush.bf16.msra.mxu2 %v693_v45  ;;  %v529_v45 = vld [vmem:[%s4386_s30 + $0x590] sm:$0xff]  ;;  %v688_v54 = vpack.c.bf16 %v514_v44, %v513_v43  ;;  %v733_v43 = vpack.c.bf16 %v604_v30, %v603_v29  ;;  %v570_v44 = vld [vmem:[%s4386_s30 + $0x6d8] sm:$0xff]  ;;  %v596_v25 = vld [vmem:[%s4386_s30 + $0x7a8] sm:$0xff] }
  0x5b   : > { %1324 = vmatpush.bf16.msra.mxu3 %v701_v50  ;;  %v480_v50 = vld [vmem:[%s4386_s30 + $0x408] sm:$0xff]  ;;  %v545_v30 = vld [vmem:[%s4386_s30 + $0x610] sm:$0xff] }
  0x5c   : > { %1286 = vmatpush.bf16.msra.mxu0 %v676_v56  ;;  %v512_v56 = vld [vmem:[%s4386_s30 + $0x508] sm:$0xff]  ;;  %v671_v1 = vpack.c.bf16 %v480_v50, %v479_v47  ;;  %v601_v47 = vld [vmem:[%s4386_s30 + $0x7d0] sm:$0xff] }
  0x5d   : > { %1299 = vmatpush.bf16.msra.mxu1 %v684_v57  ;;  %v315_v57 = vld [vmem:[%s6202_s2 + $0x28] sm:$0xff]  ;;  %v687_v7 = vpack.c.bf16 %v512_v56, %v511_v55  ;;  %v567_v55 = vld [vmem:[%s4386_s30 + $0x6c0] sm:$0xff] }
  0x5e   : > { %1312 = vmatpush.bf16.msra.mxu2 %v692_v58  ;;  %v696_v58 = vpack.c.bf16 %v530_v46, %v529_v45  ;;  %v1143_v11 = vunpack.c.h.b16 %v315_v57  ;;  %v585_v45 = vld [vmem:[%s4386_s30 + $0x750] sm:$0xff]  ;;  %v586_v46 = vld [vmem:[%s4386_s30 + $0x758] sm:$0xff] }
  0x5f   : > { %1325 = vmatpush.bf16.msra.mxu3 %v700_v62  ;;  %v557_v62 = vld [vmem:[%s4386_s30 + $0x670] sm:$0xff] }
  0x60   : > { %1287 = vmatpush.bf16.msra.mxu0 %v675_v4  ;;  %v590_v4 = vld [vmem:[%s4386_s30 + $0x778] sm:$0xff]  ;;  %v710_v13 = vpack.c.bf16 %v558_v63, %v557_v62 }
  0x61   : > { %1300 = vmatpush.bf16.msra.mxu1 %v683_v5  ;;  %v1142_v5 = vunpack.c.l.b16 %v315_v57  ;;  %v568_v57 = vld [vmem:[%s4386_s30 + $0x6c8] sm:$0xff] }
  0x62   : > { %1313 = vmatpush.bf16.msra.mxu2 %v691_v6  ;;  %v679_v6 = vpack.c.bf16 %v496_v52, %v495_v51  ;;  %v716_v51 = vpack.c.bf16 %v570_v44, %v569_v39  ;;  %v724_v52 = vpack.c.bf16 %v586_v46, %v585_v45  ;;  %v715_v63 = vpack.c.bf16 %v568_v57, %v567_v55  ;;  %v578_v39 = vld [vmem:[%s4386_s30 + $0x718] sm:$0xff]  ;;  %v543_v45 = vld [vmem:[%s4386_s30 + $0x600] sm:$0xff] }
  0x63   : > { %1326 = vmatpush.bf16.msra.mxu3 %v699_v10  ;;  %v1140_v10 = vunpack.c.l.b16 %v314_v61  ;;  %v4636_v28 = vpack.c.b16 %v1142_v5, %v1142_v5  ;;  %v600_v61 = vld [vmem:[%s4386_s30 + $0x7c8] sm:$0xff]  ;;  %v566_v5 = vld [vmem:[%s4386_s30 + $0x6b8] sm:$0xff]  ;;  %v591_v57 = vld [vmem:[%s4386_s30 + $0x780] sm:$0xff] }
  0x64   : > { %1288 = vmatpush.bf16.msra.mxu0 %v674_v16  ;;  %v726_v16 = vpack.c.bf16 %v590_v4, %v589_v3  ;;  %v565_v3 = vld [vmem:[%s4386_s30 + $0x6b0] sm:$0xff]  ;;  %v731_v4 = vpack.c.bf16 %v600_v61, %v599_v60  ;;  %v594_v44 = vld [vmem:[%s4386_s30 + $0x798] sm:$0xff]  ;;  %v763_v60 = vld [vmem:[%s4696_s22 + $0xe0] sm:$0xff] }
  0x65   : > { %1301 = vmatpush.bf16.msra.mxu1 %v682_v17  ;;  %v555_v17 = vld [vmem:[%s4386_s30 + $0x660] sm:$0xff]  ;;  %6294 = vst [vmem:[#allocation9_spill] sm:$0xff] %v4636_v28  ;;  %v4640_v31 = vpack.c.b16 %v1140_v10, %v1140_v10  ;;  %v317_v55 = vld [vmem:[%s6202_s2 + $0x38] sm:$0xff]  ;;  %v765_v61 = vld [vmem:[%s4696_s22 + $0xf0] sm:$0xff] }
  0x66   : > { %1314 = vmatpush.bf16.msra.mxu2 %v690_v21  ;;  %v556_v21 = vld [vmem:[%s4386_s30 + $0x668] sm:$0xff] }
  0x67   : > { %1327 = vmatpush.bf16.msra.mxu3 %v698_v26  ;;  %v587_v26 = vld [vmem:[%s4386_s30 + $0x760] sm:$0xff]  ;;  %6295 = vst [vmem:[#allocation10_spill] sm:$0xff] %v4640_v31 }
  0x68   : > { %1289 = vmatpush.bf16.msra.mxu0 %v673_v32  ;;  %v4642_v32 = vpack.c.b16 %v1143_v11, %v1143_v11  ;;  %v725_v36 = vpack.c.bf16 %v588_v27, %v587_v26  ;;  %v714_v11 = vpack.c.bf16 %v566_v5, %v565_v3  ;;  %v1146_v3 = vunpack.c.l.b16 %v317_v55 }
  0x69   : > { %1302 = vmatpush.bf16.msra.mxu1 %v681_v33  ;;  %v709_v33 = vpack.c.bf16 %v556_v21, %v555_v17  ;;  %v564_v17 = vld [vmem:[%s4386_s30 + $0x6a8] sm:$0xff]  ;;  %v579_v21 = vld [vmem:[%s4386_s30 + $0x720] sm:$0xff] }
  0x6a   : > { %1315 = vmatpush.bf16.msra.mxu2 %v689_v34  ;;  %6296 = vst [vmem:[#allocation11_spill] sm:$0xff] %v4642_v32  ;;  %v4644_v34 = vpack.c.b16 %v1141_v14, %v1141_v14  ;;  %v548_v14 = vld [vmem:[%s4386_s30 + $0x628] sm:$0xff]  ;;  %v721_v29 = vpack.c.bf16 %v580_v23, %v579_v21  ;;  %v793_v23 = vld [vmem:[%s4696_s22 + $0x1d0] sm:$0xff] }
  0x6b   : > { %1328 = vmatpush.bf16.msra.mxu3 %v697_v38  ;;  %v554_v38 = vld [vmem:[%s4386_s30 + $0x658] sm:$0xff] }
  0x6c   : > { %1290 = vmatpush.bf16.msra.mxu0 %v672_v48  ;;  %6297 = vst [vmem:[#allocation12_spill] sm:$0xff] %v4644_v34  ;;  %v602_v48 = vld [vmem:[%s4386_s30 + $0x7d8] sm:$0xff]  ;;  %v708_v50 = vpack.c.bf16 %v554_v38, %v553_v37  ;;  %v577_v38 = vld [vmem:[%s4386_s30 + $0x710] sm:$0xff] }
  0x6d   : > { %1303 = vmatpush.bf16.msra.mxu1 %v680_v53  ;;  %v551_v53 = vld [vmem:[%s4386_s30 + $0x640] sm:$0xff]  ;;  %v732_v56 = vpack.c.bf16 %v602_v48, %v601_v47  ;;  %v562_v37 = vld [vmem:[%s4386_s30 + $0x698] sm:$0xff]  ;;  %v544_v47 = vld [vmem:[%s4386_s30 + $0x608] sm:$0xff] }
  0x6e   : > { %1316 = vmatpush.bf16.msra.mxu2 %v688_v54  ;;  %v552_v54 = vld [vmem:[%s4386_s30 + $0x648] sm:$0xff]  ;;  %v559_v48 = vld [vmem:[%s4386_s30 + $0x680] sm:$0xff] }
  0x6f   : > { %1329 = vmatpush.bf16.msra.mxu3 %v696_v58  ;;  %v583_v58 = vld [vmem:[%s4386_s30 + $0x740] sm:$0xff]  ;;  %v707_v62 = vpack.c.bf16 %v552_v54, %v551_v53  ;;  %v576_v54 = vld [vmem:[%s4386_s30 + $0x708] sm:$0xff] }
  0x70   : > { %1291 = vmatpush.bf16.msra.mxu0 %v671_v1  ;;  %v723_v0 = vpack.c.bf16 %v584_v59, %v583_v58  ;;  %v549_v1 = vld [vmem:[%s4386_s30 + $0x630] sm:$0xff]  ;;  %v575_v53 = vld [vmem:[%s4386_s30 + $0x700] sm:$0xff]  ;;  %v592_v58 = vld [vmem:[%s4386_s30 + $0x788] sm:$0xff] }
  0x71   : > { %1304 = vmatpush.bf16.msra.mxu1 %v679_v6  ;;  %v581_v6 = vld [vmem:[%s4386_s30 + $0x730] sm:$0xff]  ;;  %v706_v10 = vpack.c.bf16 %v550_v2, %v549_v1  ;;  %v827_v1 = vld [vmem:[%s4696_s22 + $0x2e0] sm:$0xff]  ;;  %v719_v5 = vpack.c.bf16 %v576_v54, %v575_v53 }
  0x72   : > { %1317 = vmatpush.bf16.msra.mxu2 %v687_v7  ;;  %v582_v7 = vld [vmem:[%s4386_s30 + $0x738] sm:$0xff]  ;;  %v316_v59 = vld [vmem:[%s6202_s2 + $0x30] sm:$0xff] }
  0x73   : > { %1330 = vmatpush.bf16.msra.mxu3 %v695_v12  ;;  %1292 = vmatmul.bf16.vlgmr.msra.gmra.mxu0 %v4640_v31  ;;  %v722_v12 = vpack.c.bf16 %v582_v7, %v581_v6  ;;  %v829_v2 = vld [vmem:[%s4696_s22 + $0x2f0] sm:$0xff]  ;;  %v859_v6 = vld [vmem:[%s4696_s22 + $0x3e0] sm:$0xff] }
  0x74   : > { %1336 = vmatpush.bf16.msrb.mxu0 %v710_v13  ;;  %1305 = vmatmul.bf16.vlgmr.msra.gmra.mxu1 %v4644_v34  ;;  %v547_v13 = vld [vmem:[%s4386_s30 + $0x620] sm:$0xff]  ;;  %v861_v7 = vld [vmem:[%s4696_s22 + $0x3f0] sm:$0xff] }
  0x75   : > { %1349 = vmatpush.bf16.msrb.mxu1 %v718_v15  ;;  %1318 = vmatmul.bf16.vlgmr.msra.gmra.mxu2 %v4636_v28  ;;  %v563_v15 = vld [vmem:[%s4386_s30 + $0x6a0] sm:$0xff]  ;;  %v705_v26 = vpack.c.bf16 %v548_v14, %v547_v13  ;;  %v1037_v14 = vpack.c.bf16 %v829_v2, %v827_v1  ;;  %v1053_v21 = vpack.c.bf16 %v861_v7, %v859_v6  ;;  %v781_v7 = vld [vmem:[%s4696_s22 + $0x170] sm:$0xff] }
  0x76   : > { %1362 = vmatpush.bf16.msrb.mxu2 %v726_v16  ;;  %1331 = vmatmul.bf16.vlgmr.msra.gmra.mxu3 %v4642_v32  ;;  %v730_v16 = vpack.c.bf16 %v598_v9, %v597_v8  ;;  %v713_v27 = vpack.c.bf16 %v564_v17, %v563_v15  ;;  %v1144_v8 = vunpack.c.l.b16 %v316_v59  ;;  %v1147_v9 = vunpack.c.h.b16 %v317_v55  ;;  %v759_v15 = vld [vmem:[%s4696_s22 + $0xc0] sm:$0xff] }
  0x77   : > { %1375 = vmatpush.bf16.msrb.mxu3 %v734_v24  ;;  %v595_v24 = vld [vmem:[%s4386_s30 + $0x7a0] sm:$0xff] }
  0x78   : > { %1337 = vmatpush.bf16.msrb.mxu0 %v709_v33  ;;  %v546_v33 = vld [vmem:[%s4386_s30 + $0x618] sm:$0xff]  ;;  %v791_v17 = vld [vmem:[%s4696_s22 + $0x1c0] sm:$0xff] }
  0x79   : > { %1350 = vmatpush.bf16.msrb.mxu1 %v717_v35  ;;  %v561_v35 = vld [vmem:[%s4386_s30 + $0x690] sm:$0xff]  ;;  %v704_v46 = vpack.c.bf16 %v546_v33, %v545_v30  ;;  %v4729_v30 = vpack.c.b16 %v1144_v8, %v1144_v8  ;;  %v4731_v33 = vpack.c.b16 %v1147_v9, %v1147_v9  ;;  %v751_v55 = vld [vmem:[%s4696_s22 + $0x80] sm:$0xff] }
  0x7a   : > { %1363 = vmatpush.bf16.msrb.mxu2 %v725_v36  ;;  %v729_v36 = vpack.c.bf16 %v596_v25, %v595_v24  ;;  %v823_v24 = vld [vmem:[%s4696_s22 + $0x2c0] sm:$0xff]  ;;  %v825_v25 = vld [vmem:[%s4696_s22 + $0x2d0] sm:$0xff] }
  0x7b   : > { %1376 = vmatpush.bf16.msrb.mxu3 %v733_v43  ;;  %v593_v43 = vld [vmem:[%s4386_s30 + $0x790] sm:$0xff]  ;;  %6299 = vst [vmem:[#allocation14_spill] sm:$0xff] %v4729_v30  ;;  %v811_v8 = vld [vmem:[%s4696_s22 + $0x260] sm:$0xff] }
  0x7c   : > { %1338 = vmatpush.bf16.msrb.mxu0 %v708_v50  ;;  %v560_v50 = vld [vmem:[%s4386_s30 + $0x688] sm:$0xff]  ;;  %6300 = vst [vmem:[#allocation15_spill] sm:$0xff] %v4731_v33  ;;  %v813_v9 = vld [vmem:[%s4696_s22 + $0x270] sm:$0xff] }
  0x7d   : > { %1351 = vmatpush.bf16.msrb.mxu1 %v716_v51  ;;  %v712_v51 = vpack.c.bf16 %v562_v37, %v561_v35  ;;  %v1019_v37 = vpack.c.bf16 %v793_v23, %v791_v17  ;;  %v775_v17 = vld [vmem:[%s4696_s22 + $0x140] sm:$0xff]  ;;  %v777_v23 = vld [vmem:[%s4696_s22 + $0x150] sm:$0xff] }
  0x7e   : > { %1364 = vmatpush.bf16.msrb.mxu2 %v724_v52  ;;  %v720_v52 = vpack.c.bf16 %v578_v39, %v577_v38  ;;  %v1035_v38 = vpack.c.bf16 %v825_v25, %v823_v24  ;;  %v755_v39 = vld [vmem:[%s4696_s22 + $0xa0] sm:$0xff]  ;;  %v809_v25 = vld [vmem:[%s4696_s22 + $0x250] sm:$0xff] }
  0x7f   : > { %1377 = vmatpush.bf16.msrb.mxu3 %v732_v56  ;;  %v728_v56 = vpack.c.bf16 %v594_v44, %v593_v43  ;;  %v757_v43 = vld [vmem:[%s4696_s22 + $0xb0] sm:$0xff]  ;;  %v787_v44 = vld [vmem:[%s4696_s22 + $0x1a0] sm:$0xff] }
  0x80   : > { %1339 = vmatpush.bf16.msrb.mxu0 %v707_v62  ;;  %v795_v62 = vld [vmem:[%s4696_s22 + $0x1e0] sm:$0xff] }
  0x81   : > { %1352 = vmatpush.bf16.msrb.mxu1 %v715_v63  ;;  %v703_v63 = vpack.c.bf16 %v544_v47, %v543_v45  ;;  %v819_v47 = vld [vmem:[%s4696_s22 + $0x2a0] sm:$0xff] }
  0x82   : > { %1365 = vmatpush.bf16.msrb.mxu2 %v723_v0  ;;  %v797_v0 = vld [vmem:[%s4696_s22 + $0x1f0] sm:$0xff]  ;;  %v807_v24 = vld [vmem:[%s4696_s22 + $0x240] sm:$0xff] }
  0x83   : > { %1378 = vmatpush.bf16.msrb.mxu3 %v731_v4  ;;  %v711_v4 = vpack.c.bf16 %v560_v50, %v559_v48  ;;  %v1021_v13 = vpack.c.bf16 %v797_v0, %v795_v62  ;;  %v821_v48 = vld [vmem:[%s4696_s22 + $0x2b0] sm:$0xff]  ;;  %v851_v50 = vld [vmem:[%s4696_s22 + $0x3a0] sm:$0xff] }
  0x84   : > { %1340 = vmatpush.bf16.msrb.mxu0 %v706_v10  ;;  %v727_v10 = vpack.c.bf16 %v592_v58, %v591_v57  ;;  %v1033_v54 = vpack.c.bf16 %v821_v48, %v819_v47  ;;  %v783_v57 = vld [vmem:[%s4696_s22 + $0x180] sm:$0xff]  ;;  %v805_v48 = vld [vmem:[%s4696_s22 + $0x230] sm:$0xff] }
  0x85   : > { %1353 = vmatpush.bf16.msrb.mxu1 %v714_v11  ;;  %v1005_v11 = vpack.c.bf16 %v765_v61, %v763_v60  ;;  %v815_v60 = vld [vmem:[%s4696_s22 + $0x280] sm:$0xff]  ;;  %v817_v61 = vld [vmem:[%s4696_s22 + $0x290] sm:$0xff] }
  0x86   : > { %1366 = vmatpush.bf16.msrb.mxu2 %v722_v12  ;;  %v1145_v12 = vunpack.c.h.b16 %v316_v59  ;;  %v785_v59 = vld [vmem:[%s4696_s22 + $0x190] sm:$0xff]  ;;  %v847_v62 = vld [vmem:[%s4696_s22 + $0x380] sm:$0xff]  ;;  %v1031_v2 = vpack.c.bf16 %v817_v61, %v815_v60 }
  0x87   : > { %1379 = vmatpush.bf16.msrb.mxu3 %v730_v16  ;;  %v761_v16 = vld [vmem:[%s4696_s22 + $0xd0] sm:$0xff]  ;;  %v1015_v1 = vpack.c.bf16 %v785_v59, %v783_v57  ;;  %v803_v47 = vld [vmem:[%s4696_s22 + $0x220] sm:$0xff] }
  0x88   : > { %1341 = vmatpush.bf16.msrb.mxu0 %v705_v26  ;;  %v4725_v26 = vpack.c.b16 %v1146_v3, %v1146_v3  ;;  %v1003_v35 = vpack.c.bf16 %v761_v16, %v759_v15  ;;  %v747_v3 = vld [vmem:[%s4696_s22 + $0x60] sm:$0xff]  ;;  %v745_v16 = vld [vmem:[%s4696_s22 + $0x50] sm:$0xff] }
  0x89   : > { %1354 = vmatpush.bf16.msrb.mxu1 %v713_v27  ;;  %v855_v27 = vld [vmem:[%s4696_s22 + $0x3c0] sm:$0xff]  ;;  %v769_v59 = vld [vmem:[%s4696_s22 + $0x110] sm:$0xff] }
  0x8a   : > { %1367 = vmatpush.bf16.msrb.mxu2 %v721_v29  ;;  %6298 = vst [vmem:[#allocation13_spill] sm:$0xff] %v4725_v26  ;;  %v857_v29 = vld [vmem:[%s4696_s22 + $0x3d0] sm:$0xff]  ;;  %v743_v15 = vld [vmem:[%s4696_s22 + $0x40] sm:$0xff] }
  0x8b   : > { %1380 = vmatpush.bf16.msrb.mxu3 %v729_v36  ;;  %v4733_v36 = vpack.c.b16 %v1145_v12, %v1145_v12  ;;  %v1051_v45 = vpack.c.bf16 %v857_v29, %v855_v27  ;;  %v839_v27 = vld [vmem:[%s4696_s22 + $0x340] sm:$0xff]  ;;  %v841_v29 = vld [vmem:[%s4696_s22 + $0x350] sm:$0xff] }
  0x8c   : > { %1342 = vmatpush.bf16.msrb.mxu0 %v704_v46  ;;  %v789_v46 = vld [vmem:[%s4696_s22 + $0x1b0] sm:$0xff]  ;;  %v767_v57 = vld [vmem:[%s4696_s22 + $0x100] sm:$0xff] }
  0x8d   : > { %1355 = vmatpush.bf16.msrb.mxu1 %v712_v51  ;;  %6301 = vst [vmem:[#allocation16_spill] sm:$0xff] %v4733_v36  ;;  %v853_v51 = vld [vmem:[%s4696_s22 + $0x3b0] sm:$0xff]  ;;  %v1017_v53 = vpack.c.bf16 %v789_v46, %v787_v44  ;;  %v771_v44 = vld [vmem:[%s4696_s22 + $0x120] sm:$0xff] }
  0x8e   : > { %1368 = vmatpush.bf16.msrb.mxu2 %v720_v52  ;;  %v1001_v52 = vpack.c.bf16 %v757_v43, %v755_v39  ;;  %v1049_v58 = vpack.c.bf16 %v853_v51, %v851_v50  ;;  %v739_v39 = vld [vmem:[%s4696_s22 + $0x20] sm:$0xff]  ;;  %v741_v43 = vld [vmem:[%s4696_s22 + $0x30] sm:$0xff] }
  0x8f   : > { %1381 = vmatpush.bf16.msrb.mxu3 %v728_v56  ;;  %v753_v56 = vld [vmem:[%s4696_s22 + $0x90] sm:$0xff]  ;;  %v835_v50 = vld [vmem:[%s4696_s22 + $0x320] sm:$0xff] }
  0x90   : > { %1343 = vmatpush.bf16.msrb.mxu0 %v703_v63  ;;  %v849_v63 = vld [vmem:[%s4696_s22 + $0x390] sm:$0xff]  ;;  %v999_v0 = vpack.c.bf16 %v753_v56, %v751_v55  ;;  %v735_v55 = vld [vmem:[%s4696_s22] sm:$0xff] }
  0x91   : > { %1356 = vmatpush.bf16.msrb.mxu1 %v711_v4  ;;  %v749_v4 = vld [vmem:[%s4696_s22 + $0x70] sm:$0xff]  ;;  %v1047_v6 = vpack.c.bf16 %v849_v63, %v847_v62  ;;  %v799_v60 = vld [vmem:[%s4696_s22 + $0x200] sm:$0xff] }
  0x92   : > { %1369 = vmatpush.bf16.msrb.mxu2 %v719_v5  ;;  %v779_v5 = vld [vmem:[%s4696_s22 + $0x160] sm:$0xff]  ;;  %v997_v12 = vpack.c.bf16 %v749_v4, %v747_v3  ;;  %v773_v46 = vld [vmem:[%s4696_s22 + $0x130] sm:$0xff]  ;;  %v1007_v4 = vpack.c.bf16 %v769_v59, %v767_v57 }
  0x93   : > { %1382 = vmatpush.bf16.msrb.mxu3 %v727_v10  ;;  %1344 = vmatmul.bf16.vlgmr.msrb.gmra.mxu0 %v4729_v30  ;;  %v843_v10 = vld [vmem:[%s4696_s22 + $0x360] sm:$0xff]  ;;  %v837_v51 = vld [vmem:[%s4696_s22 + $0x330] sm:$0xff]  ;;  %v800_v30 = vld [vmem:[%s4696_s22 + $0x208] sm:$0xff] }
  0x94   : > { %1549 = vmatpush.bf16.msra.mxu0 %v1005_v11  ;;  %1357 = vmatmul.bf16.vlgmr.msrb.gmra.mxu1 %v4733_v36  ;;  %v845_v11 = vld [vmem:[%s4696_s22 + $0x370] sm:$0xff]  ;;  %v831_v62 = vld [vmem:[%s4696_s22 + $0x300] sm:$0xff] }
  0x95   : > { %1577 = vmatpush.bf16.msra.mxu1 %v1021_v13  ;;  %1370 = vmatmul.bf16.vlgmr.msrb.gmra.mxu2 %v4725_v26  ;;  %v1013_v13 = vpack.c.bf16 %v781_v7, %v779_v5  ;;  %v737_v56 = vld [vmem:[%s4696_s22 + $0x10] sm:$0xff]  ;;  %v4271_v3 = vld [vmem:[%s6204_s4 + $0x4] sm:$0xf]  ;;  %v3662_v7 = vld [vmem:[%s6204_s4 + $0x8] sm:$0xf] }
  0x96   : > { %1605 = vmatpush.bf16.msra.mxu2 %v1037_v14  ;;  %1383 = vmatmul.bf16.vlgmr.msrb.gmra.mxu3 %v4731_v33  ;;  %v1029_v14 = vpack.c.bf16 %v813_v9, %v811_v8  ;;  %v801_v61 = vld [vmem:[%s4696_s22 + $0x210] sm:$0xff]  ;;  %v4276_v8 = vld [vmem:[%s6204_s4 + $0x24] sm:$0xf0]  ;;  %v3686_v57 = vld [vmem:[%s6204_s4 + $0x40] sm:$0xf] }
  0x97   : > { %1633 = vmatpush.bf16.msra.mxu3 %v1053_v21  ;;  %v1045_v21 = vpack.c.bf16 %v845_v11, %v843_v10  ;;  %v833_v63 = vld [vmem:[%s4696_s22 + $0x310] sm:$0xff]  ;;  %v1023_v5 = vpack.c.bf16 %v801_v61, %v799_v60  ;;  %v4272_v10 = vld [vmem:[%s6204_s4 + $0xc] sm:$0xf]  ;;  %v915_v60 = vld [vmem:[%s4696_s22 + $0x5a0] sm:$0xff] }
  0x98   : > { %1550 = vmatpush.bf16.msra.mxu0 %v1003_v35  ;;  %v995_v35 = vpack.c.bf16 %v745_v16, %v743_v15  ;;  %v1039_v9 = vpack.c.bf16 %v833_v63, %v831_v62  ;;  %v3664_v11 = vld [vmem:[%s6204_s4 + $0x28] sm:$0xf0]  ;;  %v891_v16 = vld [vmem:[%s4696_s22 + $0x4e0] sm:$0xff]  ;;  %v917_v61 = vld [vmem:[%s4696_s22 + $0x5b0] sm:$0xff] }
  0x99   : > { %1578 = vmatpush.bf16.msra.mxu1 %v1019_v37  ;;  %v1011_v37 = vpack.c.bf16 %v777_v23, %v775_v17  ;;  %v4817_v15 = vor.u32 %v4272_v10, %v3664_v11  ;;  %v893_v17 = vld [vmem:[%s4696_s22 + $0x4f0] sm:$0xff]  ;;  %v947_v62 = vld [vmem:[%s4696_s22 + $0x6a0] sm:$0xff]  ;;  %v3696_v10 = vld [vmem:[%s6204_s4 + $0x68] sm:$0xf0] }
  0x9a   : > { %1606 = vmatpush.bf16.msra.mxu2 %v1035_v38  ;;  %v1027_v38 = vpack.c.bf16 %v809_v25, %v807_v24  ;;  %v1069_v23 = vpack.c.bf16 %v893_v17, %v891_v16  ;;  %v925_v24 = vld [vmem:[%s4696_s22 + $0x5f0] sm:$0xff]  ;;  %v955_v25 = vld [vmem:[%s4696_s22 + $0x6e0] sm:$0xff]  ;;  %v768_v33 = vld [vmem:[%s4696_s22 + $0x108] sm:$0xff] }
  0x9b   : > { %1634 = vmatpush.bf16.msra.mxu3 %v1051_v45  ;;  %v1043_v45 = vpack.c.bf16 %v841_v29, %v839_v27  ;;  %6305 = vst [vmem:[#allocation20_spill] sm:$0xff] %v4817_v15  ;;  %v957_v27 = vld [vmem:[%s4696_s22 + $0x6f0] sm:$0xff]  ;;  %v879_v16 = vld [vmem:[%s4696_s22 + $0x480] sm:$0xff]  ;;  %v802_v26 = vld [vmem:[%s4696_s22 + $0x218] sm:$0xff] }
  0x9c   : > { %1551 = vmatpush.bf16.msra.mxu0 %v1001_v52  ;;  %v993_v52 = vpack.c.bf16 %v741_v43, %v739_v39  ;;  %v887_v39 = vld [vmem:[%s4696_s22 + $0x4c0] sm:$0xff]  ;;  %v881_v17 = vld [vmem:[%s4696_s22 + $0x490] sm:$0xff] }
  0x9d   : > { %1579 = vmatpush.bf16.msra.mxu1 %v1017_v53  ;;  %v1009_v53 = vpack.c.bf16 %v773_v46, %v771_v44  ;;  %v889_v44 = vld [vmem:[%s4696_s22 + $0x4d0] sm:$0xff] }
  0x9e   : > { %1607 = vmatpush.bf16.msra.mxu2 %v1033_v54  ;;  %v1025_v54 = vpack.c.bf16 %v805_v48, %v803_v47  ;;  %v921_v46 = vld [vmem:[%s4696_s22 + $0x5d0] sm:$0xff]  ;;  %v1067_v47 = vpack.c.bf16 %v889_v44, %v887_v39 }
  0x9f   : > { %1635 = vmatpush.bf16.msra.mxu3 %v1049_v58  ;;  %v1041_v58 = vpack.c.bf16 %v837_v51, %v835_v50  ;;  %v951_v50 = vld [vmem:[%s4696_s22 + $0x6c0] sm:$0xff]  ;;  %v953_v51 = vld [vmem:[%s4696_s22 + $0x6d0] sm:$0xff] }
  0xa0   : > { %1552 = vmatpush.bf16.msra.mxu0 %v999_v0  ;;  %v991_v0 = vpack.c.bf16 %v737_v56, %v735_v55  ;;  %v883_v55 = vld [vmem:[%s4696_s22 + $0x4a0] sm:$0xff]  ;;  %v885_v56 = vld [vmem:[%s4696_s22 + $0x4b0] sm:$0xff] }
  0xa1   : > { %1580 = vmatpush.bf16.msra.mxu1 %v1015_v1  ;;  %v3654_v1 = vld [vmem:[%s6204_s4] sm:$0xf]  ;;  %v1065_v63 = vpack.c.bf16 %v885_v56, %v883_v55  ;;  %v941_v55 = vld [vmem:[%s4696_s22 + $0x670] sm:$0xff] }
  0xa2   : > { %1608 = vmatpush.bf16.msra.mxu2 %v1031_v2  ;;  %v4275_v2 = vld [vmem:[%s6204_s4 + $0x1c] sm:$0xf0] }
  0xa3   : > { %1636 = vmatpush.bf16.msra.mxu3 %v1047_v6  ;;  %v3656_v6 = vld [vmem:[%s6204_s4 + $0x20] sm:$0xf0] }
  0xa4   : > { %1553 = vmatpush.bf16.msra.mxu0 %v997_v12  ;;  %v4811_v12 = vor.u32 %v4275_v2, %v3654_v1  ;;  %v979_v1 = vld [vmem:[%s4696_s22 + $0x7a0] sm:$0xff]  ;;  %v981_v2 = vld [vmem:[%s4696_s22 + $0x7b0] sm:$0xff] }
  0xa5   : > { %1581 = vmatpush.bf16.msra.mxu1 %v1013_v13  ;;  %v4813_v13 = vor.u32 %v4271_v3, %v3656_v6  ;;  %v4279_v3 = vld [vmem:[%s6204_s4 + $0x44] sm:$0xf]  ;;  %v1081_v6 = vpack.c.bf16 %v917_v61, %v915_v60  ;;  %v1113_v11 = vpack.c.bf16 %v981_v2, %v979_v1  ;;  %v905_v2 = vld [vmem:[%s4696_s22 + $0x550] sm:$0xff] }
  0xa6   : > { %1609 = vmatpush.bf16.msra.mxu2 %v1029_v14  ;;  %6302 = vst [vmem:[#allocation17_spill] sm:$0xff] %v4811_v12  ;;  %v4815_v14 = vor.u32 %v4276_v8, %v3662_v7  ;;  %v4284_v8 = vld [vmem:[%s6204_s4 + $0x64] sm:$0xf0]  ;;  %v871_v61 = vld [vmem:[%s4696_s22 + $0x440] sm:$0xff] }
  0xa7   : > { %1637 = vmatpush.bf16.msra.mxu3 %v1045_v21  ;;  %6303 = vst [vmem:[#allocation18_spill] sm:$0xff] %v4813_v13  ;;  %v923_v21 = vld [vmem:[%s4696_s22 + $0x5e0] sm:$0xff] }
  0xa8   : > { %1554 = vmatpush.bf16.msra.mxu0 %v995_v35  ;;  %6304 = vst [vmem:[#allocation19_spill] sm:$0xff] %v4815_v14  ;;  %v1085_v29 = vpack.c.bf16 %v925_v24, %v923_v21  ;;  %v1101_v35 = vpack.c.bf16 %v957_v27, %v955_v25  ;;  %v911_v21 = vld [vmem:[%s4696_s22 + $0x580] sm:$0xff]  ;;  %v913_v24 = vld [vmem:[%s4696_s22 + $0x590] sm:$0xff] }
  0xa9   : > { %1582 = vmatpush.bf16.msra.mxu1 %v1011_v37  ;;  %v987_v37 = vld [vmem:[%s4696_s22 + $0x7e0] sm:$0xff]  ;;  %v945_v27 = vld [vmem:[%s4696_s22 + $0x690] sm:$0xff] }
  0xaa   : > { %1610 = vmatpush.bf16.msra.mxu2 %v1027_v38  ;;  %v989_v38 = vld [vmem:[%s4696_s22 + $0x7f0] sm:$0xff]  ;;  %v943_v25 = vld [vmem:[%s4696_s22 + $0x680] sm:$0xff] }
  0xab   : > { %1638 = vmatpush.bf16.msra.mxu3 %v1043_v45  ;;  %v1117_v43 = vpack.c.bf16 %v989_v38, %v987_v37  ;;  %v919_v45 = vld [vmem:[%s4696_s22 + $0x5c0] sm:$0xff]  ;;  %v977_v38 = vld [vmem:[%s4696_s22 + $0x790] sm:$0xff] }
  0xac   : > { %1555 = vmatpush.bf16.msra.mxu0 %v993_v52  ;;  %v1083_v48 = vpack.c.bf16 %v921_v46, %v919_v45  ;;  %v983_v52 = vld [vmem:[%s4696_s22 + $0x7c0] sm:$0xff]  ;;  %v1079_v45 = vpack.c.bf16 %v913_v24, %v911_v21  ;;  %v1095_v46 = vpack.c.bf16 %v945_v27, %v943_v25  ;;  %v869_v24 = vld [vmem:[%s4696_s22 + $0x430] sm:$0xff] }
  0xad   : > { %1583 = vmatpush.bf16.msra.mxu1 %v1009_v53  ;;  %v1099_v53 = vpack.c.bf16 %v953_v51, %v951_v50  ;;  %v975_v37 = vld [vmem:[%s4696_s22 + $0x780] sm:$0xff]  ;;  %v877_v51 = vld [vmem:[%s4696_s22 + $0x470] sm:$0xff] }
  0xae   : > { %1611 = vmatpush.bf16.msra.mxu2 %v1025_v54  ;;  %v985_v54 = vld [vmem:[%s4696_s22 + $0x7d0] sm:$0xff]  ;;  %v875_v50 = vld [vmem:[%s4696_s22 + $0x460] sm:$0xff] }
  0xaf   : > { %1639 = vmatpush.bf16.msra.mxu3 %v1041_v58  ;;  %v4283_v58 = vld [vmem:[%s6204_s4 + $0x5c] sm:$0xf0]  ;;  %v1115_v59 = vpack.c.bf16 %v985_v54, %v983_v52  ;;  %v1061_v56 = vpack.c.bf16 %v877_v51, %v875_v50  ;;  %v4287_v27 = vld [vmem:[%s6204_s4 + $0x84] sm:$0xf]  ;;  %v3726_v50 = vld [vmem:[%s6204_s4 + $0x88] sm:$0xf] }
  0xb0   : > { %1556 = vmatpush.bf16.msra.mxu0 %v991_v0  ;;  %v949_v0 = vld [vmem:[%s4696_s22 + $0x6b0] sm:$0xff]  ;;  %v4887_v44 = vpop.f32.mrf.mxu0  ;;  %v907_v52 = vld [vmem:[%s4696_s22 + $0x560] sm:$0xff] }
  0xb1   : > { %1584 = vmatpush.bf16.msra.mxu1 %v1007_v4  ;;  %v3688_v4 = vld [vmem:[%s6204_s4 + $0x60] sm:$0xf0]  ;;  %v1097_v7 = vpack.c.bf16 %v949_v0, %v947_v62  ;;  %6310 = vst [vmem:[#allocation25_spill] sm:$0xff] %v4887_v44  ;;  %v873_v62 = vld [vmem:[%s4696_s22 + $0x450] sm:$0xff]  ;;  %v838_v44 = vld [vmem:[%s4696_s22 + $0x338] sm:$0xff] }
  0xb2   : > { %1612 = vmatpush.bf16.msra.mxu2 %v1023_v5  ;;  %v3694_v5 = vld [vmem:[%s6204_s4 + $0x48] sm:$0xf]  ;;  %v939_v54 = vld [vmem:[%s4696_s22 + $0x660] sm:$0xff] }
  0xb3   : > { %1640 = vmatpush.bf16.msra.mxu3 %v1039_v9  ;;  %1557 = vmatmul.bf16.vlgmr.msra.gmra.mxu0 %v4811_v12  ;;  %v4280_v9 = vld [vmem:[%s6204_s4 + $0x4c] sm:$0xf]  ;;  %v1093_v60 = vpack.c.bf16 %v941_v55, %v939_v54  ;;  %v867_v21 = vld [vmem:[%s4696_s22 + $0x420] sm:$0xff] }
  0xb4   : > { %1585 = vmatmul.bf16.vlgmr.msra.gmra.mxu1 %v4813_v13  ;;  %1661 = vmatpush.bf16.msrb.mxu0 %v1069_v23  ;;  %v4874_v23 = vor.u32 %v4283_v58, %v3686_v57  ;;  %v4885_v39 = vor.u32 %v4280_v9, %v3696_v10  ;;  %v971_v57 = vld [vmem:[%s4696_s22 + $0x760] sm:$0xff]  ;;  %v973_v58 = vld [vmem:[%s4696_s22 + $0x770] sm:$0xff]  ;;  %v4288_v54 = vld [vmem:[%s6204_s4 + $0x8c] sm:$0xf] }
  0xb5   : > { %1613 = vmatmul.bf16.vlgmr.msra.gmra.mxu2 %v4815_v14  ;;  %1689 = vmatpush.bf16.msrb.mxu1 %v1085_v29  ;;  %v4879_v29 = vor.u32 %v4279_v3, %v3688_v4  ;;  %v1109_v1 = vpack.c.bf16 %v973_v58, %v971_v57  ;;  %v935_v3 = vld [vmem:[%s4696_s22 + $0x640] sm:$0xff]  ;;  %v937_v4 = vld [vmem:[%s4696_s22 + $0x650] sm:$0xff]  ;;  %v3728_v55 = vld [vmem:[%s6204_s4 + $0xa8] sm:$0xf0] }
  0xb6   : > { %1641 = vmatmul.bf16.vlgmr.msra.gmra.mxu3 %v4817_v15  ;;  %1717 = vmatpush.bf16.msrb.mxu2 %v1101_v35  ;;  %6306 = vst [vmem:[#allocation21_spill] sm:$0xff] %v4874_v23  ;;  %v4881_v35 = vor.u32 %v4284_v8, %v3694_v5  ;;  %v1059_v8 = vpack.c.bf16 %v873_v62, %v871_v61  ;;  %v3718_v9 = vld [vmem:[%s6204_s4 + $0x80] sm:$0xf] }
  0xb7   : > { %1745 = vmatpush.bf16.msrb.mxu3 %v1117_v43  ;;  %6307 = vst [vmem:[#allocation22_spill] sm:$0xff] %v4879_v29  ;;  %v1063_v43 = vpack.c.bf16 %v881_v17, %v879_v16  ;;  %v4291_v10 = vld [vmem:[%s6204_s4 + $0x9c] sm:$0xf0]  ;;  %v1091_v17 = vpack.c.bf16 %v937_v4, %v935_v3  ;;  %v929_v4 = vld [vmem:[%s4696_s22 + $0x610] sm:$0xff] }
  0xb8   : > { %1662 = vmatpush.bf16.msrb.mxu0 %v1067_v47  ;;  %6308 = vst [vmem:[#allocation23_spill] sm:$0xff] %v4881_v35  ;;  %v4890_v47 = vpop.f32.mrf.mxu1  ;;  %v4906_v0 = vpop.f32.mrf.mxu2  ;;  %v899_v25 = vld [vmem:[%s4696_s22 + $0x520] sm:$0xff]  ;;  %v4950_v62 = vor.u32 %v4291_v10, %v3718_v9 }
  0xb9   : > { %1690 = vmatpush.bf16.msrb.mxu1 %v1083_v48  ;;  %6309 = vst [vmem:[#allocation24_spill] sm:$0xff] %v4885_v39  ;;  %v1111_v48 = vpack.c.bf16 %v977_v38, %v975_v37  ;;  %v4911_v5 = vpop.f32.mrf.mxu3  ;;  %v3720_v37 = vld [vmem:[%s6204_s4 + $0xa0] sm:$0xf0] }
  0xba   : > { %1718 = vmatpush.bf16.msrb.mxu2 %v1099_v53  ;;  %6311 = vst [vmem:[#allocation26_spill] sm:$0xff] %v4890_v47  ;;  %v909_v53 = vld [vmem:[%s4696_s22 + $0x570] sm:$0xff]  ;;  %v963_v51 = vld [vmem:[%s4696_s22 + $0x720] sm:$0xff]  ;;  %v836_v47 = vld [vmem:[%s4696_s22 + $0x328] sm:$0xff] }
  0xbb   : > { %1746 = vmatpush.bf16.msrb.mxu3 %v1115_v59  ;;  %v1077_v59 = vpack.c.bf16 %v909_v53, %v907_v52  ;;  %6312 = vst [vmem:[#allocation27_spill] sm:$0xff] %v4906_v0  ;;  %v965_v52 = vld [vmem:[%s4696_s22 + $0x730] sm:$0xff]  ;;  %v4292_v53 = vld [vmem:[%s6204_s4 + $0xa4] sm:$0xf0]  ;;  %v895_v61 = vld [vmem:[%s4696_s22 + $0x500] sm:$0xff] }
  0xbc   : > { %1663 = vmatpush.bf16.msrb.mxu0 %v1065_v63  ;;  %v903_v63 = vld [vmem:[%s4696_s22 + $0x540] sm:$0xff]  ;;  %6313 = vst [vmem:[#allocation28_spill] sm:$0xff] %v4911_v5  ;;  %v4289_v0 = vld [vmem:[%s6204_s4 + $0x94] sm:$0xf] }
  0xbd   : > { %1691 = vmatpush.bf16.msrb.mxu1 %v1081_v6  ;;  %v967_v6 = vld [vmem:[%s4696_s22 + $0x740] sm:$0xff]  ;;  %v1075_v16 = vpack.c.bf16 %v905_v2, %v903_v63  ;;  %6314 = vst [vmem:[#allocation29_spill] sm:$0xff] %v4950_v62  ;;  %v897_v2 = vld [vmem:[%s4696_s22 + $0x510] sm:$0xff] }
  0xbe   : > { %1719 = vmatpush.bf16.msrb.mxu2 %v1097_v7  ;;  %v969_v7 = vld [vmem:[%s4696_s22 + $0x750] sm:$0xff]  ;;  %v927_v3 = vld [vmem:[%s4696_s22 + $0x600] sm:$0xff]  ;;  %v1071_v9 = vpack.c.bf16 %v897_v2, %v895_v61  ;;  %v3678_v2 = vld [vmem:[%s6204_s4 + $0x18] sm:$0xf] }
  0xbf   : > { %1747 = vmatpush.bf16.msrb.mxu3 %v1113_v11  ;;  %v1191_v11 = vpop.f32.mrf.mxu0  ;;  %v1087_v10 = vpack.c.bf16 %v929_v4, %v927_v3  ;;  %v4277_v61 = vld [vmem:[%s6204_s4 + $0x2c] sm:$0xf0]  ;;  %v4278_v3 = vld [vmem:[%s6204_s4 + $0x34] sm:$0xf0]  ;;  %v4274_v4 = vld [vmem:[%s6204_s4 + $0x1c] sm:$0xf] }
  0xc0   : > { %1664 = vmatpush.bf16.msrb.mxu0 %v1063_v43  ;;  %v1204_v38 = vpop.f32.mrf.mxu1  ;;  %v1107_v43 = vpack.c.bf16 %v969_v7, %v967_v6  ;;  %v1217_v63 = vpop.f32.mrf.mxu2  ;;  %v4955_v6 = vor.u32 %v4287_v27, %v3720_v37  ;;  %v4957_v7 = vor.u32 %v4292_v53, %v3726_v50  ;;  %v959_v11 = vld [vmem:[%s4696_s22 + $0x700] sm:$0xff]  ;;  %v344_v37 = vld [vmem:[%s6204_s4 + $0xc8] sm:$0xff] }
  0xc1   : > { %1692 = vmatpush.bf16.msrb.mxu1 %v1079_v45  ;;  %v901_v45 = vld [vmem:[%s4696_s22 + $0x530] sm:$0xff] }
  0xc2   : > { %1720 = vmatpush.bf16.msrb.mxu2 %v1095_v46  ;;  %v931_v46 = vld [vmem:[%s4696_s22 + $0x620] sm:$0xff]  ;;  %v1073_v57 = vpack.c.bf16 %v901_v45, %v899_v25  ;;  %6315 = vst [vmem:[#allocation30_spill] sm:$0xff] %v4955_v6  ;;  %v4273_v63 = vld [vmem:[%s6204_s4 + $0x14] sm:$0xf] }
  0xc3   : > { %1562 = vmatmul.bf16.gmra.mxu0 %v4874_v23  ;;  %1748 = vmatpush.bf16.msrb.mxu3 %v1111_v48  ;;  %v933_v48 = vld [vmem:[%s4696_s22 + $0x630] sm:$0xff]  ;;  %6316 = vst [vmem:[#allocation31_spill] sm:$0xff] %v4957_v7  ;;  %v343_v25 = vld [vmem:[%s6204_s4 + $0xc0] sm:$0xff] }
  0xc4   : > { %1590 = vmatmul.bf16.gmra.mxu1 %v4879_v29  ;;  %1665 = vmatpush.bf16.msrb.mxu0 %v1061_v56  ;;  %v1057_v56 = vpack.c.bf16 %v869_v24, %v867_v21  ;;  %v1089_v58 = vpack.c.bf16 %v933_v48, %v931_v46  ;;  %v1478_v45 = vunpack.c.h.b16 %v343_v25  ;;  %v1479_v46 = vunpack.c.l.b16 %v344_v37 }
  0xc5   : > { %1618 = vmatmul.bf16.gmra.mxu2 %v4881_v35  ;;  %1693 = vmatpush.bf16.msrb.mxu1 %v1077_v59  ;;  %v863_v59 = vld [vmem:[%s4696_s22 + $0x400] sm:$0xff]  ;;  %v1480_v48 = vunpack.c.h.b16 %v344_v37 }
  0xc6   : > { %1646 = vmatmul.bf16.gmra.mxu3 %v4885_v39  ;;  %1721 = vmatpush.bf16.msrb.mxu2 %v1093_v60  ;;  %v865_v60 = vld [vmem:[%s4696_s22 + $0x410] sm:$0xff]  ;;  %v4983_v53 = vpack.c.b16 %v1478_v45, %v1478_v45  ;;  %v828_v45 = vld [vmem:[%s4696_s22 + $0x2e8] sm:$0xff] }
  0xc7   : > { %1749 = vmatpush.bf16.msrb.mxu3 %v1109_v1  ;;  %v1105_v1 = vpack.c.bf16 %v965_v52, %v963_v51  ;;  %v1055_v21 = vpack.c.bf16 %v865_v60, %v863_v59  ;;  %v3670_v60 = vld [vmem:[%s6204_s4 + $0x10] sm:$0xf] }
  0xc8   : > { %1666 = vmatpush.bf16.msrb.mxu0 %v1059_v8  ;;  %v1230_v8 = vpop.f32.mrf.mxu3  ;;  %6323 = vst [vmem:[#allocation38_spill] sm:$0xff] %v4983_v53 }
  0xc9   : > { %1694 = vmatpush.bf16.msrb.mxu1 %v1075_v16  ;;  %v961_v16 = vld [vmem:[%s4696_s22 + $0x710] sm:$0xff]  ;;  %v3680_v8 = vld [vmem:[%s6204_s4 + $0x38] sm:$0xf0] }
  0xca   : > { %1722 = vmatpush.bf16.msrb.mxu2 %v1091_v17  ;;  %v4961_v17 = vor.u32 %v4288_v54, %v3728_v55  ;;  %v1103_v24 = vpack.c.bf16 %v961_v16, %v959_v11  ;;  %v4985_v54 = vpack.c.b16 %v1479_v46, %v1479_v46  ;;  %v5017_v11 = vor.u32 %v4277_v61, %v3670_v60  ;;  %v830_v46 = vld [vmem:[%s4696_s22 + $0x2f8] sm:$0xff]  ;;  %v760_v60 = vld [vmem:[%s4696_s22 + $0xc8] sm:$0xff] }
  0xcb   : > { %1750 = vmatpush.bf16.msrb.mxu3 %v1107_v43  ;;  %v1477_v43 = vunpack.c.l.b16 %v343_v25  ;;  %v796_v25 = vld [vmem:[%s4696_s22 + $0x1e8] sm:$0xff] }
  0xcc   : > { %6317 = vst [vmem:[#allocation32_spill] sm:$0xff] %v4961_v17  ;;  %1667 = vmatpush.bf16.msrb.mxu0 %v1057_v56  ;;  %v4987_v56 = vpack.c.b16 %v1480_v48, %v1480_v48 }
  0xcd   : > { %1695 = vmatpush.bf16.msrb.mxu1 %v1073_v57  ;;  %v4981_v52 = vpack.c.b16 %v1477_v43, %v1477_v43  ;;  %6324 = vst [vmem:[#allocation39_spill] sm:$0xff] %v4985_v54  ;;  %v798_v43 = vld [vmem:[%s4696_s22 + $0x1f8] sm:$0xff] }
  0xce   : > { %1723 = vmatpush.bf16.msrb.mxu2 %v1089_v58  ;;  %6325 = vst [vmem:[#allocation40_spill] sm:$0xff] %v4987_v56 }
  0xcf   : > { %1751 = vmatpush.bf16.msrb.mxu3 %v1105_v1  ;;  %6322 = vst [vmem:[#allocation37_spill] sm:$0xff] %v4981_v52  ;;  %v3672_v1 = vld [vmem:[%s6204_s4 + $0x30] sm:$0xf0] }
  0xd0   : > { %1668 = vmatpush.bf16.msrb.mxu0 %v1055_v21  ;;  %v4970_v27 = vpop.f32.mrf.mxu0  ;;  %6326 = vst [vmem:[#allocation41_spill] sm:$0xff] %v5017_v11  ;;  %v5019_v16 = vor.u32 %v4273_v63, %v3672_v1  ;;  %v5021_v21 = vor.u32 %v4278_v3, %v3678_v2  ;;  %v762_v1 = vld [vmem:[%s4696_s22 + $0xd8] sm:$0xff]  ;;  %v792_v2 = vld [vmem:[%s4696_s22 + $0x1c8] sm:$0xff] }
  0xd1   : > { %1696 = vmatpush.bf16.msrb.mxu1 %v1071_v9  ;;  %6318 = vst [vmem:[#allocation33_spill] sm:$0xff] %v4970_v27  ;;  %v4975_v38 = vpop.f32.mrf.mxu1  ;;  %v5023_v9 = vor.u32 %v4274_v4, %v3680_v8  ;;  %v794_v3 = vld [vmem:[%s4696_s22 + $0x1d8] sm:$0xff]  ;;  %v1004_v4 = vpack.c.bf16 %v762_v1, %v760_v60  ;;  %v820_v1 = vld [vmem:[%s4696_s22 + $0x2a8] sm:$0xff] }
  0xd2   : > { %1724 = vmatpush.bf16.msrb.mxu2 %v1087_v10  ;;  %6319 = vst [vmem:[#allocation34_spill] sm:$0xff] %v4975_v38  ;;  %v764_v10 = vld [vmem:[%s4696_s22 + $0xe8] sm:$0xff]  ;;  %v1020_v8 = vpack.c.bf16 %v794_v3, %v792_v2  ;;  %v790_v60 = vld [vmem:[%s4696_s22 + $0x1b8] sm:$0xff] }
  0xd3   : > { %1567 = vmatmul.bf16.gmra.mxu0 %v4950_v62  ;;  %1752 = vmatpush.bf16.msrb.mxu3 %v1103_v24  ;;  %6327 = vst [vmem:[#allocation42_spill] sm:$0xff] %v5019_v16  ;;  %v766_v24 = vld [vmem:[%s4696_s22 + $0xf8] sm:$0xff]  ;;  %v816_v38 = vld [vmem:[%s4696_s22 + $0x288] sm:$0xff] }
  0xd4   : > { %1595 = vmatmul.bf16.gmra.mxu1 %v4955_v6  ;;  %6328 = vst [vmem:[#allocation43_spill] sm:$0xff] %v5021_v21  ;;  %v1006_v37 = vpack.c.bf16 %v766_v24, %v764_v10  ;;  %v824_v10 = vld [vmem:[%s4696_s22 + $0x2c8] sm:$0xff]  ;;  %v826_v24 = vld [vmem:[%s4696_s22 + $0x2d8] sm:$0xff] }
  0xd5   : > { %1623 = vmatmul.bf16.gmra.mxu2 %v4957_v7  ;;  %6329 = vst [vmem:[#allocation44_spill] sm:$0xff] %v5023_v9  ;;  %v822_v3 = vld [vmem:[%s4696_s22 + $0x2b8] sm:$0xff] }
  0xd6   : > { %1651 = vmatmul.bf16.gmra.mxu3 %v4961_v17  ;;  %1773 = vmatpush.bf16.msra.mxu0 %v1006_v37  ;;  %v1036_v37 = vpack.c.bf16 %v826_v24, %v824_v10  ;;  %v852_v10 = vld [vmem:[%s4696_s22 + $0x3a8] sm:$0xff]  ;;  %v854_v24 = vld [vmem:[%s4696_s22 + $0x3b8] sm:$0xff] }
  0xd7   : > { %v818_v27 = vld [vmem:[%s4696_s22 + $0x298] sm:$0xff] }
  0xd8   : > { %v4977_v50 = vpop.f32.mrf.mxu2  ;;  %v1243_v55 = vpop.f32.mrf.mxu0 }
  0xd9   : > { %6320 = vst [vmem:[#allocation35_spill] sm:$0xff] %v4977_v50  ;;  %v4979_v51 = vpop.f32.mrf.mxu3  ;;  %v1256_v57 = vpop.f32.mrf.mxu1  ;;  %v1022_v55 = vpack.c.bf16 %v798_v43, %v796_v25  ;;  %v856_v25 = vld [vmem:[%s4696_s22 + $0x3c8] sm:$0xff]  ;;  %v858_v43 = vld [vmem:[%s4696_s22 + $0x3d8] sm:$0xff] }
  0xda   : > { %6321 = vst [vmem:[#allocation36_spill] sm:$0xff] %v4979_v51  ;;  %v1038_v57 = vpack.c.bf16 %v830_v46, %v828_v45  ;;  %v756_v45 = vld [vmem:[%s4696_s22 + $0xa8] sm:$0xff]  ;;  %v758_v46 = vld [vmem:[%s4696_s22 + $0xb8] sm:$0xff]  ;;  %1774 = vmatpush.bf16.msra.mxu0 %v1004_v4 }
  0xdb   : > { %1801 = vmatpush.bf16.msra.mxu1 %v1022_v55  ;;  %v3702_v55 = vld [vmem:[%s6204_s4 + $0x50] sm:$0xf]  ;;  %v3712_v51 = vld [vmem:[%s6204_s4 + $0x78] sm:$0xf0] }
  0xdc   : > { %1829 = vmatpush.bf16.msra.mxu2 %v1038_v57  ;;  %v4285_v57 = vld [vmem:[%s6204_s4 + $0x6c] sm:$0xf0]  ;;  %v786_v50 = vld [vmem:[%s4696_s22 + $0x198] sm:$0xff] }
  0xdf   : > { %1802 = vmatpush.bf16.msra.mxu1 %v1020_v8  ;;  %v1050_v8 = vpack.c.bf16 %v854_v24, %v852_v10  ;;  %v848_v10 = vld [vmem:[%s4696_s22 + $0x388] sm:$0xff]  ;;  %v850_v24 = vld [vmem:[%s4696_s22 + $0x398] sm:$0xff] }
  0xe0   : > { %v1269_v58 = vpop.f32.mrf.mxu2  ;;  %1830 = vmatpush.bf16.msra.mxu2 %v1036_v37 }
  0xe1   : > { %v1282_v59 = vpop.f32.mrf.mxu3  ;;  %v860_v58 = vld [vmem:[%s4696_s22 + $0x3e8] sm:$0xff] }
  0xe2   : > { %v862_v59 = vld [vmem:[%s4696_s22 + $0x3f8] sm:$0xff] }
  0xe3   : > { %1572 = vmatmul.bf16.gmra.mxu0 %v4981_v52  ;;  %v1054_v63 = vpack.c.bf16 %v862_v59, %v860_v58  ;;  %v1052_v58 = vpack.c.bf16 %v858_v43, %v856_v25  ;;  %v788_v59 = vld [vmem:[%s4696_s22 + $0x1a8] sm:$0xff]  ;;  %v3704_v25 = vld [vmem:[%s6204_s4 + $0x70] sm:$0xf0]  ;;  %v3710_v43 = vld [vmem:[%s6204_s4 + $0x58] sm:$0xf] }
  0xe4   : > { %1600 = vmatmul.bf16.gmra.mxu1 %v4983_v53 }
  0xe5   : > { %1628 = vmatmul.bf16.gmra.mxu2 %v4985_v54  ;;  %1857 = vmatpush.bf16.msra.mxu3 %v1054_v63  ;;  %v1002_v63 = vpack.c.bf16 %v758_v46, %v756_v45  ;;  %v1018_v45 = vpack.c.bf16 %v790_v60, %v788_v59  ;;  %v1034_v46 = vpack.c.bf16 %v822_v3, %v820_v1  ;;  %v752_v59 = vld [vmem:[%s4696_s22 + $0x88] sm:$0xff]  ;;  %v754_v60 = vld [vmem:[%s4696_s22 + $0x98] sm:$0xff] }
  0xe6   : > { %1656 = vmatmul.bf16.gmra.mxu3 %v4987_v56  ;;  %v784_v1 = vld [vmem:[%s4696_s22 + $0x188] sm:$0xff]  ;;  %v5088_v3 = vor.u32 %v4285_v57, %v3702_v55  ;;  %v1000_v57 = vpack.c.bf16 %v754_v60, %v752_v59 }
  0xe7   : > { %1775 = vmatpush.bf16.msra.mxu0 %v1002_v63  ;;  %1803 = vmatpush.bf16.msra.mxu1 %v1018_v45  ;;  %v1016_v63 = vpack.c.bf16 %v786_v50, %v784_v1  ;;  %v780_v45 = vld [vmem:[%s4696_s22 + $0x168] sm:$0xff]  ;;  %v746_v1 = vld [vmem:[%s4696_s22 + $0x58] sm:$0xff] }
  0xe8   : > { %6334 = vst [vmem:[#allocation49_spill] sm:$0xff] %v5088_v3  ;;  %1831 = vmatpush.bf16.msra.mxu2 %v1034_v46  ;;  %v812_v50 = vld [vmem:[%s4696_s22 + $0x268] sm:$0xff] }
  0xe9   : > { %1858 = vmatpush.bf16.msra.mxu3 %v1052_v58  ;;  %v844_v46 = vld [vmem:[%s4696_s22 + $0x368] sm:$0xff] }
  0xea   : > { %v744_v60 = vld [vmem:[%s4696_s22 + $0x48] sm:$0xff] }
  0xeb   : > { %1776 = vmatpush.bf16.msra.mxu0 %v1000_v57  ;;  %1804 = vmatpush.bf16.msra.mxu1 %v1016_v63  ;;  %v810_v57 = vld [vmem:[%s4696_s22 + $0x258] sm:$0xff]  ;;  %v996_v63 = vpack.c.bf16 %v746_v1, %v744_v60  ;;  %v804_v60 = vld [vmem:[%s4696_s22 + $0x228] sm:$0xff] }
  0xec   : > { %v806_v1 = vld [vmem:[%s4696_s22 + $0x238] sm:$0xff] }
  0xed   : > { %1859 = vmatpush.bf16.msra.mxu3 %v1050_v8  ;;  %v846_v8 = vld [vmem:[%s4696_s22 + $0x378] sm:$0xff] }
  0xf0   : > { %v5035_v48 = vpop.f32.mrf.mxu0 }
  0xf1   : > { %6330 = vst [vmem:[#allocation45_spill] sm:$0xff] %v5035_v48  ;;  %v5040_v61 = vpop.f32.mrf.mxu1  ;;  %v4282_v48 = vld [vmem:[%s6204_s4 + $0x5c] sm:$0xf] }
  0xf2   : > { %6331 = vst [vmem:[#allocation46_spill] sm:$0xff] %v5040_v61  ;;  %v4281_v61 = vld [vmem:[%s6204_s4 + $0x54] sm:$0xf]  ;;  %v5099_v55 = vor.u32 %v4282_v48, %v3712_v51  ;;  %v782_v48 = vld [vmem:[%s4696_s22 + $0x178] sm:$0xff] }
  0xf3   : > { %1669 = vmatmul.bf16.vlgmr.msrb.gmra.mxu0 %v5017_v11  ;;  %v5093_v5 = vor.u32 %v4281_v61, %v3704_v25  ;;  %v748_v25 = vld [vmem:[%s4696_s22 + $0x68] sm:$0xff] }
  0xf4   : > { %1697 = vmatmul.bf16.vlgmr.msrb.gmra.mxu1 %v5019_v16  ;;  %6337 = vst [vmem:[#allocation52_spill] sm:$0xff] %v5099_v55 }
  0xf5   : > { %1725 = vmatmul.bf16.vlgmr.msrb.gmra.mxu2 %v5021_v21  ;;  %6335 = vst [vmem:[#allocation50_spill] sm:$0xff] %v5093_v5 }
  0xf6   : > { %1753 = vmatmul.bf16.vlgmr.msrb.gmra.mxu3 %v5023_v9 }
  0xf8   : > { %v5060_v2 = vpop.f32.mrf.mxu2  ;;  %v1295_v37 = vpop.f32.mrf.mxu0 }
  0xf9   : > { %6332 = vst [vmem:[#allocation47_spill] sm:$0xff] %v5060_v2  ;;  %v5074_v4 = vpop.f32.mrf.mxu3  ;;  %v4286_v2 = vld [vmem:[%s6204_s4 + $0x74] sm:$0xf0]  ;;  %v1014_v37 = vpack.c.bf16 %v782_v48, %v780_v45 }
  0xfa   : > { %6333 = vst [vmem:[#allocation48_spill] sm:$0xff] %v5074_v4  ;;  %v1308_v4 = vpop.f32.mrf.mxu1  ;;  %v5095_v58 = vor.u32 %v4286_v2, %v3710_v43  ;;  %v1048_v2 = vpack.c.bf16 %v850_v24, %v848_v10  ;;  %v750_v43 = vld [vmem:[%s4696_s22 + $0x78] sm:$0xff]  ;;  %v776_v10 = vld [vmem:[%s4696_s22 + $0x148] sm:$0xff]  ;;  %v1046_v24 = vpack.c.bf16 %v846_v8, %v844_v46 }
  0xfb   : > { %v1032_v4 = vpack.c.bf16 %v818_v27, %v816_v38  ;;  %v814_v27 = vld [vmem:[%s4696_s22 + $0x278] sm:$0xff]  ;;  %v998_v38 = vpack.c.bf16 %v750_v43, %v748_v25  ;;  %v840_v25 = vld [vmem:[%s4696_s22 + $0x348] sm:$0xff]  ;;  %1805 = vmatpush.bf16.msra.mxu1 %v1014_v37  ;;  %v3736_v37 = vld [vmem:[%s6204_s4 + $0xb0] sm:$0xf0] }
  0xfc   : > { %6336 = vst [vmem:[#allocation51_spill] sm:$0xff] %v5095_v58  ;;  %v1030_v59 = vpack.c.bf16 %v814_v27, %v812_v50  ;;  %1860 = vmatpush.bf16.msra.mxu3 %v1048_v2  ;;  %v842_v43 = vld [vmem:[%s4696_s22 + $0x358] sm:$0xff]  ;;  %v4293_v2 = vld [vmem:[%s6204_s4 + $0xac] sm:$0xf0]  ;;  %v740_v50 = vld [vmem:[%s4696_s22 + $0x28] sm:$0xff]  ;;  %v5158_v32 = vor.u32 %v4289_v0, %v3736_v37 }
  0xfd   : > { %1832 = vmatpush.bf16.msra.mxu2 %v1032_v4  ;;  %1777 = vmatpush.bf16.msra.mxu0 %v998_v38  ;;  %v3734_v4 = vld [vmem:[%s6204_s4 + $0x90] sm:$0xf]  ;;  %v742_v27 = vld [vmem:[%s4696_s22 + $0x38] sm:$0xff]  ;;  %v772_v46 = vld [vmem:[%s4696_s22 + $0x128] sm:$0xff]  ;;  %v1044_v38 = vpack.c.bf16 %v842_v43, %v840_v25  ;;  %v1026_v25 = vpack.c.bf16 %v806_v1, %v804_v60 }
  0xfe   : > { %v774_v8 = vld [vmem:[%s4696_s22 + $0x138] sm:$0xff]  ;;  %v5153_v43 = vor.u32 %v4293_v2, %v3734_v4  ;;  %6339 = vst [vmem:[#allocation54_spill] sm:$0xff] %v5158_v32  ;;  %v1008_v4 = vpack.c.bf16 %v770_v20, %v768_v33  ;;  %v345_v20 = vld [vmem:[%s6204_s4 + $0xd0] sm:$0xff] }
  0xff   : > { %v1482_v1 = vunpack.c.h.b16 %v345_v20 }
 0x100   : > { %v1321_v61 = vpop.f32.mrf.mxu2  ;;  %1861 = vmatpush.bf16.msra.mxu3 %v1046_v24  ;;  %v994_v24 = vpack.c.bf16 %v742_v27, %v740_v50  ;;  %6338 = vst [vmem:[#allocation53_spill] sm:$0xff] %v5153_v43  ;;  %v736_v50 = vld [vmem:[%s4696_s22 + $0x8] sm:$0xff]  ;;  %v738_v27 = vld [vmem:[%s4696_s22 + $0x18] sm:$0xff] }
 0x101   : > { %v1334_v51 = vpop.f32.mrf.mxu3  ;;  %v778_v61 = vld [vmem:[%s4696_s22 + $0x158] sm:$0xff]  ;;  %1833 = vmatpush.bf16.msra.mxu2 %v1030_v59  ;;  %1778 = vmatpush.bf16.msra.mxu0 %v996_v63  ;;  %v1042_v63 = vpack.c.bf16 %v838_v44, %v836_v47  ;;  %v1024_v44 = vpack.c.bf16 %v802_v26, %v800_v30 }
 0x102   : > { %v808_v51 = vld [vmem:[%s4696_s22 + $0x248] sm:$0xff]  ;;  %v1012_v45 = vpack.c.bf16 %v778_v61, %v776_v10  ;;  %v3742_v59 = vld [vmem:[%s6204_s4 + $0x98] sm:$0xf]  ;;  %v4290_v61 = vld [vmem:[%s6204_s4 + $0x9c] sm:$0xf] }
 0x103   : > { %1674 = vmatmul.bf16.gmra.mxu0 %v5088_v3  ;;  %v1028_v48 = vpack.c.bf16 %v810_v57, %v808_v51  ;;  %v4294_v10 = vld [vmem:[%s6204_s4 + $0xb4] sm:$0xf0]  ;;  %v3744_v51 = vld [vmem:[%s6204_s4 + $0xb8] sm:$0xf0]  ;;  %v1010_v57 = vpack.c.bf16 %v774_v8, %v772_v46  ;;  %v832_v46 = vld [vmem:[%s4696_s22 + $0x308] sm:$0xff] }
 0x104   : > { %1702 = vmatmul.bf16.gmra.mxu1 %v5093_v5  ;;  %1862 = vmatpush.bf16.msra.mxu3 %v1044_v38  ;;  %v5160_v42 = vor.u32 %v4294_v10, %v3742_v59  ;;  %v834_v8 = vld [vmem:[%s4696_s22 + $0x318] sm:$0xff]  ;;  %v1481_v38 = vunpack.c.l.b16 %v345_v20  ;;  %v956_v20 = vld [vmem:[%s4696_s22 + $0x6e8] sm:$0xff] }
 0x105   : > { %1730 = vmatmul.bf16.gmra.mxu2 %v5095_v58  ;;  %1806 = vmatpush.bf16.msra.mxu1 %v1012_v45  ;;  %v5165_v45 = vor.u32 %v4290_v61, %v3744_v51  ;;  %v1040_v47 = vpack.c.bf16 %v834_v8, %v832_v46  ;;  %v346_v30 = vld [vmem:[%s6204_s4 + $0xd8] sm:$0xff]  ;;  %v5189_v61 = vpack.c.b16 %v1482_v1, %v1482_v1  ;;  %v892_v46 = vld [vmem:[%s4696_s22 + $0x4e8] sm:$0xff] }
 0x106   : > { %1758 = vmatmul.bf16.gmra.mxu3 %v5099_v55  ;;  %1834 = vmatpush.bf16.msra.mxu2 %v1028_v48  ;;  %6340 = vst [vmem:[#allocation55_spill] sm:$0xff] %v5160_v42  ;;  %v992_v48 = vpack.c.bf16 %v738_v27, %v736_v50  ;;  %v1483_v37 = vunpack.c.l.b16 %v346_v30  ;;  %v1484_v59 = vunpack.c.h.b16 %v346_v30  ;;  %v894_v8 = vld [vmem:[%s4696_s22 + $0x4f8] sm:$0xff]  ;;  %v988_v1 = vld [vmem:[%s4696_s22 + $0x7e8] sm:$0xff] }
 0x107   : > { %6341 = vst [vmem:[#allocation56_spill] sm:$0xff] %v5165_v45  ;;  %1779 = vmatpush.bf16.msra.mxu0 %v994_v24  ;;  %v5187_v24 = vpack.c.b16 %v1481_v38, %v1481_v38  ;;  %v958_v30 = vld [vmem:[%s4696_s22 + $0x6f8] sm:$0xff] }
 0x108   : > { %1863 = vmatpush.bf16.msra.mxu3 %v1042_v63  ;;  %6347 = vst [vmem:[#allocation62_spill] sm:$0xff] %v5189_v61  ;;  %v5191_v51 = vpack.c.b16 %v1483_v37, %v1483_v37  ;;  %v990_v37 = vld [vmem:[%s4696_s22 + $0x7f8] sm:$0xff] }
 0x109   : > { %1807 = vmatpush.bf16.msra.mxu1 %v1010_v57  ;;  %6346 = vst [vmem:[#allocation61_spill] sm:$0xff] %v5187_v24  ;;  %v5193_v57 = vpack.c.b16 %v1484_v59, %v1484_v59  ;;  %v1118_v59 = vpack.c.bf16 %v990_v37, %v988_v1  ;;  %v984_v1 = vld [vmem:[%s4696_s22 + $0x7c8] sm:$0xff]  ;;  %v986_v37 = vld [vmem:[%s4696_s22 + $0x7d8] sm:$0xff] }
 0x10a   : > { %1835 = vmatpush.bf16.msra.mxu2 %v1026_v25  ;;  %6348 = vst [vmem:[#allocation63_spill] sm:$0xff] %v5191_v51 }
 0x10b   : > { %1780 = vmatpush.bf16.msra.mxu0 %v992_v48  ;;  %6349 = vst [vmem:[#allocation64_spill] sm:$0xff] %v5193_v57 }
 0x10c   : > { %1864 = vmatpush.bf16.msra.mxu3 %v1040_v47  ;;  %v926_v47 = vld [vmem:[%s4696_s22 + $0x5f8] sm:$0xff] }
 0x10d   : > { %1808 = vmatpush.bf16.msra.mxu1 %v1008_v4  ;;  %v924_v4 = vld [vmem:[%s4696_s22 + $0x5e8] sm:$0xff] }
 0x10e   : > { %1836 = vmatpush.bf16.msra.mxu2 %v1024_v44  ;;  %v1070_v44 = vpack.c.bf16 %v894_v8, %v892_v46  ;;  %v1086_v38 = vpack.c.bf16 %v926_v47, %v924_v4  ;;  %v922_v47 = vld [vmem:[%s4696_s22 + $0x5d8] sm:$0xff] }
 0x110   : > { %v5172_v0 = vpop.f32.mrf.mxu0  ;;  %1885 = vmatpush.bf16.msrb.mxu0 %v1070_v44  ;;  %1969 = vmatpush.bf16.msrb.mxu3 %v1118_v59  ;;  %v954_v44 = vld [vmem:[%s4696_s22 + $0x6d8] sm:$0xff]  ;;  %v1116_v59 = vpack.c.bf16 %v986_v37, %v984_v1  ;;  %v912_v1 = vld [vmem:[%s4696_s22 + $0x588] sm:$0xff] }
 0x111   : > { %6342 = vst [vmem:[#allocation57_spill] sm:$0xff] %v5172_v0  ;;  %v5175_v2 = vpop.f32.mrf.mxu1  ;;  %1913 = vmatpush.bf16.msrb.mxu1 %v1086_v38  ;;  %v870_v0 = vld [vmem:[%s4696_s22 + $0x438] sm:$0xff] }
 0x112   : > { %6343 = vst [vmem:[#allocation58_spill] sm:$0xff] %v5175_v2 }
 0x113   : > { %1679 = vmatmul.bf16.gmra.mxu0 %v5153_v43 }
 0x114   : > { %1707 = vmatmul.bf16.gmra.mxu1 %v5158_v32  ;;  %1970 = vmatpush.bf16.msrb.mxu3 %v1116_v59 }
 0x115   : > { %1735 = vmatmul.bf16.gmra.mxu2 %v5160_v42 }
 0x116   : > { %1763 = vmatmul.bf16.gmra.mxu3 %v5165_v45 }
 0x118   : > { %v5180_v26 = vpop.f32.mrf.mxu2  ;;  %v1347_v60 = vpop.f32.mrf.mxu0 }
 0x119   : > { %6344 = vst [vmem:[#allocation59_spill] sm:$0xff] %v5180_v26  ;;  %v5185_v33 = vpop.f32.mrf.mxu3  ;;  %v1360_v10 = vpop.f32.mrf.mxu1  ;;  %v1102_v60 = vpack.c.bf16 %v958_v30, %v956_v20  ;;  %v952_v20 = vld [vmem:[%s4696_s22 + $0x6c8] sm:$0xff] }
 0x11a   : > { %6345 = vst [vmem:[#allocation60_spill] sm:$0xff] %v5185_v33 }
 0x11b   : > { %1941 = vmatpush.bf16.msrb.mxu2 %v1102_v60  ;;  %v1100_v60 = vpack.c.bf16 %v954_v44, %v952_v20  ;;  %v950_v20 = vld [vmem:[%s4696_s22 + $0x6b8] sm:$0xff] }
 0x11f   : > { %1942 = vmatpush.bf16.msrb.mxu2 %v1100_v60  ;;  %v882_v60 = vld [vmem:[%s4696_s22 + $0x498] sm:$0xff] }
 0x120   : > { %v1373_v25 = vpop.f32.mrf.mxu2 }
 0x121   : > { %v1386_v63 = vpop.f32.mrf.mxu3  ;;  %v888_v25 = vld [vmem:[%s4696_s22 + $0x4c8] sm:$0xff] }
 0x122   : > { %v890_v63 = vld [vmem:[%s4696_s22 + $0x4d8] sm:$0xff] }
 0x123   : > { %1684 = vmatmul.bf16.gmra.mxu0 %v5187_v24  ;;  %v1068_v4 = vpack.c.bf16 %v890_v63, %v888_v25  ;;  %v886_v25 = vld [vmem:[%s4696_s22 + $0x4b8] sm:$0xff]  ;;  %v916_v63 = vld [vmem:[%s4696_s22 + $0x5a8] sm:$0xff] }
 0x124   : > { %1712 = vmatmul.bf16.gmra.mxu1 %v5189_v61 }
 0x125   : > { %1740 = vmatmul.bf16.gmra.mxu2 %v5191_v51  ;;  %1886 = vmatpush.bf16.msrb.mxu0 %v1068_v4  ;;  %v982_v4 = vld [vmem:[%s4696_s22 + $0x7b8] sm:$0xff] }
 0x126   : > { %1768 = vmatmul.bf16.gmra.mxu3 %v5193_v57 }
 0x130   : > { %v1558_v50 = vpop.f32.mrf.mxu0 }
 0x131   : > { %v1586_v27 = vpop.f32.mrf.mxu1 }
 0x132   : > { %v1587_v48 = vadd.f32 %v1586_v27, %v1558_v50  ;;  %v920_v50 = vld [vmem:[%s4696_s22 + $0x5c8] sm:$0xff] }
 0x133   : > { %1781 = vmatmul.bf16.vlgmr.msra.gmra.mxu0 %v4811_v12  ;;  %v1084_v38 = vpack.c.bf16 %v922_v47, %v920_v50  ;;  %v918_v50 = vld [vmem:[%s4696_s22 + $0x5b8] sm:$0xff]  ;;  %v948_v47 = vld [vmem:[%s4696_s22 + $0x6a8] sm:$0xff] }
 0x134   : > { %1809 = vmatmul.bf16.vlgmr.msra.gmra.mxu1 %v4813_v13 }
 0x135   : > { %1837 = vmatmul.bf16.vlgmr.msra.gmra.mxu2 %v4815_v14  ;;  %1914 = vmatpush.bf16.msrb.mxu1 %v1084_v38  ;;  %v880_v38 = vld [vmem:[%s4696_s22 + $0x488] sm:$0xff] }
 0x136   : > { %1865 = vmatmul.bf16.vlgmr.msra.gmra.mxu3 %v4817_v15  ;;  %v964_v15 = vld [vmem:[%s4696_s22 + $0x728] sm:$0xff] }
 0x138   : > { %v1614_v10 = vpop.f32.mrf.mxu2  ;;  %v1560_v8 = vpop.f32.mrf.mxu0 }
 0x139   : > { %v1615_v27 = vadd.f32 %v1614_v10, %v1587_v48  ;;  %v1642_v46 = vpop.f32.mrf.mxu3  ;;  %v1588_v30 = vpop.f32.mrf.mxu1  ;;  %v884_v10 = vld [vmem:[%s4696_s22 + $0x4a8] sm:$0xff] }
 0x13a   : > { %v1589_v48 = vadd.f32 %v1588_v30, %v1560_v8  ;;  %v1066_v26 = vpack.c.bf16 %v886_v25, %v884_v10  ;;  %v980_v8 = vld [vmem:[%s4696_s22 + $0x7a8] sm:$0xff]  ;;  %v1064_v25 = vpack.c.bf16 %v882_v60, %v880_v38  ;;  %v878_v38 = vld [vmem:[%s4696_s22 + $0x478] sm:$0xff] }
 0x13b   : > { %v5219_v33 = vadd.f32 %v1642_v46, %v1615_v27  ;;  %v1082_v27 = vpack.c.bf16 %v918_v50, %v916_v63  ;;  %v1098_v46 = vpack.c.bf16 %v950_v20, %v948_v47  ;;  %v1114_v44 = vpack.c.bf16 %v982_v4, %v980_v8  ;;  %v914_v63 = vld [vmem:[%s4696_s22 + $0x598] sm:$0xff]  ;;  %v944_v50 = vld [vmem:[%s4696_s22 + $0x688] sm:$0xff] }
 0x13c   : > { %1887 = vmatpush.bf16.msrb.mxu0 %v1066_v26  ;;  %v946_v47 = vld [vmem:[%s4696_s22 + $0x698] sm:$0xff]  ;;  %v1080_v20 = vpack.c.bf16 %v914_v63, %v912_v1  ;;  %v908_v60 = vld [vmem:[%s4696_s22 + $0x568] sm:$0xff] }
 0x13d   : > { %1915 = vmatpush.bf16.msrb.mxu1 %v1082_v27  ;;  %1943 = vmatpush.bf16.msrb.mxu2 %v1098_v46  ;;  %v1096_v27 = vpack.c.bf16 %v946_v47, %v944_v50  ;;  %v976_v46 = vld [vmem:[%s4696_s22 + $0x788] sm:$0xff]  ;;  %v978_v8 = vld [vmem:[%s4696_s22 + $0x798] sm:$0xff] }
 0x13e   : > { %1971 = vmatpush.bf16.msrb.mxu3 %v1114_v44  ;;  %v1112_v44 = vpack.c.bf16 %v978_v8, %v976_v46  ;;  %v972_v50 = vld [vmem:[%s4696_s22 + $0x768] sm:$0xff]  ;;  %v974_v47 = vld [vmem:[%s4696_s22 + $0x778] sm:$0xff] }
 0x13f   : > { %v872_v46 = vld [vmem:[%s4696_s22 + $0x448] sm:$0xff]  ;;  %v874_v8 = vld [vmem:[%s4696_s22 + $0x458] sm:$0xff] }
 0x140   : > { %v1616_v30 = vpop.f32.mrf.mxu2  ;;  %v1563_v59 = vpop.f32.mrf.mxu0  ;;  %1888 = vmatpush.bf16.msrb.mxu0 %v1064_v25 }
 0x141   : > { %v1617_v37 = vadd.f32 %v1616_v30, %v1589_v48  ;;  %v1644_v10 = vpop.f32.mrf.mxu3  ;;  %v1591_v26 = vpop.f32.mrf.mxu1  ;;  %1916 = vmatpush.bf16.msrb.mxu1 %v1080_v20  ;;  %v876_v30 = vld [vmem:[%s4696_s22 + $0x468] sm:$0xff]  ;;  %1944 = vmatpush.bf16.msrb.mxu2 %v1096_v27 }
 0x142   : > { %v1592_v48 = vadd.f32 %v1591_v26, %v1563_v59  ;;  %v1062_v1 = vpack.c.bf16 %v878_v38, %v876_v30  ;;  %v942_v59 = vld [vmem:[%s4696_s22 + $0x678] sm:$0xff]  ;;  %1972 = vmatpush.bf16.msrb.mxu3 %v1112_v44  ;;  %v1110_v26 = vpack.c.bf16 %v974_v47, %v972_v50  ;;  %v904_v30 = vld [vmem:[%s4696_s22 + $0x548] sm:$0xff] }
 0x143   : > { %v5237_v4 = vadd.f32 %v1644_v10, %v1617_v37  ;;  %1786 = vmatmul.bf16.gmra.mxu0 %v4874_v23  ;;  %v910_v37 = vld [vmem:[%s4696_s22 + $0x578] sm:$0xff]  ;;  %v940_v10 = vld [vmem:[%s4696_s22 + $0x668] sm:$0xff] }
 0x144   : > { %1814 = vmatmul.bf16.gmra.mxu1 %v4879_v29  ;;  %v1078_v25 = vpack.c.bf16 %v910_v37, %v908_v60  ;;  %v1094_v63 = vpack.c.bf16 %v942_v59, %v940_v10  ;;  %1889 = vmatpush.bf16.msrb.mxu0 %v1062_v1  ;;  %v1060_v60 = vpack.c.bf16 %v874_v8, %v872_v46  ;;  %v906_v37 = vld [vmem:[%s4696_s22 + $0x558] sm:$0xff]  ;;  %v936_v10 = vld [vmem:[%s4696_s22 + $0x648] sm:$0xff] }
 0x145   : > { %1842 = vmatmul.bf16.gmra.mxu2 %v4881_v35  ;;  %v938_v59 = vld [vmem:[%s4696_s22 + $0x658] sm:$0xff]  ;;  %v1076_v1 = vpack.c.bf16 %v906_v37, %v904_v30  ;;  %v968_v50 = vld [vmem:[%s4696_s22 + $0x748] sm:$0xff] }
 0x146   : > { %1870 = vmatmul.bf16.gmra.mxu3 %v4885_v39  ;;  %1917 = vmatpush.bf16.msrb.mxu1 %v1078_v25  ;;  %v1092_v25 = vpack.c.bf16 %v938_v59, %v936_v10  ;;  %v970_v47 = vld [vmem:[%s4696_s22 + $0x758] sm:$0xff]  ;;  %v868_v8 = vld [vmem:[%s4696_s22 + $0x428] sm:$0xff] }
 0x147   : > { %1945 = vmatpush.bf16.msrb.mxu2 %v1094_v63  ;;  %1973 = vmatpush.bf16.msrb.mxu3 %v1110_v26  ;;  %v1108_v46 = vpack.c.bf16 %v970_v47, %v968_v50  ;;  %v900_v39 = vld [vmem:[%s4696_s22 + $0x528] sm:$0xff]  ;;  %v1058_v63 = vpack.c.bf16 %v870_v0, %v868_v8  ;;  %v902_v30 = vld [vmem:[%s4696_s22 + $0x538] sm:$0xff] }
 0x148   : > { %v1619_v20 = vpop.f32.mrf.mxu2  ;;  %v1565_v27 = vpop.f32.mrf.mxu0  ;;  %1890 = vmatpush.bf16.msrb.mxu0 %v1060_v60  ;;  %v932_v37 = vld [vmem:[%s4696_s22 + $0x628] sm:$0xff]  ;;  %v934_v10 = vld [vmem:[%s4696_s22 + $0x638] sm:$0xff]  ;;  %v1074_v59 = vpack.c.bf16 %v902_v30, %v900_v39 }
 0x149   : > { %v1620_v38 = vadd.f32 %v1619_v20, %v1592_v48  ;;  %v1647_v2 = vpop.f32.mrf.mxu3  ;;  %v1593_v44 = vpop.f32.mrf.mxu1  ;;  %v1090_v26 = vpack.c.bf16 %v934_v10, %v932_v37  ;;  %v864_v0 = vld [vmem:[%s4696_s22 + $0x408] sm:$0xff]  ;;  %v866_v60 = vld [vmem:[%s4696_s22 + $0x418] sm:$0xff] }
 0x14a   : > { %v1594_v20 = vadd.f32 %v1593_v44, %v1565_v27  ;;  %1918 = vmatpush.bf16.msrb.mxu1 %v1076_v1  ;;  %v896_v44 = vld [vmem:[%s4696_s22 + $0x508] sm:$0xff]  ;;  %v1056_v47 = vpack.c.bf16 %v866_v60, %v864_v0  ;;  %v898_v8 = vld [vmem:[%s4696_s22 + $0x518] sm:$0xff] }
 0x14b   : > { %v5259_v48 = vadd.f32 %v1647_v2, %v1620_v38  ;;  %v966_v2 = vld [vmem:[%s4696_s22 + $0x738] sm:$0xff]  ;;  %1946 = vmatpush.bf16.msrb.mxu2 %v1092_v25  ;;  %1974 = vmatpush.bf16.msrb.mxu3 %v1108_v46  ;;  %v928_v30 = vld [vmem:[%s4696_s22 + $0x608] sm:$0xff]  ;;  %v1072_v37 = vpack.c.bf16 %v898_v8, %v896_v44 }
 0x14c   : > { %1891 = vmatpush.bf16.msrb.mxu0 %v1058_v63  ;;  %v1106_v38 = vpack.c.bf16 %v966_v2, %v964_v15  ;;  %v930_v23 = vld [vmem:[%s4696_s22 + $0x618] sm:$0xff]  ;;  %v960_v63 = vld [vmem:[%s4696_s22 + $0x708] sm:$0xff] }
 0x14d   : > { %v1088_v46 = vpack.c.bf16 %v930_v23, %v928_v30  ;;  %v962_v15 = vld [vmem:[%s4696_s22 + $0x718] sm:$0xff] }
 0x14e   : > { %1919 = vmatpush.bf16.msrb.mxu1 %v1074_v59  ;;  %v1104_v2 = vpack.c.bf16 %v962_v15, %v960_v63 }
 0x14f   : > { %1947 = vmatpush.bf16.msrb.mxu2 %v1090_v26  ;;  %1975 = vmatpush.bf16.msrb.mxu3 %v1106_v38 }
 0x150   : > { %v1621_v27 = vpop.f32.mrf.mxu2  ;;  %v1568_v39 = vpop.f32.mrf.mxu0  ;;  %1892 = vmatpush.bf16.msrb.mxu0 %v1056_v47 }
 0x151   : > { %v1622_v1 = vadd.f32 %v1621_v27, %v1594_v20  ;;  %v1649_v50 = vpop.f32.mrf.mxu3  ;;  %v1596_v25 = vpop.f32.mrf.mxu1 }
 0x152   : > { %v1597_v59 = vadd.f32 %v1596_v25, %v1568_v39  ;;  %1920 = vmatpush.bf16.msrb.mxu1 %v1072_v37 }
 0x153   : > { %v5277_v10 = vadd.f32 %v1649_v50, %v1622_v1  ;;  %1791 = vmatmul.bf16.gmra.mxu0 %v4950_v62  ;;  %1948 = vmatpush.bf16.msrb.mxu2 %v1088_v46 }
 0x154   : > { %1819 = vmatmul.bf16.gmra.mxu1 %v4955_v6  ;;  %1976 = vmatpush.bf16.msrb.mxu3 %v1104_v2 }
 0x155   : > { %1847 = vmatmul.bf16.gmra.mxu2 %v4957_v7 }
 0x156   : > { %1875 = vmatmul.bf16.gmra.mxu3 %v4961_v17 }
 0x158   : > { %v1624_v23 = vpop.f32.mrf.mxu2  ;;  %v1570_v27 = vpop.f32.mrf.mxu0 }
 0x159   : > { %v1625_v20 = vadd.f32 %v1624_v23, %v1597_v59  ;;  %v1652_v26 = vpop.f32.mrf.mxu3  ;;  %v1598_v0 = vpop.f32.mrf.mxu1 }
 0x15a   : > { %v1599_v38 = vadd.f32 %v1598_v0, %v1570_v27 }
 0x15b   : > { %v1653_v60 = vadd.f32 %v1652_v26, %v1625_v20 }
 0x160   : > { %v1626_v44 = vpop.f32.mrf.mxu2  ;;  %v1573_v39 = vpop.f32.mrf.mxu0 }
 0x161   : > { %v1627_v1 = vadd.f32 %v1626_v44, %v1599_v38  ;;  %v1654_v50 = vpop.f32.mrf.mxu3  ;;  %v1601_v47 = vpop.f32.mrf.mxu1 }
 0x162   : > { %v1602_v30 = vadd.f32 %v1601_v47, %v1573_v39 }
 0x163   : > { %v5283_v8 = vadd.f32 %v1654_v50, %v1627_v1  ;;  %1796 = vmatmul.bf16.gmra.mxu0 %v4981_v52 }
 0x164   : > { %1824 = vmatmul.bf16.gmra.mxu1 %v4983_v53 }
 0x165   : > { %1852 = vmatmul.bf16.gmra.mxu2 %v4985_v54 }
 0x166   : > { %1880 = vmatmul.bf16.gmra.mxu3 %v4987_v56 }
 0x168   : > { %v1629_v25 = vpop.f32.mrf.mxu2  ;;  %v1575_v63 = vpop.f32.mrf.mxu0 }
 0x169   : > { %v1630_v37 = vadd.f32 %v1629_v25, %v1602_v30  ;;  %v1657_v46 = vpop.f32.mrf.mxu3  ;;  %v1603_v15 = vpop.f32.mrf.mxu1 }
 0x16b   : > { %v1658_v59 = vadd.f32 %v1657_v46, %v1630_v37 }
 0x170   : > { %v1631_v2 = vpop.f32.mrf.mxu2  ;;  %v1670_v20 = vpop.f32.mrf.mxu0 }
 0x171   : > { %v1659_v23 = vpop.f32.mrf.mxu3  ;;  %v1671_v26 = vadd.f32 %v1670_v20, %v5219_v33  ;;  %v1698_v27 = vpop.f32.mrf.mxu1 }
 0x173   : > { %v1699_v0 = vadd.f32 %v1698_v27, %v1671_v26  ;;  %1893 = vmatmul.bf16.vlgmr.msrb.gmra.mxu0 %v5017_v11 }
 0x174   : > { %1921 = vmatmul.bf16.vlgmr.msrb.gmra.mxu1 %v5019_v16 }
 0x175   : > { %1949 = vmatmul.bf16.vlgmr.msrb.gmra.mxu2 %v5021_v21 }
 0x176   : > { %1977 = vmatmul.bf16.vlgmr.msrb.gmra.mxu3 %v5023_v9 }
 0x178   : > { %v1726_v38 = vpop.f32.mrf.mxu2  ;;  %v5294_v50 = vpop.f32.mrf.mxu0 }
 0x179   : > { %v1727_v44 = vadd.f32 %v1726_v38, %v1699_v0  ;;  %v1754_v1 = vpop.f32.mrf.mxu3  ;;  %v5296_v39 = vpop.f32.mrf.mxu1 }
 0x17b   : > { %v5298_v47 = vadd.f32 %v1754_v1, %v1727_v44 }
 0x180   : > { %v5300_v33 = vpop.f32.mrf.mxu2  ;;  %v1675_v25 = vpop.f32.mrf.mxu0 }
 0x181   : > { %v5302_v30 = vpop.f32.mrf.mxu3  ;;  %v1676_v37 = vadd.f32 %v1675_v25, %v5259_v48  ;;  %v1703_v46 = vpop.f32.mrf.mxu1 }
 0x183   : > { %v1704_v63 = vadd.f32 %v1703_v46, %v1676_v37  ;;  %1898 = vmatmul.bf16.gmra.mxu0 %v5088_v3 }
 0x184   : > { %1926 = vmatmul.bf16.gmra.mxu1 %v5093_v5 }
 0x185   : > { %1954 = vmatmul.bf16.gmra.mxu2 %v5095_v58 }
 0x186   : > { %1982 = vmatmul.bf16.gmra.mxu3 %v5099_v55 }
 0x188   : > { %v1731_v15 = vpop.f32.mrf.mxu2  ;;  %v5309_v20 = vpop.f32.mrf.mxu0 }
 0x189   : > { %v1732_v2 = vadd.f32 %v1731_v15, %v1704_v63  ;;  %v1759_v23 = vpop.f32.mrf.mxu3  ;;  %v5311_v26 = vpop.f32.mrf.mxu1 }
 0x18b   : > { %v5313_v27 = vadd.f32 %v1759_v23, %v1732_v2 }
 0x190   : > { %v5315_v48 = vpop.f32.mrf.mxu2  ;;  %v1680_v38 = vpop.f32.mrf.mxu0 }
 0x191   : > { %v5317_v0 = vpop.f32.mrf.mxu3  ;;  %v1681_v44 = vadd.f32 %v1680_v38, %v1653_v60  ;;  %v1708_v1 = vpop.f32.mrf.mxu1 }
 0x193   : > { %v1709_v25 = vadd.f32 %v1708_v1, %v1681_v44  ;;  %1903 = vmatmul.bf16.gmra.mxu0 %v5153_v43 }
 0x194   : > { %1931 = vmatmul.bf16.gmra.mxu1 %v5158_v32 }
 0x195   : > { %1959 = vmatmul.bf16.gmra.mxu2 %v5160_v42 }
 0x196   : > { %1987 = vmatmul.bf16.gmra.mxu3 %v5165_v45 }
 0x198   : > { %v1736_v37 = vpop.f32.mrf.mxu2  ;;  %v5323_v15 = vpop.f32.mrf.mxu0 }
 0x199   : > { %v1737_v46 = vadd.f32 %v1736_v37, %v1709_v25  ;;  %v1764_v63 = vpop.f32.mrf.mxu3  ;;  %v5325_v2 = vpop.f32.mrf.mxu1 }
 0x19b   : > { %v5327_v23 = vadd.f32 %v1764_v63, %v1737_v46 }
 0x1a0   : > { %v5329_v60 = vpop.f32.mrf.mxu2  ;;  %v1685_v44 = vpop.f32.mrf.mxu0 }
 0x1a1   : > { %v5331_v38 = vpop.f32.mrf.mxu3  ;;  %v1686_v1 = vadd.f32 %v1685_v44, %v1658_v59  ;;  %v1713_v55 = vpop.f32.mrf.mxu1 }
 0x1a3   : > { %v1714_v9 = vadd.f32 %v1713_v55, %v1686_v1  ;;  %1908 = vmatmul.bf16.gmra.mxu0 %v5187_v24 }
 0x1a4   : > { %1936 = vmatmul.bf16.gmra.mxu1 %v5189_v61 }
 0x1a5   : > { %1964 = vmatmul.bf16.gmra.mxu2 %v5191_v51 }
 0x1a6   : > { %1992 = vmatmul.bf16.gmra.mxu3 %v5193_v57 }
 0x1a8   : > { %v1741_v25 = vpop.f32.mrf.mxu2  ;;  %v1687_v63 = vpop.f32.mrf.mxu0 }
 0x1a9   : > { %v1742_v37 = vadd.f32 %v1741_v25, %v1714_v9  ;;  %v1769_v46 = vpop.f32.mrf.mxu3  ;;  %v1715_v45 = vpop.f32.mrf.mxu1 }
 0x1ab   : > { %v5337_v56 = vadd.f32 %v1769_v46, %v1742_v37 }
 0x1b0   : > { %v1743_v17 = vpop.f32.mrf.mxu2  ;;  %v1782_v59 = vpop.f32.mrf.mxu0 }
 0x1b1   : > { %v1771_v43 = vpop.f32.mrf.mxu3  ;;  %v1810_v44 = vpop.f32.mrf.mxu1 }
 0x1b2   : > { %v1811_v55 = vadd.f32 %v1810_v44, %v1782_v59 }
 0x1b8   : > { %v1838_v1 = vpop.f32.mrf.mxu2  ;;  %v1784_v61 = vpop.f32.mrf.mxu0 }
 0x1b9   : > { %v1839_v24 = vadd.f32 %v1838_v1, %v1811_v55  ;;  %v1866_v42 = vpop.f32.mrf.mxu3  ;;  %v1812_v32 = vpop.f32.mrf.mxu1 }
 0x1bb   : > { %v1867_v51 = vadd.f32 %v1866_v42, %v1839_v24 }
 0x1c0   : > { %v1840_v3 = vpop.f32.mrf.mxu2  ;;  %v1787_v58 = vpop.f32.mrf.mxu0 }
 0x1c1   : > { %v1868_v57 = vpop.f32.mrf.mxu3  ;;  %v1815_v9 = vpop.f32.mrf.mxu1 }
 0x1c2   : > { %v1816_v34 = vadd.f32 %v1815_v9, %v1787_v58 }
 0x1c8   : > { %v1843_v25 = vpop.f32.mrf.mxu2  ;;  %v1789_v45 = vpop.f32.mrf.mxu0 }
 0x1c9   : > { %v1871_v63 = vpop.f32.mrf.mxu3  ;;  %v1817_v37 = vpop.f32.mrf.mxu1  ;;  %v1844_v40 = vadd.f32 %v1843_v25, %v1816_v34 }
 0x1d0   : > { %v1845_v46 = vpop.f32.mrf.mxu2  ;;  %v1792_v43 = vpop.f32.mrf.mxu0 }
 0x1d1   : > { %v5339_v17 = vpop.f32.mrf.mxu3  ;;  %v1820_v5 = vpop.f32.mrf.mxu1 }
 0x1d2   : > { %v1821_v25 = vadd.f32 %v1820_v5, %v1792_v43 }
 0x1d8   : > { %v1848_v59 = vpop.f32.mrf.mxu2  ;;  %v5341_v55 = vpop.f32.mrf.mxu0 }
 0x1d9   : > { %v1876_v44 = vpop.f32.mrf.mxu3  ;;  %v5343_v1 = vpop.f32.mrf.mxu1 }
 0x1e0   : > { %v5345_v42 = vpop.f32.mrf.mxu2  ;;  %v5349_v11 = vpop.f32.mrf.mxu0 }
 0x1e1   : > { %v5347_v24 = vpop.f32.mrf.mxu3  ;;  %v5351_v21 = vpop.f32.mrf.mxu1 }
 0x1e8   : > { %v5353_v16 = vpop.f32.mrf.mxu2  ;;  %v1799_v54 = vpop.f32.mrf.mxu0 }
 0x1e9   : > { %v5355_v52 = vpop.f32.mrf.mxu3  ;;  %v1827_v53 = vpop.f32.mrf.mxu1  ;;  %v1813_v54 = vadd.f32 %v1812_v32, %v1784_v61 }
 0x1f0   : > { %v1855_v62 = vpop.f32.mrf.mxu2  ;;  %v1894_v6 = vpop.f32.mrf.mxu0 }
 0x1f1   : > { %v1883_v7 = vpop.f32.mrf.mxu3  ;;  %v1895_v35 = vadd.f32 %v1894_v6, %v1867_v51  ;;  %v1922_v29 = vpop.f32.mrf.mxu1  ;;  %v1841_v62 = vadd.f32 %v1840_v3, %v1813_v54  ;;  %v1849_v3 = vadd.f32 %v1848_v59, %v1821_v25 }
 0x1f2   : > { %v1872_v7 = vadd.f32 %v1871_v63, %v1844_v40 }
 0x1f3   : > { %v1923_v12 = vadd.f32 %v1922_v29, %v1895_v35  ;;  %v1869_v35 = vadd.f32 %v1868_v57, %v1841_v62  ;;  %v1818_v57 = vadd.f32 %v1817_v37, %v1789_v45 }
 0x1f8   : > { %v1950_v14 = vpop.f32.mrf.mxu2  ;;  %v1896_v31 = vpop.f32.mrf.mxu0 }
 0x1f9   : > { %v1951_v13 = vadd.f32 %v1950_v14, %v1923_v12  ;;  %v1978_v36 = vpop.f32.mrf.mxu3  ;;  %v1924_v28 = vpop.f32.mrf.mxu1  ;;  %v1897_v12 = vadd.f32 %v1896_v31, %v1869_v35 }
 0x1fb   : > { %v5357_v41 = vadd.f32 %v1978_v36, %v1951_v13  ;;  %v1673_v36 = vadd.f32 %v5294_v50, %v5237_v4  ;;  %v1925_v32 = vadd.f32 %v1924_v28, %v1897_v12  ;;  %v1877_v4 = vadd.f32 %v1876_v44, %v1849_v3 }
 0x1fd   : > { %v1997_v49 = vmax.f32 %v5298_v47, %v5357_v41  ;;  %v1701_v40 = vadd.f32 %v5296_v39, %v1673_v36  ;;  %v3780_v36 = vld [vmem:[%s4386_s30 + $0x8f0] sm:$0xff]  ;;  %v3842_v47 = vld [vmem:[%s4386_s30 + $0xae0] sm:$0xff] }
 0x1ff   : > { %v1729_v31 = vadd.f32 %v5300_v33, %v1701_v40  ;;  %v1678_v33 = vadd.f32 %v5309_v20, %v5277_v10  ;;  %v1823_v20 = vadd.f32 %v5343_v1, %v5341_v55  ;;  %v3796_v1 = vld [vmem:[%s4386_s30 + $0x970] sm:$0xff] }
 0x200   : > { %v1952_v53 = vpop.f32.mrf.mxu2  ;;  %v1899_v6 = vpop.f32.mrf.mxu0 }
 0x201   : > { %v1980_v19 = vpop.f32.mrf.mxu3  ;;  %v1927_v51 = vpop.f32.mrf.mxu1  ;;  %v1900_v29 = vadd.f32 %v1899_v6, %v1872_v7  ;;  %v1953_v63 = vadd.f32 %v1952_v53, %v1925_v32  ;;  %v1846_v7 = vadd.f32 %v1845_v46, %v1818_v57  ;;  %v1757_v28 = vadd.f32 %v5302_v30, %v1729_v31  ;;  %v3764_v32 = vld [vmem:[%s4386_s30 + $0x870] sm:$0xff]  ;;  %v3794_v57 = vld [vmem:[%s4386_s30 + $0x960] sm:$0xff] }
 0x202   : > { %v1826_v30 = vadd.f32 %v5351_v21, %v5349_v11  ;;  %v3781_v11 = vld [vmem:[%s4386_s30 + $0x8f8] sm:$0xff]  ;;  %v3778_v21 = vld [vmem:[%s4386_s30 + $0x8e0] sm:$0xff] }
 0x203   : > { %v1928_v14 = vadd.f32 %v1927_v51, %v1900_v29  ;;  %v1874_v39 = vadd.f32 %v5339_v17, %v1846_v7  ;;  %v1706_v29 = vadd.f32 %v5311_v26, %v1678_v33  ;;  %v1851_v26 = vadd.f32 %v5345_v42, %v1823_v20  ;;  %v3797_v42 = vld [vmem:[%s4386_s30 + $0x978] sm:$0xff]  ;;  %v3795_v7 = vld [vmem:[%s4386_s30 + $0x968] sm:$0xff] }
 0x204   : > { %v1854_v35 = vadd.f32 %v5353_v16, %v1826_v30  ;;  %v2347_v16 = vpack.c.bf16 %v3781_v11, %v3780_v36  ;;  %v1683_v33 = vadd.f32 %v5323_v15, %v5283_v8  ;;  %v3772_v15 = vld [vmem:[%s4386_s30 + $0x8b0] sm:$0xff] }
 0x206   : > { %2858 = vmatpush.bf16.msra.mxu2 %v2347_v16  ;;  %v1711_v36 = vadd.f32 %v5325_v2, %v1683_v33  ;;  %v3753_v33 = vld [vmem:[%s4386_s30 + $0x818] sm:$0xff] }
 0x208   : > { %v1955_v18 = vpop.f32.mrf.mxu2  ;;  %v1901_v58 = vpop.f32.mrf.mxu0 }
 0x209   : > { %v1956_v13 = vadd.f32 %v1955_v18, %v1928_v14  ;;  %v1983_v34 = vpop.f32.mrf.mxu3  ;;  %v1929_v9 = vpop.f32.mrf.mxu1  ;;  %v1981_v18 = vadd.f32 %v1980_v19, %v1953_v63  ;;  %v1902_v59 = vadd.f32 %v1901_v58, %v1874_v39  ;;  %v1734_v14 = vadd.f32 %v5315_v48, %v1706_v29  ;;  %v3777_v63 = vld [vmem:[%s4386_s30 + $0x8d8] sm:$0xff]  ;;  %v3760_v39 = vld [vmem:[%s4386_s30 + $0x850] sm:$0xff] }
 0x20b   : > { %v1984_v61 = vadd.f32 %v1983_v34, %v1956_v13  ;;  %v2000_v43 = vmax.f32 %v1757_v28, %v1981_v18  ;;  %v1930_v17 = vadd.f32 %v1929_v9, %v1902_v59  ;;  %v3779_v34 = vld [vmem:[%s4386_s30 + $0x8e8] sm:$0xff]  ;;  %v1762_v40 = vadd.f32 %v5317_v0, %v1734_v14  ;;  %v3773_v14 = vld [vmem:[%s4386_s30 + $0x8b8] sm:$0xff] }
 0x20c   : > { %v2346_v25 = vpack.c.bf16 %v3779_v34, %v3778_v21  ;;  %v3763_v18 = vld [vmem:[%s4386_s30 + $0x868] sm:$0xff]  ;;  %v2354_v0 = vpack.c.bf16 %v3795_v7, %v3794_v57  ;;  %v2343_v16 = vpack.c.bf16 %v3773_v14, %v3772_v15  ;;  %v1739_v34 = vadd.f32 %v5329_v60, %v1711_v36  ;;  %v3769_v60 = vld [vmem:[%s4386_s30 + $0x898] sm:$0xff]  ;;  %v3756_v57 = vld [vmem:[%s4386_s30 + $0x830] sm:$0xff] }
 0x20d   : > { %v2003_v54 = vmax.f32 %v5313_v27, %v1984_v61  ;;  %v3765_v61 = vld [vmem:[%s4386_s30 + $0x878] sm:$0xff]  ;;  %v3836_v36 = vld [vmem:[%s4386_s30 + $0xab0] sm:$0xff] }
 0x20e   : > { %v2339_v31 = vpack.c.bf16 %v3765_v61, %v3764_v32  ;;  %2859 = vmatpush.bf16.msra.mxu2 %v2346_v25  ;;  %v3767_v61 = vld [vmem:[%s4386_s30 + $0x888] sm:$0xff]  ;;  %v3829_v14 = vld [vmem:[%s4386_s30 + $0xa78] sm:$0xff] }
 0x20f   : > { %2004 = vmax.xlane.f32.xlu2 %v2003_v54  ;;  %v2355_v54 = vpack.c.bf16 %v3797_v42, %v3796_v1  ;;  %v3768_v1 = vld [vmem:[%s4386_s30 + $0x890] sm:$0xff]  ;;  %v3759_v42 = vld [vmem:[%s4386_s30 + $0x848] sm:$0xff] }
 0x210   : > { %v1957_v62 = vpop.f32.mrf.mxu2  ;;  %v1904_v6 = vpop.f32.mrf.mxu0  ;;  %2845 = vmatpush.bf16.msra.mxu1 %v2339_v31  ;;  %v2341_v25 = vpack.c.bf16 %v3769_v60, %v3768_v1  ;;  %v3789_v31 = vld [vmem:[%s4386_s30 + $0x938] sm:$0xff]  ;;  %v6351_v60 = vld [vmem:[#allocation3_spill] sm:$0xff] }
 0x211   : > { %v1985_v50 = vpop.f32.mrf.mxu3  ;;  %v1932_v51 = vpop.f32.mrf.mxu1  ;;  %v1905_v5 = vadd.f32 %v1904_v6, %v1877_v4  ;;  %v1958_v12 = vadd.f32 %v1957_v62, %v1930_v17  ;;  %v1879_v62 = vadd.f32 %v5347_v24, %v1851_v26  ;;  %v3762_v4 = vld [vmem:[%s4386_s30 + $0x860] sm:$0xff]  ;;  %2871 = vmatpush.bf16.msra.mxu3 %v2355_v54  ;;  %v3788_v54 = vld [vmem:[%s4386_s30 + $0x930] sm:$0xff] }
 0x212   : > { %v2338_v6 = vpack.c.bf16 %v3763_v18, %v3762_v4  ;;  %v3774_v24 = vld [vmem:[%s4386_s30 + $0x8c0] sm:$0xff]  ;;  %v2351_v41 = vpack.c.bf16 %v3789_v31, %v3788_v54  ;;  %v3787_v18 = vld [vmem:[%s4386_s30 + $0x928] sm:$0xff] }
 0x213   : > { %v1933_v53 = vadd.f32 %v1932_v51, %v1905_v5  ;;  %v1986_v58 = vadd.f32 %v1985_v50, %v1958_v12  ;;  %v3792_v51 = vld [vmem:[%s4386_s30 + $0x950] sm:$0xff]  ;;  %v3793_v5 = vld [vmem:[%s4386_s30 + $0x958] sm:$0xff]  ;;  %v3790_v12 = vld [vmem:[%s4386_s30 + $0x940] sm:$0xff] }
 0x214   : > { %2846 = vmatpush.bf16.msra.mxu1 %v2338_v6  ;;  %v3786_v4 = vld [vmem:[%s4386_s30 + $0x920] sm:$0xff] }
 0x215   : > { %v2006_v50 = vmax.f32 %v1762_v40, %v1986_v58  ;;  %2872 = vmatpush.bf16.msra.mxu3 %v2354_v0  ;;  %v3844_v40 = vld [vmem:[%s4386_s30 + $0xaf0] sm:$0xff]  ;;  %v2350_v0 = vpack.c.bf16 %v3787_v18, %v3786_v4  ;;  %v3754_v6 = vld [vmem:[%s4386_s30 + $0x820] sm:$0xff] }
 0x216   : > { %v3822_v31 = vld [vmem:[%s4386_s30 + $0xa40] sm:$0xff] }
 0x217   : > { %2001 = vmax.xlane.f32.xlu2 %v2000_v43  ;;  %v3761_v43 = vld [vmem:[%s4386_s30 + $0x858] sm:$0xff] }
 0x218   : > { %v1960_v27 = vpop.f32.mrf.mxu2  ;;  %v1906_v37 = vpop.f32.mrf.mxu0  ;;  %v2337_v29 = vpack.c.bf16 %v3761_v43, %v3760_v39  ;;  %v3841_v39 = vld [vmem:[%s4386_s30 + $0xad8] sm:$0xff]  ;;  %v3784_v43 = vld [vmem:[%s4386_s30 + $0x910] sm:$0xff] }
 0x219   : > { %v1961_v45 = vadd.f32 %v1960_v27, %v1933_v53  ;;  %v1988_v19 = vpop.f32.mrf.mxu3  ;;  %v5370_v46 = vpop.f32.mrf.mxu1  ;;  %v1907_v59 = vadd.f32 %v1906_v37, %v1879_v62  ;;  %v3775_v27 = vld [vmem:[%s4386_s30 + $0x8c8] sm:$0xff] }
 0x21a   : > { %2847 = vmatpush.bf16.msra.mxu1 %v2337_v29  ;;  %v3843_v62 = vld [vmem:[%s4386_s30 + $0xae8] sm:$0xff] }
 0x21b   : > { %v1989_v44 = vadd.f32 %v1988_v19, %v1961_v45  ;;  %v1935_v20 = vadd.f32 %v5370_v46, %v1907_v59  ;;  %v3771_v46 = vld [vmem:[%s4386_s30 + $0x8a8] sm:$0xff]  ;;  %v3785_v59 = vld [vmem:[%s4386_s30 + $0x918] sm:$0xff] }
 0x21d   : > { %v2009_v10 = vmax.f32 %v5327_v23, %v1989_v44  ;;  %v1882_v23 = vadd.f32 %v5355_v52, %v1854_v35  ;;  %v3776_v52 = vld [vmem:[%s4386_s30 + $0x8d0] sm:$0xff]  ;;  %v2353_v44 = vpack.c.bf16 %v3793_v5, %v3792_v51  ;;  %v2344_v35 = vpack.c.bf16 %v3775_v27, %v3774_v24  ;;  %v3755_v51 = vld [vmem:[%s4386_s30 + $0x828] sm:$0xff] }
 0x21e   : > { %v2345_v28 = vpack.c.bf16 %v3777_v63, %v3776_v52  ;;  %v2334_v5 = vpack.c.bf16 %v3755_v51, %v3754_v6  ;;  %v2349_v24 = vpack.c.bf16 %v3785_v59, %v3784_v43  ;;  %v3752_v27 = vld [vmem:[%s4386_s30 + $0x810] sm:$0xff]  ;;  %v3907_v43 = vld [vmem:[%s4386_s30 + $0xce8] sm:$0xff]  ;;  %v3850_v59 = vld [vmem:[%s4386_s30 + $0xb20] sm:$0xff] }
 0x21f   : > { %2010 = vmax.xlane.f32.xlu1 %v2009_v10  ;;  %v3791_v10 = vld [vmem:[%s4386_s30 + $0x948] sm:$0xff]  ;;  %2873 = vmatpush.bf16.msra.mxu3 %v2353_v44  ;;  %v3820_v51 = vld [vmem:[%s4386_s30 + $0xa30] sm:$0xff] }
 0x220   : > { %v1962_v13 = vpop.f32.mrf.mxu2  ;;  %v1909_v48 = vpop.f32.mrf.mxu0  ;;  %2860 = vmatpush.bf16.msra.mxu2 %v2345_v28  ;;  %v2352_v26 = vpack.c.bf16 %v3791_v10, %v3790_v12  ;;  %v3840_v28 = vld [vmem:[%s4386_s30 + $0xad0] sm:$0xff]  ;;  %v3750_v10 = vld [vmem:[%s4386_s30 + $0x800] sm:$0xff] }
 0x221   : > { %v5386_v55 = vpop.f32.mrf.mxu3  ;;  %v1937_v9 = vpop.f32.mrf.mxu1  ;;  %v1910_v3 = vadd.f32 %v1909_v48, %v1882_v23  ;;  %v1963_v11 = vadd.f32 %v1962_v13, %v1935_v20  ;;  %v3770_v23 = vld [vmem:[%s4386_s30 + $0x8a0] sm:$0xff]  ;;  %v1767_v48 = vadd.f32 %v5331_v38, %v1739_v34  ;;  %v3751_v20 = vld [vmem:[%s4386_s30 + $0x808] sm:$0xff] }
 0x222   : > { %v3766_v38 = vld [vmem:[%s4386_s30 + $0x880] sm:$0xff]  ;;  %v2332_v15 = vpack.c.bf16 %v3751_v20, %v3750_v10  ;;  %v3859_v34 = vld [vmem:[%s4386_s30 + $0xb68] sm:$0xff]  ;;  %v3817_v10 = vld [vmem:[%s4386_s30 + $0xa18] sm:$0xff] }
 0x223   : > { %v1938_v53 = vadd.f32 %v1937_v9, %v1910_v3  ;;  %v1991_v2 = vadd.f32 %v5386_v55, %v1963_v11  ;;  %2874 = vmatpush.bf16.msra.mxu3 %v2352_v26  ;;  %v3758_v55 = vld [vmem:[%s4386_s30 + $0x840] sm:$0xff]  ;;  %v3845_v3 = vld [vmem:[%s4386_s30 + $0xaf8] sm:$0xff]  ;;  %v2340_v52 = vpack.c.bf16 %v3767_v61, %v3766_v38 }
 0x224   : > { %2861 = vmatpush.bf16.msra.mxu2 %v2344_v35  ;;  %v2336_v32 = vpack.c.bf16 %v3759_v42, %v3758_v55  ;;  %v2379_v63 = vpack.c.bf16 %v3845_v3, %v3844_v40  ;;  %v3861_v35 = vld [vmem:[%s4386_s30 + $0xb78] sm:$0xff]  ;;  %v3824_v42 = vld [vmem:[%s4386_s30 + $0xa50] sm:$0xff]  ;;  %v3854_v3 = vld [vmem:[%s4386_s30 + $0xb40] sm:$0xff] }
 0x225   : > { %v2012_v9 = vmax.f32 %v1767_v48, %v1991_v2  ;;  %v3837_v11 = vld [vmem:[%s4386_s30 + $0xab8] sm:$0xff]  ;;  %v3834_v2 = vld [vmem:[%s4386_s30 + $0xaa0] sm:$0xff] }
 0x226   : > { %2848 = vmatpush.bf16.msra.mxu1 %v2336_v32  ;;  %v2375_v26 = vpack.c.bf16 %v3837_v11, %v3836_v36  ;;  %v6350_v48 = vld [vmem:[#allocation2_spill] sm:$0xff]  ;;  %v3825_v38 = vld [vmem:[%s4386_s30 + $0xa58] sm:$0xff]  ;;  %v3832_v32 = vld [vmem:[%s4386_s30 + $0xa90] sm:$0xff] }
 0x227   : > { %2007 = vmax.xlane.f32.xlu1 %v2006_v50  ;;  %2875 = vmatpush.bf16.msra.mxu3 %v2351_v41  ;;  %v2378_v50 = vpack.c.bf16 %v3843_v62, %v3842_v47  ;;  %v2369_v61 = vpack.c.bf16 %v3825_v38, %v3824_v42  ;;  %v3833_v40 = vld [vmem:[%s4386_s30 + $0xa98] sm:$0xff]  ;;  %v3830_v41 = vld [vmem:[%s4386_s30 + $0xa80] sm:$0xff]  ;;  %v3908_v47 = vld [vmem:[%s4386_s30 + $0xcf0] sm:$0xff] }
 0x228   : > { %v1965_v45 = vpop.f32.mrf.mxu2  ;;  %v1911_v17 = vpop.f32.mrf.mxu0  ;;  %2862 = vmatpush.bf16.msra.mxu2 %v2343_v16  ;;  %v3858_v16 = vld [vmem:[%s4386_s30 + $0xb60] sm:$0xff]  ;;  %v3909_v62 = vld [vmem:[%s4386_s30 + $0xcf8] sm:$0xff]  ;;  %v3847_v11 = vld [vmem:[%s4386_s30 + $0xb08] sm:$0xff] }
 0x229   : > { %v1966_v19 = vadd.f32 %v1965_v45, %v1938_v53  ;;  %v1993_v30 = vpop.f32.mrf.mxu3  ;;  %v1939_v37 = vpop.f32.mrf.mxu1  ;;  %v2377_v53 = vpack.c.bf16 %v3841_v39, %v3840_v28  ;;  %v2333_v45 = vpack.c.bf16 %v3753_v33, %v3752_v27  ;;  %v3783_v17 = vld [vmem:[%s4386_s30 + $0x908] sm:$0xff]  ;;  %v2411_v18 = vpack.c.bf16 %v3909_v62, %v3908_v47  ;;  %v3821_v28 = vld [vmem:[%s4386_s30 + $0xa38] sm:$0xff]  ;;  %v3818_v33 = vld [vmem:[%s4386_s30 + $0xa20] sm:$0xff] }
 0x22a   : > { %v3860_v37 = vld [vmem:[%s4386_s30 + $0xb70] sm:$0xff]  ;;  %v2367_v39 = vpack.c.bf16 %v3821_v28, %v3820_v51  ;;  %v3846_v36 = vld [vmem:[%s4386_s30 + $0xb00] sm:$0xff]  ;;  %v6353_v42 = vld [vmem:[#allocation5_spill] sm:$0xff] }
 0x22b   : > { %v1994_v8 = vadd.f32 %v1993_v30, %v1966_v19  ;;  %2876 = vmatpush.bf16.msra.mxu3 %v2350_v0  ;;  %v3839_v19 = vld [vmem:[%s4386_s30 + $0xac8] sm:$0xff]  ;;  %v3782_v30 = vld [vmem:[%s4386_s30 + $0x900] sm:$0xff]  ;;  %v2387_v12 = vpack.c.bf16 %v3861_v35, %v3860_v37  ;;  %v3853_v0 = vld [vmem:[%s4386_s30 + $0xb38] sm:$0xff] }
 0x22c   : > { %v2348_v29 = vpack.c.bf16 %v3783_v17, %v3782_v30  ;;  %v3905_v30 = vld [vmem:[%s4386_s30 + $0xcd8] sm:$0xff]  ;;  %v6352_v17 = vld [vmem:[#allocation8_spill] sm:$0xff]  ;;  %v3890_v38 = vld [vmem:[%s4386_s30 + $0xc60] sm:$0xff] }
 0x22d   : > { %v2015_v21 = vmax.f32 %v5337_v56, %v1994_v8  ;;  %v2342_v56 = vpack.c.bf16 %v3771_v46, %v3770_v23  ;;  %v3828_v8 = vld [vmem:[%s4386_s30 + $0xa70] sm:$0xff]  ;;  %v3826_v23 = vld [vmem:[%s4386_s30 + $0xa60] sm:$0xff]  ;;  %v2386_v46 = vpack.c.bf16 %v3859_v34, %v3858_v16  ;;  %v3849_v37 = vld [vmem:[%s4386_s30 + $0xb18] sm:$0xff] }
 0x22e   : > { %v3925_v16 = vld [vmem:[%s4386_s30 + $0xd78] sm:$0xff]  ;;  %v3896_v47 = vld [vmem:[%s4386_s30 + $0xc90] sm:$0xff]  ;;  %v3887_v51 = vld [vmem:[%s4386_s30 + $0xc48] sm:$0xff] }
 0x22f   : > { %2016 = vmax.xlane.f32.xlu0 %v2015_v21  ;;  %2863 = vmatpush.bf16.msra.mxu2 %v2342_v56  ;;  %v2371_v21 = vpack.c.bf16 %v3829_v14, %v3828_v8  ;;  %v3902_v8 = vld [vmem:[%s4386_s30 + $0xcc0] sm:$0xff] }
 0x230   : > { %v1967_v58 = vpop.f32.mrf.mxu2  ;;  %2877 = vmatpush.bf16.msra.mxu3 %v2349_v24  ;;  %v3894_v28 = vld [vmem:[%s4386_s30 + $0xc80] sm:$0xff] }
 0x231   : > { %v1995_v13 = vpop.f32.mrf.mxu3  ;;  %v3827_v58 = vld [vmem:[%s4386_s30 + $0xa68] sm:$0xff] }
 0x232   : > { %v3835_v13 = vld [vmem:[%s4386_s30 + $0xaa8] sm:$0xff]  ;;  %v2370_v56 = vpack.c.bf16 %v3827_v58, %v3826_v23  ;;  %v3814_v23 = vld [vmem:[%s4386_s30 + $0xa00] sm:$0xff] }
 0x233   : > { %2864 = vmatpush.bf16.msra.mxu2 %v2341_v25  ;;  %v2374_v1 = vpack.c.bf16 %v3835_v13, %v3834_v2  ;;  %v3857_v25 = vld [vmem:[%s4386_s30 + $0xb58] sm:$0xff]  ;;  %v3892_v2 = vld [vmem:[%s4386_s30 + $0xc70] sm:$0xff] }
 0x234   : > { %2878 = vmatpush.bf16.msra.mxu3 %v2348_v29  ;;  %v3848_v29 = vld [vmem:[%s4386_s30 + $0xb10] sm:$0xff]  ;;  %v3893_v13 = vld [vmem:[%s4386_s30 + $0xc78] sm:$0xff] }
 0x235   : > { %v2381_v35 = vpack.c.bf16 %v3849_v37, %v3848_v29 }
 0x237   : > { %2013 = vmax.xlane.f32.xlu0 %v2012_v9  ;;  %2865 = vmatpush.bf16.msra.mxu2 %v2340_v52  ;;  %v3856_v9 = vld [vmem:[%s4386_s30 + $0xb50] sm:$0xff]  ;;  %v3855_v52 = vld [vmem:[%s4386_s30 + $0xb48] sm:$0xff] }
 0x238   : > { %2923 = vmatpush.bf16.msrb.mxu3 %v2387_v12  ;;  %v2385_v55 = vpack.c.bf16 %v3857_v25, %v3856_v9  ;;  %v2384_v54 = vpack.c.bf16 %v3855_v52, %v3854_v3  ;;  %v3816_v12 = vld [vmem:[%s4386_s30 + $0xa10] sm:$0xff]  ;;  %v3922_v9 = vld [vmem:[%s4386_s30 + $0xd60] sm:$0xff]  ;;  %v3923_v25 = vld [vmem:[%s4386_s30 + $0xd68] sm:$0xff] }
 0x239   : > { %2879 = vmatmul.bf16.vlgmr.msra.gmra.mxu3 %v6350_v48  ;;  %v2365_v20 = vpack.c.bf16 %v3817_v10, %v3816_v12  ;;  %v2403_v48 = vpack.c.bf16 %v3893_v13, %v3892_v2  ;;  %v6354_v3 = vld [vmem:[#allocation6_spill] sm:$0xff]  ;;  %v3915_v12 = vld [vmem:[%s4386_s30 + $0xd28] sm:$0xff]  ;;  %v3881_v2 = vld [vmem:[%s4386_s30 + $0xc18] sm:$0xff] }
 0x23a   : > { %2866 = vmatmul.bf16.vlgmr.msra.gmra.mxu2 %v4496_v22  ;;  %v3838_v22 = vld [vmem:[%s4386_s30 + $0xac0] sm:$0xff] }
 0x23b   : > { %2910 = vmatpush.bf16.msrb.mxu2 %v2379_v63  ;;  %v2376_v44 = vpack.c.bf16 %v3839_v19, %v3838_v22  ;;  %v2373_v63 = vpack.c.bf16 %v3833_v40, %v3832_v32  ;;  %v3819_v22 = vld [vmem:[%s4386_s30 + $0xa28] sm:$0xff] }
 0x23c   : > { %2924 = vmatpush.bf16.msrb.mxu3 %v2386_v46  ;;  %v2366_v19 = vpack.c.bf16 %v3819_v22, %v3818_v33  ;;  %v3815_v46 = vld [vmem:[%s4386_s30 + $0xa08] sm:$0xff]  ;;  %v3917_v33 = vld [vmem:[%s4386_s30 + $0xd38] sm:$0xff] }
 0x23d   : > { %v2364_v58 = vpack.c.bf16 %v3815_v46, %v3814_v23  ;;  %v3891_v32 = vld [vmem:[%s4386_s30 + $0xc68] sm:$0xff] }
 0x23e   : > { %v3899_v40 = vld [vmem:[%s4386_s30 + $0xca8] sm:$0xff]  ;;  %v2402_v52 = vpack.c.bf16 %v3891_v32, %v3890_v38  ;;  %v3989_v38 = vld [vmem:[%s4386_s30 + $0xf78] sm:$0xff] }
 0x23f   : > { %1998 = vmax.xlane.f32.xlu0 %v1997_v49  ;;  %v3757_v49 = vld [vmem:[%s4386_s30 + $0x838] sm:$0xff]  ;;  %2911 = vmatpush.bf16.msrb.mxu2 %v2378_v50  ;;  %v3852_v50 = vld [vmem:[%s4386_s30 + $0xb30] sm:$0xff] }
 0x240   : > { %v2335_v7 = vpack.c.bf16 %v3757_v49, %v3756_v57  ;;  %2925 = vmatpush.bf16.msrb.mxu3 %v2385_v55  ;;  %v3823_v57 = vld [vmem:[%s4386_s30 + $0xa48] sm:$0xff]  ;;  %v2383_v6 = vpack.c.bf16 %v3853_v0, %v3852_v50  ;;  %v2418_v55 = vpack.c.bf16 %v3923_v25, %v3922_v9  ;;  %v3910_v9 = vld [vmem:[%s4386_s30 + $0xd00] sm:$0xff] }
 0x241   : > { %v3831_v49 = vld [vmem:[%s4386_s30 + $0xa88] sm:$0xff] }
 0x242   : > { %2849 = vmatpush.bf16.msra.mxu1 %v2335_v7  ;;  %v2368_v7 = vpack.c.bf16 %v3823_v57, %v3822_v31  ;;  %v2372_v4 = vpack.c.bf16 %v3831_v49, %v3830_v41  ;;  %v3921_v31 = vld [vmem:[%s4386_s30 + $0xd58] sm:$0xff]  ;;  %v3888_v41 = vld [vmem:[%s4386_s30 + $0xc50] sm:$0xff]  ;;  %v3919_v50 = vld [vmem:[%s4386_s30 + $0xd48] sm:$0xff] }
 0x243   : > { %2912 = vmatpush.bf16.msrb.mxu2 %v2377_v53  ;;  %v3851_v53 = vld [vmem:[%s4386_s30 + $0xb28] sm:$0xff]  ;;  %v3889_v49 = vld [vmem:[%s4386_s30 + $0xc58] sm:$0xff] }
 0x244   : > { %2926 = vmatpush.bf16.msrb.mxu3 %v2384_v54  ;;  %v2382_v27 = vpack.c.bf16 %v3851_v53, %v3850_v59  ;;  %v3920_v54 = vld [vmem:[%s4386_s30 + $0xd50] sm:$0xff]  ;;  %v2401_v62 = vpack.c.bf16 %v3889_v49, %v3888_v41  ;;  %v3973_v59 = vld [vmem:[%s4386_s30 + $0xef8] sm:$0xff]  ;;  %v3911_v25 = vld [vmem:[%s4386_s30 + $0xd08] sm:$0xff] }
 0x245   : > { %v2417_v57 = vpack.c.bf16 %v3921_v31, %v3920_v54  ;;  %v3964_v54 = vld [vmem:[%s4386_s30 + $0xeb0] sm:$0xff]  ;;  %v3965_v41 = vld [vmem:[%s4386_s30 + $0xeb8] sm:$0xff]  ;;  %v3986_v49 = vld [vmem:[%s4386_s30 + $0xf60] sm:$0xff] }
 0x246   : > { %2850 = vmatpush.bf16.msra.mxu1 %v2334_v5  ;;  %v3906_v5 = vld [vmem:[%s4386_s30 + $0xce0] sm:$0xff] }
 0x247   : > { %2913 = vmatpush.bf16.msrb.mxu2 %v2376_v44  ;;  %v2410_v24 = vpack.c.bf16 %v3907_v43, %v3906_v5  ;;  %v3972_v43 = vld [vmem:[%s4386_s30 + $0xef0] sm:$0xff] }
 0x248   : > { %2927 = vmatpush.bf16.msrb.mxu3 %v2383_v6  ;;  %v3886_v6 = vld [vmem:[%s4386_s30 + $0xc40] sm:$0xff] }
 0x249   : > { %v2400_v5 = vpack.c.bf16 %v3887_v51, %v3886_v6 }
 0x24a   : > { %2851 = vmatpush.bf16.msra.mxu1 %v2333_v45  ;;  %v3904_v45 = vld [vmem:[%s4386_s30 + $0xcd0] sm:$0xff] }
 0x24b   : > { %2914 = vmatpush.bf16.msrb.mxu2 %v2375_v26  ;;  %v2409_v44 = vpack.c.bf16 %v3905_v30, %v3904_v45  ;;  %v3924_v26 = vld [vmem:[%s4386_s30 + $0xd70] sm:$0xff] }
 0x24c   : > { %2928 = vmatpush.bf16.msrb.mxu3 %v2382_v27  ;;  %v2419_v34 = vpack.c.bf16 %v3925_v16, %v3924_v26  ;;  %v3916_v27 = vld [vmem:[%s4386_s30 + $0xd30] sm:$0xff] }
 0x24d   : > { %v2415_v22 = vpack.c.bf16 %v3917_v33, %v3916_v27  ;;  %v3884_v45 = vld [vmem:[%s4386_s30 + $0xc30] sm:$0xff]  ;;  %v3985_v27 = vld [vmem:[%s4386_s30 + $0xf58] sm:$0xff] }
 0x24e   : > { %2852 = vmatpush.bf16.msra.mxu1 %v2332_v15  ;;  %v3903_v15 = vld [vmem:[%s4386_s30 + $0xcc8] sm:$0xff]  ;;  %v3912_v16 = vld [vmem:[%s4386_s30 + $0xd10] sm:$0xff] }
 0x24f   : > { %2915 = vmatpush.bf16.msrb.mxu2 %v2374_v1  ;;  %v2408_v14 = vpack.c.bf16 %v3903_v15, %v3902_v8  ;;  %v3901_v1 = vld [vmem:[%s4386_s30 + $0xcb8] sm:$0xff]  ;;  %v3882_v15 = vld [vmem:[%s4386_s30 + $0xc20] sm:$0xff] }
 0x250   : > { %2929 = vmatpush.bf16.msrb.mxu3 %v2381_v35  ;;  %v3914_v35 = vld [vmem:[%s4386_s30 + $0xd20] sm:$0xff] }
 0x251   : > { %2853 = vmatmul.bf16.vlgmr.msra.gmra.mxu1 %v6351_v60  ;;  %v2414_v10 = vpack.c.bf16 %v3915_v12, %v3914_v35  ;;  %v3808_v35 = vld [vmem:[%s4386_s30 + $0x9d0] sm:$0xff] }
 0x252   : > { %2897 = vmatpush.bf16.msrb.mxu1 %v2371_v21  ;;  %v2380_v21 = vpack.c.bf16 %v3847_v11, %v3846_v36  ;;  %v3968_v11 = vld [vmem:[%s4386_s30 + $0xed0] sm:$0xff] }
 0x253   : > { %2916 = vmatpush.bf16.msrb.mxu2 %v2373_v63 }
 0x254   : > { %2930 = vmatpush.bf16.msrb.mxu3 %v2380_v21  ;;  %v3969_v21 = vld [vmem:[%s4386_s30 + $0xed8] sm:$0xff] }
 0x255   : > { %v2441_v26 = vpack.c.bf16 %v3969_v21, %v3968_v11  ;;  %v3806_v11 = vld [vmem:[%s4386_s30 + $0x9c0] sm:$0xff] }
 0x256   : > { %2898 = vmatpush.bf16.msrb.mxu1 %v2370_v56  ;;  %v3900_v56 = vld [vmem:[%s4386_s30 + $0xcb0] sm:$0xff]  ;;  %v3950_v21 = vld [vmem:[%s4386_s30 + $0xe40] sm:$0xff] }
 0x257   : > { %2917 = vmatpush.bf16.msrb.mxu2 %v2372_v4  ;;  %v2407_v60 = vpack.c.bf16 %v3901_v1, %v3900_v56  ;;  %2931 = vmatmul.bf16.vlgmr.msrb.gmra.mxu3 %v6353_v42  ;;  %v3966_v56 = vld [vmem:[%s4386_s30 + $0xec0] sm:$0xff]  ;;  %v2412_v42 = vpack.c.bf16 %v3911_v25, %v3910_v9  ;;  %v3804_v25 = vld [vmem:[%s4386_s30 + $0x9b0] sm:$0xff] }
 0x258   : > { %2975 = vmatpush.bf16.msra.mxu3 %v2419_v34  ;;  %v3913_v34 = vld [vmem:[%s4386_s30 + $0xd18] sm:$0xff] }
 0x259   : > { %v2413_v23 = vpack.c.bf16 %v3913_v34, %v3912_v16  ;;  %v3958_v16 = vld [vmem:[%s4386_s30 + $0xe80] sm:$0xff] }
 0x25a   : > { %2899 = vmatpush.bf16.msrb.mxu1 %v2369_v61  ;;  %2918 = vmatmul.bf16.vlgmr.msrb.gmra.mxu2 %v6352_v17  ;;  %v3898_v61 = vld [vmem:[%s4386_s30 + $0xca0] sm:$0xff] }
 0x25b   : > { %2962 = vmatpush.bf16.msra.mxu2 %v2411_v18  ;;  %v2406_v63 = vpack.c.bf16 %v3899_v40, %v3898_v61  ;;  %v3918_v18 = vld [vmem:[%s4386_s30 + $0xd40] sm:$0xff]  ;;  %v3879_v40 = vld [vmem:[%s4386_s30 + $0xc08] sm:$0xff] }
 0x25c   : > { %2976 = vmatpush.bf16.msra.mxu3 %v2418_v55  ;;  %v2416_v0 = vpack.c.bf16 %v3919_v50, %v3918_v18  ;;  %v3970_v17 = vld [vmem:[%s4386_s30 + $0xee0] sm:$0xff]  ;;  %v3988_v55 = vld [vmem:[%s4386_s30 + $0xf70] sm:$0xff] }
 0x25d   : > { %v2451_v32 = vpack.c.bf16 %v3989_v38, %v3988_v55  ;;  %v3878_v61 = vld [vmem:[%s4386_s30 + $0xc00] sm:$0xff]  ;;  %v3948_v55 = vld [vmem:[%s4386_s30 + $0xe30] sm:$0xff] }
 0x25e   : > { %2900 = vmatpush.bf16.msrb.mxu1 %v2368_v7  ;;  %v3897_v7 = vld [vmem:[%s4386_s30 + $0xc98] sm:$0xff]  ;;  %v3810_v50 = vld [vmem:[%s4386_s30 + $0x9e0] sm:$0xff] }
 0x25f   : > { %2963 = vmatpush.bf16.msra.mxu2 %v2410_v24  ;;  %v2405_v4 = vpack.c.bf16 %v3897_v7, %v3896_v47  ;;  %v2443_v24 = vpack.c.bf16 %v3973_v59, %v3972_v43  ;;  %v3987_v47 = vld [vmem:[%s4386_s30 + $0xf68] sm:$0xff]  ;;  %v3813_v7 = vld [vmem:[%s4386_s30 + $0x9f8] sm:$0xff] }
 0x260   : > { %2977 = vmatpush.bf16.msra.mxu3 %v2417_v57  ;;  %v2450_v18 = vpack.c.bf16 %v3987_v47, %v3986_v49  ;;  %v6356_v43 = vld [vmem:[#allocation9_spill] sm:$0xff]  ;;  %v3947_v49 = vld [vmem:[%s4386_s30 + $0xe28] sm:$0xff]  ;;  %v6358_v47 = vld [vmem:[#allocation16_spill] sm:$0xff] }
 0x262   : > { %2901 = vmatpush.bf16.msrb.mxu1 %v2367_v39  ;;  %v3895_v39 = vld [vmem:[%s4386_s30 + $0xc88] sm:$0xff] }
 0x263   : > { %2964 = vmatpush.bf16.msra.mxu2 %v2409_v44  ;;  %v2404_v53 = vpack.c.bf16 %v3895_v39, %v3894_v28  ;;  %v3971_v44 = vld [vmem:[%s4386_s30 + $0xee8] sm:$0xff]  ;;  %v3962_v39 = vld [vmem:[%s4386_s30 + $0xea0] sm:$0xff] }
 0x264   : > { %2978 = vmatpush.bf16.msra.mxu3 %v2416_v0  ;;  %v2442_v37 = vpack.c.bf16 %v3971_v44, %v3970_v17  ;;  %v3954_v0 = vld [vmem:[%s4386_s30 + $0xe60] sm:$0xff]  ;;  %v3811_v28 = vld [vmem:[%s4386_s30 + $0x9e8] sm:$0xff]  ;;  %v3952_v17 = vld [vmem:[%s4386_s30 + $0xe50] sm:$0xff] }
 0x265   : > { %v3953_v44 = vld [vmem:[%s4386_s30 + $0xe58] sm:$0xff] }
 0x266   : > { %2902 = vmatpush.bf16.msrb.mxu1 %v2366_v19  ;;  %v3885_v19 = vld [vmem:[%s4386_s30 + $0xc38] sm:$0xff]  ;;  %v2433_v12 = vpack.c.bf16 %v3953_v44, %v3952_v17  ;;  %v4098_v17 = vld [vmem:[%s4696_s22 + $0xae0] sm:$0xff] }
 0x267   : > { %2965 = vmatpush.bf16.msra.mxu2 %v2408_v14  ;;  %v2399_v30 = vpack.c.bf16 %v3885_v19, %v3884_v45  ;;  %v3883_v14 = vld [vmem:[%s4386_s30 + $0xc28] sm:$0xff] }
 0x268   : > { %2979 = vmatpush.bf16.msra.mxu3 %v2415_v22  ;;  %v2398_v36 = vpack.c.bf16 %v3883_v14, %v3882_v15  ;;  %v347_v22 = vld [vmem:[%s6205_s5] sm:$0xff]  ;;  %v3983_v14 = vld [vmem:[%s4386_s30 + $0xf48] sm:$0xff] }
 0x269   : > { %v3982_v15 = vld [vmem:[%s4386_s30 + $0xf40] sm:$0xff] }
 0x26a   : > { %2903 = vmatpush.bf16.msrb.mxu1 %v2365_v20  ;;  %v6355_v20 = vld [vmem:[#allocation12_spill] sm:$0xff] }
 0x26b   : > { %2966 = vmatpush.bf16.msra.mxu2 %v2407_v60 }
 0x26c   : > { %2980 = vmatpush.bf16.msra.mxu3 %v2414_v10  ;;  %v3961_v10 = vld [vmem:[%s4386_s30 + $0xe98] sm:$0xff] }
 0x26e   : > { %2904 = vmatpush.bf16.msrb.mxu1 %v2364_v58  ;;  %v3880_v58 = vld [vmem:[%s4386_s30 + $0xc10] sm:$0xff] }
 0x26f   : > { %2967 = vmatpush.bf16.msra.mxu2 %v2406_v63  ;;  %v2397_v13 = vpack.c.bf16 %v3881_v2, %v3880_v58  ;;  %v3957_v63 = vld [vmem:[%s4386_s30 + $0xe78] sm:$0xff]  ;;  %v4066_v58 = vld [vmem:[%s4696_s22 + $0x9e0] sm:$0xff]  ;;  %v4068_v2 = vld [vmem:[%s4696_s22 + $0x9f0] sm:$0xff] }
 0x270   : > { %2981 = vmatpush.bf16.msra.mxu3 %v2413_v23 }
 0x271   : > { %2905 = vmatmul.bf16.vlgmr.msrb.gmra.mxu1 %v6354_v3  ;;  %v2396_v3 = vpack.c.bf16 %v3879_v40, %v3878_v61  ;;  %v4062_v40 = vld [vmem:[%s4696_s22 + $0x9c0] sm:$0xff] }
 0x272   : > { %2949 = vmatpush.bf16.msra.mxu1 %v2403_v48  ;;  %v3967_v48 = vld [vmem:[%s4386_s30 + $0xec8] sm:$0xff] }
 0x273   : > { %2968 = vmatpush.bf16.msra.mxu2 %v2405_v4  ;;  %v2440_v60 = vpack.c.bf16 %v3967_v48, %v3966_v56  ;;  %v2439_v4 = vpack.c.bf16 %v3965_v41, %v3964_v54  ;;  %v2747_v48 = vpack.c.bf16 %v4068_v2, %v4066_v58  ;;  %v3978_v54 = vld [vmem:[%s4386_s30 + $0xf20] sm:$0xff] }
 0x274   : > { %2982 = vmatpush.bf16.msra.mxu3 %v2412_v42  ;;  %v3949_v42 = vld [vmem:[%s4386_s30 + $0xe38] sm:$0xff]  ;;  %v3946_v41 = vld [vmem:[%s4386_s30 + $0xe20] sm:$0xff] }
 0x275   : > { %v2431_v61 = vpack.c.bf16 %v3949_v42, %v3948_v55  ;;  %v6359_v55 = vld [vmem:[#allocation13_spill] sm:$0xff]  ;;  %v3875_v42 = vld [vmem:[%s4386_s30 + $0xbe8] sm:$0xff] }
 0x276   : > { %2950 = vmatpush.bf16.msra.mxu1 %v2402_v52  ;;  %v3956_v52 = vld [vmem:[%s4386_s30 + $0xe70] sm:$0xff] }
 0x277   : > { %2969 = vmatpush.bf16.msra.mxu2 %v2404_v53  ;;  %v2435_v57 = vpack.c.bf16 %v3957_v63, %v3956_v52  ;;  %2983 = vmatmul.bf16.vlgmr.msra.gmra.mxu3 %v6356_v43  ;;  %v3963_v53 = vld [vmem:[%s4386_s30 + $0xea8] sm:$0xff]  ;;  %v3944_v43 = vld [vmem:[%s4386_s30 + $0xe10] sm:$0xff] }
 0x278   : > { %3027 = vmatpush.bf16.msrb.mxu3 %v2451_v32  ;;  %v2438_v45 = vpack.c.bf16 %v3963_v53, %v3962_v39  ;;  %v3805_v32 = vld [vmem:[%s4386_s30 + $0x9b8] sm:$0xff]  ;;  %v348_v52 = vld [vmem:[%s6205_s5 + $0x8] sm:$0x3f]  ;;  %v3800_v39 = vld [vmem:[%s4386_s30 + $0x990] sm:$0xff] }
 0x27a   : > { %2951 = vmatpush.bf16.msra.mxu1 %v2401_v62  ;;  %2970 = vmatmul.bf16.vlgmr.msra.gmra.mxu2 %v6355_v20  ;;  %v3812_v62 = vld [vmem:[%s4386_s30 + $0x9f0] sm:$0xff]  ;;  %v3809_v20 = vld [vmem:[%s4386_s30 + $0x9d8] sm:$0xff] }
 0x27b   : > { %3014 = vmatpush.bf16.msrb.mxu2 %v2443_v24  ;;  %v2363_v51 = vpack.c.bf16 %v3813_v7, %v3812_v62  ;;  %v3984_v24 = vld [vmem:[%s4386_s30 + $0xf50] sm:$0xff]  ;;  %v2361_v34 = vpack.c.bf16 %v3809_v20, %v3808_v35  ;;  %v2359_v62 = vpack.c.bf16 %v3805_v32, %v3804_v25  ;;  %v3802_v7 = vld [vmem:[%s4386_s30 + $0x9a0] sm:$0xff]  ;;  %v3799_v35 = vld [vmem:[%s4386_s30 + $0x988] sm:$0xff] }
 0x27c   : > { %3028 = vmatpush.bf16.msrb.mxu3 %v2450_v18  ;;  %v2449_v19 = vpack.c.bf16 %v3985_v27, %v3984_v24  ;;  %v4058_v18 = vld [vmem:[%s4696_s22 + $0x9a0] sm:$0xff]  ;;  %v3801_v24 = vld [vmem:[%s4386_s30 + $0x998] sm:$0xff]  ;;  %v3943_v20 = vld [vmem:[%s4386_s30 + $0xe08] sm:$0xff] }
 0x27d   : > { %v4048_v25 = vld [vmem:[%s4696_s22 + $0x950] sm:$0xff] }
 0x27e   : > { %2952 = vmatpush.bf16.msra.mxu1 %v2400_v5  ;;  %v3955_v5 = vld [vmem:[%s4386_s30 + $0xe68] sm:$0xff] }
 0x27f   : > { %3015 = vmatpush.bf16.msrb.mxu2 %v2442_v37  ;;  %v2434_v59 = vpack.c.bf16 %v3955_v5, %v3954_v0  ;;  %v2362_v37 = vpack.c.bf16 %v3811_v28, %v3810_v50  ;;  %v4060_v50 = vld [vmem:[%s4696_s22 + $0x9b0] sm:$0xff]  ;;  %v3803_v0 = vld [vmem:[%s4386_s30 + $0x9a8] sm:$0xff]  ;;  %v3977_v28 = vld [vmem:[%s4386_s30 + $0xf18] sm:$0xff] }
 0x280   : > { %3029 = vmatpush.bf16.msrb.mxu3 %v2449_v19  ;;  %v2358_v53 = vpack.c.bf16 %v3803_v0, %v3802_v7  ;;  %v3974_v19 = vld [vmem:[%s4386_s30 + $0xf00] sm:$0xff] }
 0x282   : > { %2953 = vmatpush.bf16.msra.mxu1 %v2399_v30  ;;  %v2005_v46 = vpop.xlane.xlu2 %2004  ;;  %v6357_v30 = vld [vmem:[#allocation10_spill] sm:$0xff] }
 0x283   : > { %3016 = vmatpush.bf16.msrb.mxu2 %v2441_v26  ;;  %v3951_v26 = vld [vmem:[%s4386_s30 + $0xe48] sm:$0xff] }
 0x284   : > { %v2432_v23 = vpack.c.bf16 %v3951_v26, %v3950_v21  ;;  %v4052_v26 = vld [vmem:[%s4696_s22 + $0x970] sm:$0xff] }
 0x286   : > { %2954 = vmatpush.bf16.msra.mxu1 %v2398_v36  ;;  %v2448_v36 = vpack.c.bf16 %v3983_v14, %v3982_v15  ;;  %v4034_v14 = vld [vmem:[%s4696_s22 + $0x8e0] sm:$0xff] }
 0x287   : > { %3017 = vmatpush.bf16.msrb.mxu2 %v2440_v60  ;;  %v3981_v60 = vld [vmem:[%s4386_s30 + $0xf38] sm:$0xff] }
 0x288   : > { %3030 = vmatpush.bf16.msrb.mxu3 %v2448_v36  ;;  %v4036_v36 = vld [vmem:[%s4696_s22 + $0x8f0] sm:$0xff] }
 0x289   : > { %v2731_v21 = vpack.c.bf16 %v4036_v36, %v4034_v14  ;;  %v3866_v14 = vld [vmem:[%s4386_s30 + $0xba0] sm:$0xff] }
 0x28a   : > { %2955 = vmatpush.bf16.msra.mxu1 %v2397_v13  ;;  %v2002_v6 = vpop.xlane.xlu2 %2001  ;;  %v3807_v13 = vld [vmem:[%s4386_s30 + $0x9c8] sm:$0xff] }
 0x28b   : > { %3018 = vmatpush.bf16.msrb.mxu2 %v2439_v4  ;;  %v2360_v38 = vpack.c.bf16 %v3807_v13, %v3806_v11  ;;  %v2430_v4 = vpack.c.bf16 %v3947_v49, %v3946_v41  ;;  %v4050_v11 = vld [vmem:[%s4696_s22 + $0x960] sm:$0xff]  ;;  %v3872_v41 = vld [vmem:[%s4386_s30 + $0xbd0] sm:$0xff] }
 0x28c   : > { %v2739_v58 = vpack.c.bf16 %v4052_v26, %v4050_v11  ;;  %v3867_v11 = vld [vmem:[%s4386_s30 + $0xba8] sm:$0xff]  ;;  %v4076_v26 = vld [vmem:[%s4696_s22 + $0xa30] sm:$0xff] }
 0x28e   : > { %2956 = vmatpush.bf16.msra.mxu1 %v2396_v3  ;;  %v4064_v3 = vld [vmem:[%s4696_s22 + $0x9d0] sm:$0xff] }
 0x28f   : > { %3019 = vmatpush.bf16.msrb.mxu2 %v2438_v45  ;;  %v2745_v63 = vpack.c.bf16 %v4064_v3, %v4062_v40  ;;  %v4092_v40 = vld [vmem:[%s4696_s22 + $0xab0] sm:$0xff]  ;;  %v6360_v3 = vld [vmem:[#allocation14_spill] sm:$0xff] }
 0x291   : > { %2957 = vmatmul.bf16.vlgmr.msra.gmra.mxu1 %v6357_v30  ;;  %v3975_v30 = vld [vmem:[%s4386_s30 + $0xf08] sm:$0xff] }
 0x292   : > { %v2011_v8 = vpop.xlane.xlu1 %2010  ;;  %3001 = vmatpush.bf16.msrb.mxu1 %v2435_v57  ;;  %v2444_v44 = vpack.c.bf16 %v3975_v30, %v3974_v19  ;;  %v4020_v19 = vld [vmem:[%s4696_s22 + $0x870] sm:$0xff] }
 0x296   : > { %3002 = vmatpush.bf16.msrb.mxu1 %v2434_v59  ;;  %v3945_v59 = vld [vmem:[%s4386_s30 + $0xe18] sm:$0xff] }
 0x297   : > { %v2429_v27 = vpack.c.bf16 %v3945_v59, %v3944_v43  ;;  %v4040_v59 = vld [vmem:[%s4696_s22 + $0x910] sm:$0xff] }
 0x29a   : > { %v2008_v31 = vpop.xlane.xlu1 %2007  ;;  %3003 = vmatpush.bf16.msrb.mxu1 %v2433_v12 }
 0x29e   : > { %3004 = vmatpush.bf16.msrb.mxu1 %v2432_v23  ;;  %v3876_v23 = vld [vmem:[%s4386_s30 + $0xbf0] sm:$0xff] }
 0x2a2   : > { %v2017_v29 = vpop.xlane.xlu0 %2016  ;;  %3005 = vmatpush.bf16.msrb.mxu1 %v2431_v61  ;;  %v4090_v61 = vld [vmem:[%s4696_s22 + $0xaa0] sm:$0xff] }
 0x2a3   : > { %2034 = vmatpush.msra.mxu0 %v2017_v29  ;;  %v3960_v29 = vld [vmem:[%s4386_s30 + $0xe90] sm:$0xff] }
 0x2a6   : > { %3006 = vmatpush.bf16.msrb.mxu1 %v2430_v4  ;;  %v4086_v4 = vld [vmem:[%s4696_s22 + $0xa80] sm:$0xff] }
 0x2aa   : > { %v2014_v1 = vpop.xlane.xlu0 %2013  ;;  %3007 = vmatpush.bf16.msrb.mxu1 %v2429_v27  ;;  %v4082_v27 = vld [vmem:[%s4696_s22 + $0xa60] sm:$0xff] }
 0x2ab   : > { %2035 = vmatpush.msra.mxu0 %v2014_v1  ;;  %v3980_v1 = vld [vmem:[%s4386_s30 + $0xf30] sm:$0xff] }
 0x2ac   : > { %v2447_v9 = vpack.c.bf16 %v3981_v60, %v3980_v1  ;;  %v4032_v60 = vld [vmem:[%s4696_s22 + $0x8d0] sm:$0xff] }
 0x2ad   : > { %2036 = vmatpush.msra.mxu0 %v2011_v8  ;;  %v2437_v8 = vpack.c.bf16 %v3961_v10, %v3960_v29  ;;  %v4100_v29 = vld [vmem:[%s4696_s22 + $0xaf0] sm:$0xff]  ;;  %v3942_v10 = vld [vmem:[%s4386_s30 + $0xe00] sm:$0xff] }
 0x2ae   : > { %3031 = vmatpush.bf16.msrb.mxu3 %v2447_v9  ;;  %v2763_v12 = vpack.c.bf16 %v4100_v29, %v4098_v17  ;;  %v2428_v15 = vpack.c.bf16 %v3943_v20, %v3942_v10  ;;  %v4046_v9 = vld [vmem:[%s4696_s22 + $0x940] sm:$0xff]  ;;  %v3868_v17 = vld [vmem:[%s4386_s30 + $0xbb0] sm:$0xff]  ;;  %v3869_v29 = vld [vmem:[%s4386_s30 + $0xbb8] sm:$0xff] }
 0x2af   : > { %2037 = vmatpush.msra.mxu0 %v2008_v31  ;;  %3020 = vmatpush.bf16.msrb.mxu2 %v2437_v8  ;;  %v3979_v31 = vld [vmem:[%s4386_s30 + $0xf28] sm:$0xff]  ;;  %v2357_v8 = vpack.c.bf16 %v3801_v24, %v3800_v39  ;;  %v2737_v32 = vpack.c.bf16 %v4048_v25, %v4046_v9  ;;  %v3870_v39 = vld [vmem:[%s4386_s30 + $0xbc0] sm:$0xff]  ;;  %v4008_v9 = vld [vmem:[%s4696_s22 + $0x810] sm:$0xff] }
 0x2b0   : > { %v2446_v57 = vpack.c.bf16 %v3979_v31, %v3978_v54  ;;  %3008 = vmatpush.bf16.msrb.mxu1 %v2428_v15  ;;  %v4028_v54 = vld [vmem:[%s4696_s22 + $0x8b0] sm:$0xff]  ;;  %v4042_v31 = vld [vmem:[%s4696_s22 + $0x920] sm:$0xff]  ;;  %v2391_v15 = vpack.c.bf16 %v3869_v29, %v3868_v17  ;;  %v3929_v17 = vld [vmem:[%s4386_s30 + $0xd98] sm:$0xff] }
 0x2b1   : > { %2038 = vmatpush.msra.mxu0 %v2005_v46  ;;  %v3959_v46 = vld [vmem:[%s4386_s30 + $0xe88] sm:$0xff]  ;;  %v6362_v10 = vld [vmem:[#allocation18_spill] sm:$0xff]  ;;  %v4188_v29 = vld [vmem:[%s4696_s22 + $0xdb0] sm:$0xff] }
 0x2b2   : > { %v1999_v33 = vpop.xlane.xlu0 %1998  ;;  %v2436_v56 = vpack.c.bf16 %v3959_v46, %v3958_v16  ;;  %3032 = vmatpush.bf16.msrb.mxu3 %v2446_v57  ;;  %v4094_v16 = vld [vmem:[%s4696_s22 + $0xac0] sm:$0xff]  ;;  %v3877_v46 = vld [vmem:[%s4386_s30 + $0xbf8] sm:$0xff] }
 0x2b3   : > { %2039 = vmatpush.msra.mxu0 %v2002_v6  ;;  %v2743_v6 = vpack.c.bf16 %v4060_v50, %v4058_v18  ;;  %v2395_v1 = vpack.c.bf16 %v3877_v46, %v3876_v23  ;;  %3009 = vmatmul.bf16.vlgmr.msrb.gmra.mxu1 %v6360_v3  ;;  %v4088_v18 = vld [vmem:[%s4696_s22 + $0xa90] sm:$0xff]  ;;  %v4014_v20 = vld [vmem:[%s4696_s22 + $0x840] sm:$0xff]  ;;  %v2390_v46 = vpack.c.bf16 %v3867_v11, %v3866_v14  ;;  %v6363_v3 = vld [vmem:[#allocation19_spill] sm:$0xff] }
 0x2b4   : > { %3021 = vmatpush.bf16.msrb.mxu2 %v2436_v56  ;;  %v3874_v56 = vld [vmem:[%s4386_s30 + $0xbe0] sm:$0xff]  ;;  %3058 = vmatpush.bf16.msra.mxu1 %v2731_v21  ;;  %v6361_v50 = vld [vmem:[#allocation4_spill] sm:$0xff]  ;;  %v2757_v0 = vpack.c.bf16 %v4088_v18, %v4086_v4  ;;  %v3935_v18 = vld [vmem:[%s4386_s30 + $0xdc8] sm:$0xff] }
 0x2b5   : > { %2040 = vmatpush.msra.mxu0 %v1999_v33  ;;  %v4054_v33 = vld [vmem:[%s4696_s22 + $0x980] sm:$0xff]  ;;  %v2394_v57 = vpack.c.bf16 %v3875_v42, %v3874_v56  ;;  %v4012_v23 = vld [vmem:[%s4696_s22 + $0x830] sm:$0xff] }
 0x2b6   : > { %3748 = vmatmul.msk.f32.vlgmr.msra.gmra.mxu0 %vm2018_vm0, %v347_v22  ;;  %v4056_v22 = vld [vmem:[%s4696_s22 + $0x990] sm:$0xff]  ;;  %v4074_v21 = vld [vmem:[%s4696_s22 + $0xa20] sm:$0xff] }
 0x2b7   : > { %2884 = vmatpush.bf16.msrb.mxu0 %v2363_v51  ;;  %3022 = vmatmul.bf16.vlgmr.msrb.gmra.mxu2 %v6358_v47  ;;  %v3976_v51 = vld [vmem:[%s4386_s30 + $0xf10] sm:$0xff]  ;;  %v2741_v45 = vpack.c.bf16 %v4056_v22, %v4054_v33  ;;  %v4070_v56 = vld [vmem:[%s4696_s22 + $0xa00] sm:$0xff] }
 0x2b8   : > { %3086 = vmatpush.bf16.msra.mxu2 %v2747_v48  ;;  %v2445_v5 = vpack.c.bf16 %v3977_v28, %v3976_v51  ;;  %v4030_v48 = vld [vmem:[%s4696_s22 + $0x8c0] sm:$0xff]  ;;  %v4044_v47 = vld [vmem:[%s4696_s22 + $0x930] sm:$0xff] }
 0x2b9   : > { %v2735_v7 = vpack.c.bf16 %v4044_v47, %v4042_v31  ;;  %v4024_v51 = vld [vmem:[%s4696_s22 + $0x890] sm:$0xff]  ;;  %v4038_v28 = vld [vmem:[%s4696_s22 + $0x900] sm:$0xff]  ;;  %v6364_v31 = vld [vmem:[#allocation17_spill] sm:$0xff] }
 0x2ba   : > { %3033 = vmatpush.bf16.msrb.mxu3 %v2445_v5  ;;  %v2733_v24 = vpack.c.bf16 %v4040_v59, %v4038_v28  ;;  %v4084_v33 = vld [vmem:[%s4696_s22 + $0xa70] sm:$0xff]  ;;  %v3862_v42 = vld [vmem:[%s4386_s30 + $0xb80] sm:$0xff]  ;;  %v3937_v47 = vld [vmem:[%s4386_s30 + $0xdd8] sm:$0xff] }
 0x2bb   : > { %2885 = vmatpush.bf16.msrb.mxu0 %v2362_v37  ;;  %v3798_v37 = vld [vmem:[%s4386_s30 + $0x980] sm:$0xff]  ;;  %v2755_v22 = vpack.c.bf16 %v4084_v33, %v4082_v27  ;;  %v4196_v28 = vld [vmem:[%s4696_s22 + $0xdf0] sm:$0xff] }
 0x2bc   : > { %3087 = vmatpush.bf16.msra.mxu2 %v2745_v63  ;;  %v2356_v13 = vpack.c.bf16 %v3799_v35, %v3798_v37  ;;  %v4026_v63 = vld [vmem:[%s4696_s22 + $0x8a0] sm:$0xff]  ;;  %v4080_v35 = vld [vmem:[%s4696_s22 + $0xa50] sm:$0xff] }
 0x2bd   : > { %v2727_v49 = vpack.c.bf16 %v4028_v54, %v4026_v63  ;;  %v4078_v37 = vld [vmem:[%s4696_s22 + $0xa40] sm:$0xff]  ;;  %v3939_v54 = vld [vmem:[%s4386_s30 + $0xde8] sm:$0xff]  ;;  %v4192_v33 = vld [vmem:[%s4696_s22 + $0xdd0] sm:$0xff] }
 0x2be   : > { %3749 = vmatmul.msk.f32.gmra.mxu0 %vm2018_vm0, %v348_v52  ;;  %3034 = vmatpush.bf16.msrb.mxu3 %v2444_v44  ;;  %v2759_v52 = vpack.c.bf16 %v4092_v40, %v4090_v61  ;;  %v3941_v61 = vld [vmem:[%s4386_s30 + $0xdf8] sm:$0xff]  ;;  %v3938_v63 = vld [vmem:[%s4386_s30 + $0xde0] sm:$0xff]  ;;  %v4004_v14 = vld [vmem:[%s4386_s30 + $0xff0] sm:$0xff] }
 0x2bf   : > { %2886 = vmatpush.bf16.msrb.mxu0 %v2361_v34  ;;  %v4096_v34 = vld [vmem:[%s4696_s22 + $0xad0] sm:$0xff]  ;;  %v3934_v4 = vld [vmem:[%s4386_s30 + $0xdc0] sm:$0xff] }
 0x2c0   : > { %3088 = vmatpush.bf16.msra.mxu2 %v2743_v6  ;;  %v2761_v2 = vpack.c.bf16 %v4096_v34, %v4094_v16  ;;  %v4022_v6 = vld [vmem:[%s4696_s22 + $0x880] sm:$0xff]  ;;  %v2751_v16 = vpack.c.bf16 %v4076_v26, %v4074_v21 }
 0x2c1   : > { %3035 = vmatmul.bf16.vlgmr.msrb.gmra.mxu3 %v6359_v55  ;;  %v2725_v43 = vpack.c.bf16 %v4024_v51, %v4022_v6  ;;  %v4010_v34 = vld [vmem:[%s4696_s22 + $0x820] sm:$0xff]  ;;  %v3933_v6 = vld [vmem:[%s4386_s30 + $0xdb8] sm:$0xff] }
 0x2c2   : > { %3114 = vmatpush.bf16.msra.mxu3 %v2763_v12  ;;  %v2753_v12 = vpack.c.bf16 %v4080_v35, %v4078_v37  ;;  %v4194_v51 = vld [vmem:[%s4696_s22 + $0xde0] sm:$0xff] }
 0x2c3   : > { %2887 = vmatpush.bf16.msrb.mxu0 %v2360_v38  ;;  %v2729_v38 = vpack.c.bf16 %v4032_v60, %v4030_v48  ;;  %v4072_v48 = vld [vmem:[%s4696_s22 + $0xa10] sm:$0xff]  ;;  %v4006_v60 = vld [vmem:[%s4696_s22 + $0x800] sm:$0xff] }
 0x2c4   : > { %3089 = vmatpush.bf16.msra.mxu2 %v2741_v45  ;;  %v4018_v45 = vld [vmem:[%s4696_s22 + $0x860] sm:$0xff]  ;;  %v2717_v55 = vpack.c.bf16 %v4008_v9, %v4006_v60  ;;  %v4180_v60 = vld [vmem:[%s4696_s22 + $0xd70] sm:$0xff] }
 0x2c5   : > { %3059 = vmatpush.bf16.msra.mxu1 %v2729_v38  ;;  %v2723_v44 = vpack.c.bf16 %v4020_v19, %v4018_v45  ;;  %v3863_v38 = vld [vmem:[%s4386_s30 + $0xb88] sm:$0xff]  ;;  %v3930_v59 = vld [vmem:[%s4386_s30 + $0xda0] sm:$0xff] }
 0x2c6   : > { %3115 = vmatpush.bf16.msra.mxu3 %v2761_v2  ;;  %v2719_v2 = vpack.c.bf16 %v4012_v23, %v4010_v34  ;;  %v2388_v40 = vpack.c.bf16 %v3863_v38, %v3862_v42  ;;  %v4190_v27 = vld [vmem:[%s4696_s22 + $0xdc0] sm:$0xff]  ;;  %v4003_v23 = vld [vmem:[%s4386_s30 + $0xfe8] sm:$0xff]  ;;  %v4000_v38 = vld [vmem:[%s4386_s30 + $0xfd0] sm:$0xff] }
 0x2c7   : > { %2888 = vmatpush.bf16.msrb.mxu0 %v2359_v62  ;;  %v3873_v62 = vld [vmem:[%s4386_s30 + $0xbd8] sm:$0xff]  ;;  %v2809_v45 = vpack.c.bf16 %v4192_v33, %v4190_v27  ;;  %v4226_v26 = vld [vmem:[%s4696_s22 + $0xee0] sm:$0xff] }
 0x2c8   : > { %3090 = vmatpush.bf16.msra.mxu2 %v2739_v58  ;;  %v2393_v5 = vpack.c.bf16 %v3873_v62, %v3872_v41  ;;  %v3864_v58 = vld [vmem:[%s4386_s30 + $0xb90] sm:$0xff]  ;;  %v2426_v41 = vpack.c.bf16 %v3939_v54, %v3938_v63  ;;  %v6366_v62 = vld [vmem:[#allocation7_spill] sm:$0xff]  ;;  %v4002_v34 = vld [vmem:[%s4386_s30 + $0xfe0] sm:$0xff] }
 0x2c9   : > { %3060 = vmatpush.bf16.msra.mxu1 %v2727_v49  ;;  %v3936_v49 = vld [vmem:[%s4386_s30 + $0xdd0] sm:$0xff]  ;;  %v2458_v42 = vpack.c.bf16 %v4003_v23, %v4002_v34  ;;  %v4158_v63 = vld [vmem:[%s4696_s22 + $0xcc0] sm:$0xff]  ;;  %v5766_v23 = vpop.f32.mrf.mxu2 }
 0x2ca   : > { %3116 = vmatpush.bf16.msra.mxu3 %v2759_v52  ;;  %v4160_v54 = vld [vmem:[%s4696_s22 + $0xcd0] sm:$0xff]  ;;  %v4214_v33 = vld [vmem:[%s4696_s22 + $0xe80] sm:$0xff] }
 0x2cb   : > { %2889 = vmatpush.bf16.msrb.mxu0 %v2358_v53  ;;  %v3871_v53 = vld [vmem:[%s4386_s30 + $0xbc8] sm:$0xff]  ;;  %v4148_v34 = vld [vmem:[%s4696_s22 + $0xc70] sm:$0xff] }
 0x2cc   : > { %3091 = vmatpush.bf16.msra.mxu2 %v2737_v32  ;;  %v2392_v30 = vpack.c.bf16 %v3871_v53, %v3870_v39  ;;  %v3940_v32 = vld [vmem:[%s4386_s30 + $0xdf0] sm:$0xff]  ;;  %v6367_v39 = vld [vmem:[#allocation23_spill] sm:$0xff] }
 0x2cd   : > { %3061 = vmatpush.bf16.msra.mxu1 %v2725_v43  ;;  %v2427_v52 = vpack.c.bf16 %v3941_v61, %v3940_v32  ;;  %v3931_v53 = vld [vmem:[%s4386_s30 + $0xda8] sm:$0xff]  ;;  %v4001_v32 = vld [vmem:[%s4386_s30 + $0xfd8] sm:$0xff] }
 0x2ce   : > { %3117 = vmatpush.bf16.msra.mxu3 %v2757_v0  ;;  %v3932_v0 = vld [vmem:[%s4386_s30 + $0xdb0] sm:$0xff]  ;;  %v2422_v19 = vpack.c.bf16 %v3931_v53, %v3930_v59  ;;  %v6371_v61 = vld [vmem:[#allocation29_spill] sm:$0xff] }
 0x2cf   : > { %2890 = vmatpush.bf16.msrb.mxu0 %v2357_v8  ;;  %v4016_v8 = vld [vmem:[%s4696_s22 + $0x850] sm:$0xff]  ;;  %v2423_v43 = vpack.c.bf16 %v3933_v6, %v3932_v0  ;;  %v3998_v0 = vld [vmem:[%s4386_s30 + $0xfc0] sm:$0xff]  ;;  %v3999_v6 = vld [vmem:[%s4386_s30 + $0xfc8] sm:$0xff] }
 0x2d0   : > { %3092 = vmatpush.bf16.msra.mxu2 %v2735_v7  ;;  %v2721_v36 = vpack.c.bf16 %v4016_v8, %v4014_v20  ;;  %v2425_v7 = vpack.c.bf16 %v3937_v47, %v3936_v49  ;;  %v3927_v20 = vld [vmem:[%s4386_s30 + $0xd88] sm:$0xff]  ;;  %v4182_v8 = vld [vmem:[%s4696_s22 + $0xd80] sm:$0xff]  ;;  %v2793_v47 = vpack.c.bf16 %v4160_v54, %v4158_v63  ;;  %v4172_v53 = vld [vmem:[%s4696_s22 + $0xd30] sm:$0xff] }
 0x2d1   : > { %3062 = vmatpush.bf16.msra.mxu1 %v2723_v44  ;;  %v4186_v44 = vld [vmem:[%s4696_s22 + $0xda0] sm:$0xff]  ;;  %v6373_v49 = vld [vmem:[#allocation11_spill] sm:$0xff]  ;;  %v4204_v63 = vld [vmem:[%s4696_s22 + $0xe30] sm:$0xff] }
 0x2d2   : > { %3118 = vmatpush.bf16.msra.mxu3 %v2755_v22  ;;  %v6369_v22 = vld [vmem:[#allocation30_spill] sm:$0xff]  ;;  %v2807_v37 = vpack.c.bf16 %v4188_v29, %v4186_v44 }
 0x2d3   : > { %2891 = vmatpush.bf16.msrb.mxu0 %v2356_v13  ;;  %v3865_v13 = vld [vmem:[%s4386_s30 + $0xb98] sm:$0xff]  ;;  %v4150_v29 = vld [vmem:[%s4696_s22 + $0xc80] sm:$0xff] }
 0x2d4   : > { %3093 = vmatpush.bf16.msra.mxu2 %v2733_v24  ;;  %v2389_v25 = vpack.c.bf16 %v3865_v13, %v3864_v58  ;;  %v6368_v24 = vld [vmem:[#allocation21_spill] sm:$0xff]  ;;  %v4164_v13 = vld [vmem:[%s4696_s22 + $0xcf0] sm:$0xff] }
 0x2d5   : > { %3063 = vmatpush.bf16.msra.mxu1 %v2721_v36  ;;  %v4005_v36 = vld [vmem:[%s4386_s30 + $0xff8] sm:$0xff] }
 0x2d6   : > { %2892 = vmatmul.bf16.vlgmr.msrb.gmra.mxu0 %v6361_v50  ;;  %3119 = vmatpush.bf16.msra.mxu3 %v2753_v12  ;;  %v2424_v50 = vpack.c.bf16 %v3935_v18, %v3934_v4  ;;  %v3926_v12 = vld [vmem:[%s4386_s30 + $0xd80] sm:$0xff]  ;;  %v4220_v18 = vld [vmem:[%s4696_s22 + $0xeb0] sm:$0xff] }
 0x2d7   : > { %2936 = vmatpush.bf16.msra.mxu0 %v2395_v1  ;;  %3094 = vmatmul.bf16.vlgmr.msra.gmra.mxu2 %v6362_v10  ;;  %v2749_v1 = vpack.c.bf16 %v4072_v48, %v4070_v56  ;;  %v2420_v21 = vpack.c.bf16 %v3927_v20, %v3926_v12  ;;  %v4178_v56 = vld [vmem:[%s4696_s22 + $0xd60] sm:$0xff]  ;;  %v6370_v48 = vld [vmem:[#allocation31_spill] sm:$0xff]  ;;  %v4168_v20 = vld [vmem:[%s4696_s22 + $0xd10] sm:$0xff] }
 0x2d8   : > { %v2803_v9 = vpack.c.bf16 %v4180_v60, %v4178_v56  ;;  %v4218_v4 = vld [vmem:[%s4696_s22 + $0xea0] sm:$0xff]  ;;  %v6375_v60 = vld [vmem:[#allocation37_spill] sm:$0xff] }
 0x2d9   : > { %3064 = vmatpush.bf16.msra.mxu1 %v2719_v2  ;;  %v4162_v2 = vld [vmem:[%s4696_s22 + $0xce0] sm:$0xff] }
 0x2da   : > { %3120 = vmatpush.bf16.msra.mxu3 %v2751_v16  ;;  %v2459_v16 = vpack.c.bf16 %v4005_v36, %v4004_v14  ;;  %v4212_v14 = vld [vmem:[%s4696_s22 + $0xe70] sm:$0xff] }
 0x2db   : > { %2937 = vmatpush.bf16.msra.mxu0 %v2394_v57  ;;  %v6365_v57 = vld [vmem:[#allocation22_spill] sm:$0xff] }
 0x2dd   : > { %3065 = vmatpush.bf16.msra.mxu1 %v2717_v55  ;;  %v4224_v55 = vld [vmem:[%s4696_s22 + $0xed0] sm:$0xff] }
 0x2de   : > { %3121 = vmatpush.bf16.msra.mxu3 %v2749_v1  ;;  %v2795_v1 = vpack.c.bf16 %v4164_v13, %v4162_v2  ;;  %v4206_v2 = vld [vmem:[%s4696_s22 + $0xe40] sm:$0xff]  ;;  %v4208_v13 = vld [vmem:[%s4696_s22 + $0xe50] sm:$0xff] }
 0x2df   : > { %2938 = vmatpush.bf16.msra.mxu0 %v2393_v5  ;;  %v2811_v5 = vpack.c.bf16 %v4196_v28, %v4194_v51  ;;  %v2823_v51 = vpack.c.bf16 %v4220_v18, %v4218_v4  ;;  %v4154_v28 = vld [vmem:[%s4696_s22 + $0xca0] sm:$0xff]  ;;  %v2869_v4 = vpop.f32.mrf.mxu2 }
 0x2e0   : > { %3066 = vmatmul.bf16.vlgmr.msra.gmra.mxu1 %v6364_v31  ;;  %v4130_v18 = vld [vmem:[%s4696_s22 + $0xbe0] sm:$0xff]  ;;  %v4059_v4 = vld [vmem:[%s4696_s22 + $0x9a8] sm:$0xff] }
 0x2e1   : > { %3122 = vmatmul.bf16.vlgmr.msra.gmra.mxu3 %v6363_v3  ;;  %3198 = vmatpush.bf16.msrb.mxu2 %v2811_v5  ;;  %v4156_v5 = vld [vmem:[%s4696_s22 + $0xcb0] sm:$0xff] }
 0x2e2   : > { %3170 = vmatpush.bf16.msrb.mxu1 %v2795_v1  ;;  %v2791_v59 = vpack.c.bf16 %v4156_v5, %v4154_v28  ;;  %v3992_v1 = vld [vmem:[%s4386_s30 + $0xf90] sm:$0xff] }
 0x2e3   : > { %2939 = vmatpush.bf16.msra.mxu0 %v2392_v30  ;;  %v3928_v30 = vld [vmem:[%s4386_s30 + $0xd90] sm:$0xff] }
 0x2e4   : > { %v2421_v35 = vpack.c.bf16 %v3929_v17, %v3928_v30  ;;  %v3996_v30 = vld [vmem:[%s4386_s30 + $0xfb0] sm:$0xff]  ;;  %v3997_v17 = vld [vmem:[%s4386_s30 + $0xfb8] sm:$0xff] }
 0x2e5   : > { %3199 = vmatpush.bf16.msrb.mxu2 %v2809_v45  ;;  %v4216_v45 = vld [vmem:[%s4696_s22 + $0xe90] sm:$0xff]  ;;  %v2455_v36 = vpack.c.bf16 %v3997_v17, %v3996_v30  ;;  %v5793_v30 = vpop.f32.mrf.mxu3 }
 0x2e6   : > { %3171 = vmatpush.bf16.msrb.mxu1 %v2793_v47  ;;  %v2821_v44 = vpack.c.bf16 %v4216_v45, %v4214_v33  ;;  %v3991_v47 = vld [vmem:[%s4386_s30 + $0xf88] sm:$0xff]  ;;  %v4126_v33 = vld [vmem:[%s4696_s22 + $0xbc0] sm:$0xff]  ;;  %v4128_v45 = vld [vmem:[%s4696_s22 + $0xbd0] sm:$0xff] }
 0x2e7   : > { %2940 = vmatpush.bf16.msra.mxu0 %v2391_v15  ;;  %3099 = vmatmul.bf16.gmra.mxu2 %v6365_v57  ;;  %v4184_v15 = vld [vmem:[%s4696_s22 + $0xd90] sm:$0xff]  ;;  %v2777_v17 = vpack.c.bf16 %v4128_v45, %v4126_v33  ;;  %v4057_v33 = vld [vmem:[%s4696_s22 + $0x998] sm:$0xff] }
 0x2e8   : > { %v2805_v11 = vpack.c.bf16 %v4184_v15, %v4182_v8  ;;  %v4210_v15 = vld [vmem:[%s4696_s22 + $0xe60] sm:$0xff] }
 0x2e9   : > { %3200 = vmatpush.bf16.msrb.mxu2 %v2807_v37  ;;  %v4152_v37 = vld [vmem:[%s4696_s22 + $0xc90] sm:$0xff] }
 0x2ea   : > { %3172 = vmatpush.bf16.msrb.mxu1 %v2791_v59  ;;  %v2789_v12 = vpack.c.bf16 %v4152_v37, %v4150_v29  ;;  %v5787_v59 = vpop.f32.mrf.mxu1  ;;  %v4122_v29 = vld [vmem:[%s4696_s22 + $0xba0] sm:$0xff]  ;;  %v4124_v37 = vld [vmem:[%s4696_s22 + $0xbb0] sm:$0xff] }
 0x2eb   : > { %2941 = vmatpush.bf16.msra.mxu0 %v2390_v46  ;;  %v4228_v46 = vld [vmem:[%s4696_s22 + $0xef0] sm:$0xff] }
 0x2ec   : > { %v2827_v58 = vpack.c.bf16 %v4228_v46, %v4226_v26  ;;  %v3995_v26 = vld [vmem:[%s4386_s30 + $0xfa8] sm:$0xff] }
 0x2ed   : > { %3201 = vmatpush.bf16.msrb.mxu2 %v2805_v11  ;;  %v3994_v11 = vld [vmem:[%s4386_s30 + $0xfa0] sm:$0xff]  ;;  %v6374_v46 = vld [vmem:[#allocation39_spill] sm:$0xff] }
 0x2ee   : > { %3226 = vmatpush.bf16.msrb.mxu3 %v2827_v58  ;;  %3173 = vmatpush.bf16.msrb.mxu1 %v2789_v12  ;;  %v2454_v56 = vpack.c.bf16 %v3995_v26, %v3994_v11  ;;  %v6378_v12 = vld [vmem:[#allocation15_spill] sm:$0xff]  ;;  %v4120_v11 = vld [vmem:[%s4696_s22 + $0xb90] sm:$0xff] }
 0x2ef   : > { %2942 = vmatpush.bf16.msra.mxu0 %v2389_v25  ;;  %v4222_v25 = vld [vmem:[%s4696_s22 + $0xec0] sm:$0xff] }
 0x2f0   : > { %3071 = vmatmul.bf16.gmra.mxu1 %v6368_v24 }
 0x2f1   : > { %3127 = vmatmul.bf16.gmra.mxu3 %v6367_v39  ;;  %3202 = vmatpush.bf16.msrb.mxu2 %v2803_v9  ;;  %v2817_v9 = vpack.c.bf16 %v4208_v13, %v4206_v2 }
 0x2f3   : > { %2943 = vmatpush.bf16.msra.mxu0 %v2388_v40  ;;  %v2825_v40 = vpack.c.bf16 %v4224_v55, %v4222_v25  ;;  %v3993_v25 = vld [vmem:[%s4386_s30 + $0xf98] sm:$0xff]  ;;  %v6376_v55 = vld [vmem:[#allocation42_spill] sm:$0xff] }
 0x2f4   : > { %v2453_v54 = vpack.c.bf16 %v3993_v25, %v3992_v1  ;;  %v4112_v1 = vld [vmem:[%s4696_s22 + $0xb50] sm:$0xff]  ;;  %v4067_v25 = vld [vmem:[%s4696_s22 + $0x9e8] sm:$0xff] }
 0x2f5   : > { %3227 = vmatpush.bf16.msrb.mxu3 %v2825_v40  ;;  %v4202_v40 = vld [vmem:[%s4696_s22 + $0xe20] sm:$0xff] }
 0x2f6   : > { %2944 = vmatmul.bf16.vlgmr.msra.gmra.mxu0 %v6366_v62  ;;  %v4176_v62 = vld [vmem:[%s4696_s22 + $0xd50] sm:$0xff] }
 0x2f7   : > { %2988 = vmatpush.bf16.msrb.mxu0 %v2427_v52  ;;  %3104 = vmatmul.bf16.gmra.mxu2 %v6369_v22  ;;  %v6372_v52 = vld [vmem:[#allocation38_spill] sm:$0xff] }
 0x2f9   : > { %3228 = vmatpush.bf16.msrb.mxu3 %v2823_v51  ;;  %v4200_v51 = vld [vmem:[%s4696_s22 + $0xe10] sm:$0xff] }
 0x2fb   : > { %2989 = vmatpush.bf16.msrb.mxu0 %v2426_v41  ;;  %v4174_v41 = vld [vmem:[%s4696_s22 + $0xd40] sm:$0xff] }
 0x2fd   : > { %3229 = vmatpush.bf16.msrb.mxu3 %v2821_v44  ;;  %v5795_v44 = vpop.f32.mrf.mxu2 }
 0x2ff   : > { %2990 = vmatpush.bf16.msrb.mxu0 %v2425_v7  ;;  %v2801_v7 = vpack.c.bf16 %v4176_v62, %v4174_v41  ;;  %v3990_v41 = vld [vmem:[%s4386_s30 + $0xf80] sm:$0xff] }
 0x300   : > { %3076 = vmatmul.bf16.gmra.mxu1 %v6371_v61  ;;  %v4138_v62 = vld [vmem:[%s4696_s22 + $0xc20] sm:$0xff]  ;;  %v2452_v28 = vpack.c.bf16 %v3991_v47, %v3990_v41  ;;  %v6381_v47 = vld [vmem:[#allocation51_spill] sm:$0xff] }
 0x301   : > { %3132 = vmatmul.bf16.gmra.mxu3 %v6370_v48  ;;  %3203 = vmatpush.bf16.msrb.mxu2 %v2801_v7  ;;  %v4140_v7 = vld [vmem:[%s4696_s22 + $0xc30] sm:$0xff]  ;;  %v4106_v41 = vld [vmem:[%s4696_s22 + $0xb20] sm:$0xff] }
 0x303   : > { %2991 = vmatpush.bf16.msrb.mxu0 %v2424_v50  ;;  %v2457_v50 = vpack.c.bf16 %v4001_v32, %v4000_v38  ;;  %v4144_v38 = vld [vmem:[%s4696_s22 + $0xc50] sm:$0xff] }
 0x307   : > { %2992 = vmatpush.bf16.msrb.mxu0 %v2423_v43  ;;  %3109 = vmatmul.bf16.gmra.mxu2 %v6372_v52  ;;  %v4170_v43 = vld [vmem:[%s4696_s22 + $0xd20] sm:$0xff] }
 0x308   : > { %v2799_v27 = vpack.c.bf16 %v4172_v53, %v4170_v43  ;;  %v4134_v53 = vld [vmem:[%s4696_s22 + $0xc00] sm:$0xff] }
 0x30a   : > { %3204 = vmatpush.bf16.msrb.mxu2 %v2799_v27  ;;  %v4136_v27 = vld [vmem:[%s4696_s22 + $0xc10] sm:$0xff] }
 0x30b   : > { %2993 = vmatpush.bf16.msrb.mxu0 %v2422_v19  ;;  %v2456_v19 = vpack.c.bf16 %v3999_v6, %v3998_v0  ;;  %v2783_v0 = vpack.c.bf16 %v4140_v7, %v4138_v62  ;;  %v4198_v6 = vld [vmem:[%s4696_s22 + $0xe00] sm:$0xff]  ;;  %v6382_v7 = vld [vmem:[#allocation49_spill] sm:$0xff] }
 0x30c   : > { %v2813_v5 = vpack.c.bf16 %v4200_v51, %v4198_v6  ;;  %v4102_v51 = vld [vmem:[%s4696_s22 + $0xb00] sm:$0xff] }
 0x30f   : > { %2994 = vmatpush.bf16.msrb.mxu0 %v2421_v35  ;;  %v4166_v35 = vld [vmem:[%s4696_s22 + $0xd00] sm:$0xff] }
 0x310   : > { %v2797_v8 = vpack.c.bf16 %v4168_v20, %v4166_v35  ;;  %3081 = vmatmul.bf16.gmra.mxu1 %v6375_v60  ;;  %v6377_v35 = vld [vmem:[#allocation43_spill] sm:$0xff]  ;;  %v6379_v20 = vld [vmem:[#allocation41_spill] sm:$0xff] }
 0x311   : > { %3137 = vmatmul.bf16.gmra.mxu3 %v6374_v46 }
 0x312   : > { %3205 = vmatpush.bf16.msrb.mxu2 %v2797_v8  ;;  %v2775_v8 = vpack.c.bf16 %v4124_v37, %v4122_v29 }
 0x313   : > { %2995 = vmatpush.bf16.msrb.mxu0 %v2420_v21  ;;  %v2819_v21 = vpack.c.bf16 %v4212_v14, %v4210_v15  ;;  %v6380_v15 = vld [vmem:[#allocation50_spill] sm:$0xff]  ;;  %v2856_v14 = vpop.f32.mrf.mxu1 }
 0x314   : > { %v4099_v14 = vld [vmem:[%s4696_s22 + $0xae8] sm:$0xff] }
 0x315   : > { %3230 = vmatpush.bf16.msrb.mxu3 %v2819_v21  ;;  %v2882_v21 = vpop.f32.mrf.mxu3 }
 0x316   : > { %2996 = vmatmul.bf16.vlgmr.msrb.gmra.mxu0 %v6373_v49  ;;  %v2815_v49 = vpack.c.bf16 %v4204_v63, %v4202_v40  ;;  %v4063_v63 = vld [vmem:[%s4696_s22 + $0x9c8] sm:$0xff]  ;;  %v4101_v21 = vld [vmem:[%s4696_s22 + $0xaf8] sm:$0xff] }
 0x317   : > { %3040 = vmatpush.bf16.msra.mxu0 %v2459_v16  ;;  %v4146_v16 = vld [vmem:[%s4696_s22 + $0xc60] sm:$0xff]  ;;  %3206 = vmatmul.bf16.vlgmr.msrb.gmra.mxu2 %v6376_v55 }
 0x318   : > { %v2787_v58 = vpack.c.bf16 %v4148_v34, %v4146_v16  ;;  %v2921_v16 = vpop.f32.mrf.mxu2  ;;  %v4114_v34 = vld [vmem:[%s4696_s22 + $0xb60] sm:$0xff] }
 0x319   : > { %3231 = vmatpush.bf16.msrb.mxu3 %v2817_v9  ;;  %v4035_v16 = vld [vmem:[%s4696_s22 + $0x8e8] sm:$0xff] }
 0x31a   : > { %3174 = vmatpush.bf16.msrb.mxu1 %v2787_v58  ;;  %v4116_v58 = vld [vmem:[%s4696_s22 + $0xb70] sm:$0xff] }
 0x31b   : > { %3041 = vmatpush.bf16.msra.mxu0 %v2458_v42  ;;  %v4142_v42 = vld [vmem:[%s4696_s22 + $0xc40] sm:$0xff]  ;;  %v2771_v2 = vpack.c.bf16 %v4116_v58, %v4114_v34  ;;  %v5807_v13 = vpop.f32.mrf.mxu1  ;;  %v4037_v34 = vld [vmem:[%s4696_s22 + $0x8f8] sm:$0xff]  ;;  %v2764_v58 = vpack.c.bf16 %v4101_v21, %v4099_v14 }
 0x31c   : > { %v2785_v32 = vpack.c.bf16 %v4144_v38, %v4142_v42  ;;  %v4069_v42 = vld [vmem:[%s4696_s22 + $0x9f8] sm:$0xff] }
 0x31d   : > { %3232 = vmatpush.bf16.msrb.mxu3 %v2815_v49  ;;  %v5811_v9 = vpop.f32.mrf.mxu3  ;;  %v4108_v49 = vld [vmem:[%s4696_s22 + $0xb30] sm:$0xff]  ;;  %v4029_v14 = vld [vmem:[%s4696_s22 + $0x8b8] sm:$0xff] }
 0x31e   : > { %3175 = vmatpush.bf16.msrb.mxu1 %v2785_v32  ;;  %v2748_v32 = vpack.c.bf16 %v4069_v42, %v4067_v25  ;;  %v4254_v42 = vld [vmem:[%s4696_s22 + $0xfc0] sm:$0xff]  ;;  %v4045_v21 = vld [vmem:[%s4696_s22 + $0x938] sm:$0xff] }
 0x31f   : > { %3042 = vmatpush.bf16.msra.mxu0 %v2457_v50  ;;  %v4132_v50 = vld [vmem:[%s4696_s22 + $0xbf0] sm:$0xff] }
 0x320   : > { %v2779_v43 = vpack.c.bf16 %v4132_v50, %v4130_v18  ;;  %v5815_v40 = vpop.f32.mrf.mxu2  ;;  %3310 = vmatpush.bf16.msra.mxu2 %v2748_v32  ;;  %v4061_v18 = vld [vmem:[%s4696_s22 + $0x9b8] sm:$0xff]  ;;  %v2767_v50 = vpack.c.bf16 %v4108_v49, %v4106_v41 }
 0x321   : > { %3233 = vmatpush.bf16.msrb.mxu3 %v2813_v5  ;;  %v4097_v41 = vld [vmem:[%s4696_s22 + $0xad8] sm:$0xff] }
 0x322   : > { %3176 = vmatpush.bf16.msrb.mxu1 %v2783_v0  ;;  %v6383_v0 = vld [vmem:[#allocation54_spill] sm:$0xff] }
 0x323   : > { %3043 = vmatpush.bf16.msra.mxu0 %v2456_v19  ;;  %v2781_v19 = vpack.c.bf16 %v4136_v27, %v4134_v53  ;;  %v2908_v6 = vpop.f32.mrf.mxu1  ;;  %v4055_v27 = vld [vmem:[%s4696_s22 + $0x988] sm:$0xff] }
 0x324   : > { %3234 = vmatmul.bf16.vlgmr.msrb.gmra.mxu3 %v6377_v35  ;;  %v6387_v6 = vld [vmem:[#allocation53_spill] sm:$0xff] }
 0x325   : > { %v2934_v53 = vpop.f32.mrf.mxu3  ;;  %3338 = vmatpush.bf16.msra.mxu3 %v2764_v58  ;;  %v4246_v58 = vld [vmem:[%s4696_s22 + $0xf80] sm:$0xff] }
 0x326   : > { %3177 = vmatpush.bf16.msrb.mxu1 %v2781_v19  ;;  %v4252_v53 = vld [vmem:[%s4696_s22 + $0xfb0] sm:$0xff] }
 0x327   : > { %3044 = vmatpush.bf16.msra.mxu0 %v2455_v36  ;;  %3211 = vmatmul.bf16.gmra.mxu2 %v6380_v15  ;;  %v4118_v36 = vld [vmem:[%s4696_s22 + $0xb80] sm:$0xff] }
 0x328   : > { %v2773_v26 = vpack.c.bf16 %v4120_v11, %v4118_v36  ;;  %v2973_v19 = vpop.f32.mrf.mxu2  ;;  %v6385_v36 = vld [vmem:[#allocation20_spill] sm:$0xff] }
 0x329   : > { %3178 = vmatmul.bf16.vlgmr.msrb.gmra.mxu1 %v6379_v20  ;;  %v4091_v19 = vld [vmem:[%s4696_s22 + $0xaa8] sm:$0xff] }
 0x32b   : > { %3045 = vmatpush.bf16.msra.mxu0 %v2454_v56  ;;  %v4110_v56 = vld [vmem:[%s4696_s22 + $0xb40] sm:$0xff]  ;;  %v5832_v29 = vpop.f32.mrf.mxu1 }
 0x32c   : > { %v2769_v38 = vpack.c.bf16 %v4112_v1, %v4110_v56  ;;  %v4051_v56 = vld [vmem:[%s4696_s22 + $0x968] sm:$0xff]  ;;  %v4053_v1 = vld [vmem:[%s4696_s22 + $0x978] sm:$0xff] }
 0x32d   : > { %v2740_v32 = vpack.c.bf16 %v4053_v1, %v4051_v56  ;;  %v4087_v56 = vld [vmem:[%s4696_s22 + $0xa88] sm:$0xff] }
 0x32f   : > { %3046 = vmatpush.bf16.msra.mxu0 %v2453_v54  ;;  %v4065_v54 = vld [vmem:[%s4696_s22 + $0x9d8] sm:$0xff] }
 0x330   : > { %v2746_v62 = vpack.c.bf16 %v4065_v54, %v4063_v63  ;;  %v4256_v63 = vld [vmem:[%s4696_s22 + $0xfd0] sm:$0xff]  ;;  %v4095_v54 = vld [vmem:[%s4696_s22 + $0xac8] sm:$0xff] }
 0x331   : > { %v2841_v49 = vpack.c.bf16 %v4256_v63, %v4254_v42  ;;  %v4023_v63 = vld [vmem:[%s4696_s22 + $0x888] sm:$0xff] }
 0x332   : > { %3311 = vmatpush.bf16.msra.mxu2 %v2746_v62  ;;  %v2762_v62 = vpack.c.bf16 %v4097_v41, %v4095_v54  ;;  %v4025_v54 = vld [vmem:[%s4696_s22 + $0x898] sm:$0xff] }
 0x333   : > { %3047 = vmatpush.bf16.msra.mxu0 %v2452_v28  ;;  %v4104_v28 = vld [vmem:[%s4696_s22 + $0xb10] sm:$0xff]  ;;  %v5828_v5 = vpop.f32.mrf.mxu0 }
 0x334   : > { %3239 = vmatmul.bf16.gmra.mxu3 %v6381_v47  ;;  %v2765_v45 = vpack.c.bf16 %v4104_v28, %v4102_v51  ;;  %v4049_v28 = vld [vmem:[%s4696_s22 + $0x958] sm:$0xff] }
 0x335   : > { %3339 = vmatpush.bf16.msra.mxu3 %v2762_v62  ;;  %v4041_v62 = vld [vmem:[%s4696_s22 + $0x918] sm:$0xff] }
 0x336   : > { %3048 = vmatmul.bf16.vlgmr.msra.gmra.mxu0 %v6378_v12  ;;  %v4258_v12 = vld [vmem:[%s4696_s22 + $0xfe0] sm:$0xff] }
 0x337   : > { %3142 = vmatpush.bf16.msrb.mxu0 %v2779_v43  ;;  %3216 = vmatmul.bf16.gmra.mxu2 %v6383_v0  ;;  %v2744_v43 = vpack.c.bf16 %v4061_v18, %v4059_v4  ;;  %v4031_v4 = vld [vmem:[%s4696_s22 + $0x8c8] sm:$0xff]  ;;  %v4033_v18 = vld [vmem:[%s4696_s22 + $0x8d8] sm:$0xff] }
 0x338   : > { %v2730_v51 = vpack.c.bf16 %v4033_v18, %v4031_v4  ;;  %v4039_v4 = vld [vmem:[%s4696_s22 + $0x908] sm:$0xff] }
 0x339   : > { %3183 = vmatmul.bf16.gmra.mxu1 %v6382_v7  ;;  %3312 = vmatpush.bf16.msra.mxu2 %v2744_v43  ;;  %v4250_v43 = vld [vmem:[%s4696_s22 + $0xfa0] sm:$0xff] }
 0x33a   : > { %v5847_v25 = vpop.f32.mrf.mxu2 }
 0x33b   : > { %3143 = vmatpush.bf16.msrb.mxu0 %v2777_v17  ;;  %v2742_v17 = vpack.c.bf16 %v4057_v33, %v4055_v27  ;;  %v5834_v37 = vpop.f32.mrf.mxu0  ;;  %v6388_v27 = vld [vmem:[#allocation62_spill] sm:$0xff]  ;;  %v2960_v33 = vpop.f32.mrf.mxu1 }
 0x33c   : > { %6384 = vst [vmem:[#allocation2_spill] sm:$0xff] %v5834_v37  ;;  %v4244_v33 = vld [vmem:[%s4696_s22 + $0xf70] sm:$0xff] }
 0x33d   : > { %3313 = vmatpush.bf16.msra.mxu2 %v2742_v17  ;;  %v4093_v17 = vld [vmem:[%s4696_s22 + $0xab8] sm:$0xff] }
 0x33f   : > { %3144 = vmatpush.bf16.msrb.mxu0 %v2775_v8  ;;  %v4260_v8 = vld [vmem:[%s4696_s22 + $0xff0] sm:$0xff] }
 0x340   : > { %v2843_v11 = vpack.c.bf16 %v4260_v8, %v4258_v12  ;;  %v4027_v12 = vld [vmem:[%s4696_s22 + $0x8a8] sm:$0xff]  ;;  %v2839_v8 = vpack.c.bf16 %v4252_v53, %v4250_v43  ;;  %v4242_v53 = vld [vmem:[%s4696_s22 + $0xf60] sm:$0xff] }
 0x341   : > { %3314 = vmatpush.bf16.msra.mxu2 %v2740_v32  ;;  %v4089_v32 = vld [vmem:[%s4696_s22 + $0xa98] sm:$0xff] }
 0x343   : > { %3145 = vmatpush.bf16.msrb.mxu0 %v2773_v26  ;;  %v5841_v26 = vpop.f32.mrf.mxu3  ;;  %v5878_v43 = vpop.f32.mrf.mxu1 }
 0x347   : > { %3146 = vmatpush.bf16.msrb.mxu0 %v2771_v2  ;;  %v2732_v2 = vpack.c.bf16 %v4037_v34, %v4035_v16  ;;  %3221 = vmatmul.bf16.gmra.mxu2 %v6388_v27  ;;  %v2760_v16 = vpack.c.bf16 %v4093_v17, %v4091_v19  ;;  %v2728_v34 = vpack.c.bf16 %v4029_v14, %v4027_v12  ;;  %v6389_v19 = vld [vmem:[#allocation24_spill] sm:$0xff]  ;;  %v4085_v12 = vld [vmem:[%s4696_s22 + $0xa78] sm:$0xff]  ;;  %v4019_v14 = vld [vmem:[%s4696_s22 + $0x868] sm:$0xff] }
 0x348   : > { %v2835_v17 = vpack.c.bf16 %v4244_v33, %v4242_v53  ;;  %v4011_v53 = vld [vmem:[%s4696_s22 + $0x828] sm:$0xff]  ;;  %v4013_v33 = vld [vmem:[%s4696_s22 + $0x838] sm:$0xff] }
 0x349   : > { %3282 = vmatpush.bf16.msra.mxu1 %v2732_v2  ;;  %v4248_v2 = vld [vmem:[%s4696_s22 + $0xf90] sm:$0xff]  ;;  %3340 = vmatpush.bf16.msra.mxu3 %v2760_v16 }
 0x34a   : > { %3188 = vmatmul.bf16.gmra.mxu1 %v6387_v6  ;;  %v2837_v18 = vpack.c.bf16 %v4248_v2, %v4246_v58  ;;  %v4238_v58 = vld [vmem:[%s4696_s22 + $0xf40] sm:$0xff]  ;;  %v4240_v2 = vld [vmem:[%s4696_s22 + $0xf50] sm:$0xff] }
 0x34b   : > { %3147 = vmatpush.bf16.msrb.mxu0 %v2769_v38  ;;  %v6386_v38 = vld [vmem:[#allocation55_spill] sm:$0xff]  ;;  %v2986_v1 = vpop.f32.mrf.mxu3 }
 0x34c   : > { %3244 = vmatmul.bf16.gmra.mxu3 %v6386_v38  ;;  %v6390_v1 = vld [vmem:[#allocation63_spill] sm:$0xff] }
 0x34d   : > { %3283 = vmatpush.bf16.msra.mxu1 %v2730_v51  ;;  %v2726_v51 = vpack.c.bf16 %v4025_v54, %v4023_v63  ;;  %v4015_v63 = vld [vmem:[%s4696_s22 + $0x848] sm:$0xff]  ;;  %v4017_v54 = vld [vmem:[%s4696_s22 + $0x858] sm:$0xff] }
 0x34f   : > { %3148 = vmatpush.bf16.msrb.mxu0 %v2767_v50  ;;  %v4047_v50 = vld [vmem:[%s4696_s22 + $0x948] sm:$0xff] }
 0x351   : > { %3284 = vmatpush.bf16.msra.mxu1 %v2728_v34 }
 0x353   : > { %3149 = vmatpush.bf16.msrb.mxu0 %v2765_v45  ;;  %v2738_v45 = vpack.c.bf16 %v4049_v28, %v4047_v50  ;;  %v5874_v41 = vpop.f32.mrf.mxu0  ;;  %v2758_v50 = vpack.c.bf16 %v4089_v32, %v4087_v56  ;;  %v2734_v28 = vpack.c.bf16 %v4041_v62, %v4039_v4  ;;  %v4079_v56 = vld [vmem:[%s4696_s22 + $0xa48] sm:$0xff]  ;;  %v4081_v32 = vld [vmem:[%s4696_s22 + $0xa58] sm:$0xff]  ;;  %v2722_v4 = vpack.c.bf16 %v4017_v54, %v4015_v63  ;;  %v4234_v62 = vld [vmem:[%s4696_s22 + $0xf20] sm:$0xff] }
 0x355   : > { %3315 = vmatpush.bf16.msra.mxu2 %v2738_v45  ;;  %3341 = vmatpush.bf16.msra.mxu3 %v2758_v50  ;;  %v4083_v45 = vld [vmem:[%s4696_s22 + $0xa68] sm:$0xff] }
 0x356   : > { %3150 = vmatmul.bf16.vlgmr.msrb.gmra.mxu0 %v6385_v36  ;;  %3285 = vmatpush.bf16.msra.mxu1 %v2726_v51  ;;  %v2756_v16 = vpack.c.bf16 %v4085_v12, %v4083_v45  ;;  %v4075_v50 = vld [vmem:[%s4696_s22 + $0xa28] sm:$0xff]  ;;  %v6391_v51 = vld [vmem:[#allocation61_spill] sm:$0xff]  ;;  %v3012_v45 = vpop.f32.mrf.mxu1 }
 0x357   : > { %3254 = vmatpush.bf16.msra.mxu0 %v2843_v11  ;;  %v4043_v11 = vld [vmem:[%s4696_s22 + $0x928] sm:$0xff] }
 0x358   : > { %v2736_v42 = vpack.c.bf16 %v4045_v21, %v4043_v11  ;;  %v4021_v11 = vld [vmem:[%s4696_s22 + $0x878] sm:$0xff] }
 0x359   : > { %v2724_v34 = vpack.c.bf16 %v4021_v11, %v4019_v14  ;;  %3342 = vmatpush.bf16.msra.mxu3 %v2756_v16  ;;  %v2720_v14 = vpack.c.bf16 %v4013_v33, %v4011_v53  ;;  %v4230_v11 = vld [vmem:[%s4696_s22 + $0xf00] sm:$0xff]  ;;  %v4071_v16 = vld [vmem:[%s4696_s22 + $0xa08] sm:$0xff] }
 0x35a   : > { %3316 = vmatpush.bf16.msra.mxu2 %v2736_v42  ;;  %v2833_v42 = vpack.c.bf16 %v4240_v2, %v4238_v58  ;;  %3193 = vmatmul.bf16.gmra.mxu1 %v6391_v51  ;;  %v4073_v2 = vld [vmem:[%s4696_s22 + $0xa18] sm:$0xff] }
 0x35b   : > { %3255 = vmatpush.bf16.msra.mxu0 %v2841_v49  ;;  %v3025_v49 = vpop.f32.mrf.mxu2  ;;  %v2895_v21 = vpop.f32.mrf.mxu0  ;;  %3286 = vmatpush.bf16.msra.mxu1 %v2724_v34 }
 0x35c   : > { %3249 = vmatmul.bf16.gmra.mxu3 %v6390_v1  ;;  %v2754_v49 = vpack.c.bf16 %v4081_v32, %v4079_v56  ;;  %v4232_v21 = vld [vmem:[%s4696_s22 + $0xf10] sm:$0xff]  ;;  %v4007_v56 = vld [vmem:[%s4696_s22 + $0x808] sm:$0xff]  ;;  %v4009_v32 = vld [vmem:[%s4696_s22 + $0x818] sm:$0xff] }
 0x35d   : > { %v2829_v63 = vpack.c.bf16 %v4232_v21, %v4230_v11  ;;  %v2718_v54 = vpack.c.bf16 %v4009_v32, %v4007_v56  ;;  %v4195_v11 = vld [vmem:[%s4696_s22 + $0xde8] sm:$0xff] }
 0x35e   : > { %3317 = vmatpush.bf16.msra.mxu2 %v2734_v28  ;;  %v4077_v28 = vld [vmem:[%s4696_s22 + $0xa38] sm:$0xff]  ;;  %3343 = vmatpush.bf16.msra.mxu3 %v2754_v49  ;;  %v4191_v21 = vld [vmem:[%s4696_s22 + $0xdc8] sm:$0xff] }
 0x35f   : > { %3256 = vmatpush.bf16.msra.mxu0 %v2839_v8  ;;  %v5885_v8 = vpop.f32.mrf.mxu3  ;;  %3287 = vmatpush.bf16.msra.mxu1 %v2722_v4  ;;  %v2752_v12 = vpack.c.bf16 %v4077_v28, %v4075_v50  ;;  %v3067_v4 = vpop.f32.mrf.mxu1  ;;  %v4187_v32 = vld [vmem:[%s4696_s22 + $0xda8] sm:$0xff] }
 0x361   : > { %3318 = vmatmul.bf16.vlgmr.msra.gmra.mxu2 %v6362_v10  ;;  %v2750_v10 = vpack.c.bf16 %v4073_v2, %v4071_v16 }
 0x362   : > { %3344 = vmatpush.bf16.msra.mxu3 %v2752_v12 }
 0x363   : > { %3257 = vmatpush.bf16.msra.mxu0 %v2837_v18  ;;  %v4236_v18 = vld [vmem:[%s4696_s22 + $0xf30] sm:$0xff]  ;;  %v3095_v34 = vpop.f32.mrf.mxu2  ;;  %3288 = vmatpush.bf16.msra.mxu1 %v2720_v14 }
 0x366   : > { %3155 = vmatmul.bf16.gmra.mxu0 %v6389_v19  ;;  %3345 = vmatpush.bf16.msra.mxu3 %v2750_v10 }
 0x367   : > { %3258 = vmatpush.bf16.msra.mxu0 %v2835_v17  ;;  %v2831_v17 = vpack.c.bf16 %v4236_v18, %v4234_v62  ;;  %v3038_v58 = vpop.f32.mrf.mxu3  ;;  %3289 = vmatpush.bf16.msra.mxu1 %v2718_v54  ;;  %v3096_v62 = vadd.f32 %v3095_v34, %v3067_v4  ;;  %v3069_v33 = vpop.f32.mrf.mxu1 }
 0x368   : > { %v4193_v58 = vld [vmem:[%s4696_s22 + $0xdd8] sm:$0xff] }
 0x369   : > { %v2810_v56 = vpack.c.bf16 %v4193_v58, %v4191_v21 }
 0x36a   : > { %3290 = vmatmul.bf16.vlgmr.msra.gmra.mxu1 %v6364_v31 }
 0x36b   : > { %3259 = vmatpush.bf16.msra.mxu0 %v2833_v42  ;;  %v6392_v42 = vld [vmem:[#allocation32_spill] sm:$0xff]  ;;  %v3097_v49 = vpop.f32.mrf.mxu2 }
 0x36c   : > { %3346 = vmatmul.bf16.vlgmr.msra.gmra.mxu3 %v6363_v3  ;;  %v3098_v45 = vadd.f32 %v3097_v49, %v3069_v33  ;;  %v6393_v3 = vld [vmem:[#allocation40_spill] sm:$0xff] }
 0x36f   : > { %3260 = vmatpush.bf16.msra.mxu0 %v2831_v17  ;;  %v3123_v18 = vpop.f32.mrf.mxu3  ;;  %v3072_v16 = vpop.f32.mrf.mxu1 }
 0x370   : > { %v5916_v28 = vadd.f32 %v3123_v18, %v3096_v62  ;;  %v4183_v62 = vld [vmem:[%s4696_s22 + $0xd88] sm:$0xff] }
 0x371   : > { %3323 = vmatmul.bf16.gmra.mxu2 %v6365_v57  ;;  %v4197_v57 = vld [vmem:[%s4696_s22 + $0xdf8] sm:$0xff] }
 0x372   : > { %v2812_v34 = vpack.c.bf16 %v4197_v57, %v4195_v11  ;;  %v6394_v11 = vld [vmem:[#allocation44_spill] sm:$0xff] }
 0x373   : > { %3261 = vmatpush.bf16.msra.mxu0 %v2829_v63  ;;  %v5914_v50 = vpop.f32.mrf.mxu0  ;;  %v3100_v53 = vpop.f32.mrf.mxu2  ;;  %v4189_v63 = vld [vmem:[%s4696_s22 + $0xdb8] sm:$0xff] }
 0x374   : > { %v3101_v2 = vadd.f32 %v3100_v53, %v3072_v16  ;;  %3422 = vmatpush.bf16.msrb.mxu2 %v2812_v34  ;;  %v2808_v49 = vpack.c.bf16 %v4189_v63, %v4187_v32  ;;  %v4163_v16 = vld [vmem:[%s4696_s22 + $0xce8] sm:$0xff]  ;;  %v4165_v34 = vld [vmem:[%s4696_s22 + $0xcf8] sm:$0xff] }
 0x375   : > { %v4179_v32 = vld [vmem:[%s4696_s22 + $0xd68] sm:$0xff]  ;;  %v4181_v63 = vld [vmem:[%s4696_s22 + $0xd78] sm:$0xff] }
 0x376   : > { %3160 = vmatmul.bf16.gmra.mxu0 %v6392_v42 }
 0x377   : > { %v3125_v17 = vpop.f32.mrf.mxu3  ;;  %v3074_v18 = vpop.f32.mrf.mxu1 }
 0x378   : > { %v5918_v14 = vadd.f32 %v3125_v17, %v3098_v45  ;;  %3423 = vmatpush.bf16.msrb.mxu2 %v2810_v56  ;;  %v4131_v45 = vld [vmem:[%s4696_s22 + $0xbe8] sm:$0xff]  ;;  %v4133_v17 = vld [vmem:[%s4696_s22 + $0xbf8] sm:$0xff]  ;;  %v2796_v56 = vpack.c.bf16 %v4165_v34, %v4163_v16 }
 0x379   : > { %v2780_v21 = vpack.c.bf16 %v4133_v17, %v4131_v45  ;;  %v4161_v17 = vld [vmem:[%s4696_s22 + $0xcd8] sm:$0xff] }
 0x37a   : > { %3295 = vmatmul.bf16.gmra.mxu1 %v6368_v24  ;;  %v4125_v16 = vld [vmem:[%s4696_s22 + $0xbb8] sm:$0xff] }
 0x37b   : > { %v2947_v12 = vpop.f32.mrf.mxu0  ;;  %v3102_v31 = vpop.f32.mrf.mxu2  ;;  %3366 = vmatpush.bf16.msrb.mxu0 %v2780_v21  ;;  %3394 = vmatpush.bf16.msrb.mxu1 %v2796_v56  ;;  %v4177_v21 = vld [vmem:[%s4696_s22 + $0xd58] sm:$0xff] }
 0x37c   : > { %3351 = vmatmul.bf16.gmra.mxu3 %v6367_v39  ;;  %v4185_v39 = vld [vmem:[%s4696_s22 + $0xd98] sm:$0xff]  ;;  %v3103_v24 = vadd.f32 %v3102_v31, %v3074_v18  ;;  %3424 = vmatpush.bf16.msrb.mxu2 %v2808_v49  ;;  %v4227_v12 = vld [vmem:[%s4696_s22 + $0xee8] sm:$0xff] }
 0x37d   : > { %v2806_v53 = vpack.c.bf16 %v4185_v39, %v4183_v62  ;;  %v4229_v31 = vld [vmem:[%s4696_s22 + $0xef8] sm:$0xff]  ;;  %v2804_v62 = vpack.c.bf16 %v4181_v63, %v4179_v32  ;;  %v4223_v18 = vld [vmem:[%s4696_s22 + $0xec8] sm:$0xff] }
 0x37e   : > { %v4129_v39 = vld [vmem:[%s4696_s22 + $0xbd8] sm:$0xff]  ;;  %v4155_v32 = vld [vmem:[%s4696_s22 + $0xca8] sm:$0xff] }
 0x37f   : > { %v3128_v10 = vpop.f32.mrf.mxu3  ;;  %v3077_v58 = vpop.f32.mrf.mxu1  ;;  %v4221_v56 = vld [vmem:[%s4696_s22 + $0xeb8] sm:$0xff] }
 0x380   : > { %v5930_v54 = vadd.f32 %v3128_v10, %v3101_v2  ;;  %3425 = vmatpush.bf16.msrb.mxu2 %v2806_v53  ;;  %v2828_v2 = vpack.c.bf16 %v4229_v31, %v4227_v12  ;;  %v4127_v10 = vld [vmem:[%s4696_s22 + $0xbc8] sm:$0xff] }
 0x381   : > { %3328 = vmatmul.bf16.gmra.mxu2 %v6369_v22  ;;  %v4123_v31 = vld [vmem:[%s4696_s22 + $0xba8] sm:$0xff] }
 0x382   : > { %3450 = vmatpush.bf16.msrb.mxu3 %v2828_v2  ;;  %v4219_v2 = vld [vmem:[%s4696_s22 + $0xea8] sm:$0xff] }
 0x383   : > { %v3105_v4 = vpop.f32.mrf.mxu2 }
 0x384   : > { %v3106_v49 = vadd.f32 %v3105_v4, %v3077_v58  ;;  %v4159_v4 = vld [vmem:[%s4696_s22 + $0xcc8] sm:$0xff]  ;;  %3426 = vmatpush.bf16.msrb.mxu2 %v2804_v62 }
 0x385   : > { %v2794_v12 = vpack.c.bf16 %v4161_v17, %v4159_v4  ;;  %v4171_v62 = vld [vmem:[%s4696_s22 + $0xd28] sm:$0xff] }
 0x386   : > { %3165 = vmatmul.bf16.gmra.mxu0 %v6393_v3  ;;  %v4119_v17 = vld [vmem:[%s4696_s22 + $0xb88] sm:$0xff] }
 0x387   : > { %v3130_v33 = vpop.f32.mrf.mxu3  ;;  %3395 = vmatpush.bf16.msrb.mxu1 %v2794_v12  ;;  %v4169_v12 = vld [vmem:[%s4696_s22 + $0xd18] sm:$0xff] }
 0x388   : > { %v5934_v22 = vadd.f32 %v3130_v33, %v3103_v24  ;;  %v4225_v24 = vld [vmem:[%s4696_s22 + $0xed8] sm:$0xff]  ;;  %v2778_v33 = vpack.c.bf16 %v4129_v39, %v4127_v10 }
 0x389   : > { %v2826_v45 = vpack.c.bf16 %v4225_v24, %v4223_v18  ;;  %v4157_v10 = vld [vmem:[%s4696_s22 + $0xcb8] sm:$0xff] }
 0x38a   : > { %3300 = vmatmul.bf16.gmra.mxu1 %v6371_v61  ;;  %3367 = vmatpush.bf16.msrb.mxu0 %v2778_v33  ;;  %v2776_v61 = vpack.c.bf16 %v4125_v16, %v4123_v31  ;;  %v4173_v39 = vld [vmem:[%s4696_s22 + $0xd38] sm:$0xff]  ;;  %v2792_v18 = vpack.c.bf16 %v4157_v10, %v4155_v32  ;;  %v3079_v33 = vpop.f32.mrf.mxu1  ;;  %v4151_v31 = vld [vmem:[%s4696_s22 + $0xc88] sm:$0xff] }
 0x38b   : > { %v3107_v57 = vpop.f32.mrf.mxu2  ;;  %3451 = vmatpush.bf16.msrb.mxu3 %v2826_v45  ;;  %v2800_v4 = vpack.c.bf16 %v4173_v39, %v4171_v62  ;;  %v4153_v16 = vld [vmem:[%s4696_s22 + $0xc98] sm:$0xff]  ;;  %v4167_v45 = vld [vmem:[%s4696_s22 + $0xd08] sm:$0xff] }
 0x38c   : > { %3356 = vmatmul.bf16.gmra.mxu3 %v6370_v48  ;;  %v4175_v48 = vld [vmem:[%s4696_s22 + $0xd48] sm:$0xff]  ;;  %3396 = vmatpush.bf16.msrb.mxu1 %v2792_v18  ;;  %v2798_v32 = vpack.c.bf16 %v4169_v12, %v4167_v45 }
 0x38d   : > { %v2802_v58 = vpack.c.bf16 %v4177_v21, %v4175_v48  ;;  %v4215_v48 = vld [vmem:[%s4696_s22 + $0xe88] sm:$0xff]  ;;  %v4217_v21 = vld [vmem:[%s4696_s22 + $0xe98] sm:$0xff] }
 0x38e   : > { %3368 = vmatpush.bf16.msrb.mxu0 %v2776_v61  ;;  %v4117_v61 = vld [vmem:[%s4696_s22 + $0xb78] sm:$0xff]  ;;  %v4211_v39 = vld [vmem:[%s4696_s22 + $0xe68] sm:$0xff] }
 0x38f   : > { %v3133_v34 = vpop.f32.mrf.mxu3  ;;  %3427 = vmatpush.bf16.msrb.mxu2 %v2802_v58  ;;  %v2822_v58 = vpack.c.bf16 %v4217_v21, %v4215_v48  ;;  %v4149_v48 = vld [vmem:[%s4696_s22 + $0xc78] sm:$0xff] }
 0x390   : > { %v5963_v63 = vadd.f32 %v3133_v34, %v3106_v49  ;;  %v4121_v49 = vld [vmem:[%s4696_s22 + $0xb98] sm:$0xff]  ;;  %v3108_v34 = vadd.f32 %v3107_v57, %v3079_v33  ;;  %v4115_v57 = vld [vmem:[%s4696_s22 + $0xb68] sm:$0xff] }
 0x391   : > { %3333 = vmatmul.bf16.gmra.mxu2 %v6372_v52  ;;  %v2824_v52 = vpack.c.bf16 %v4221_v56, %v4219_v2  ;;  %v2774_v37 = vpack.c.bf16 %v4121_v49, %v4119_v17  ;;  %v2790_v56 = vpack.c.bf16 %v4153_v16, %v4151_v31  ;;  %v4213_v17 = vld [vmem:[%s4696_s22 + $0xe78] sm:$0xff]  ;;  %v4147_v49 = vld [vmem:[%s4696_s22 + $0xc68] sm:$0xff] }
 0x392   : > { %v2820_v33 = vpack.c.bf16 %v4213_v17, %v4211_v39  ;;  %v2788_v21 = vpack.c.bf16 %v4149_v48, %v4147_v49  ;;  %v4111_v31 = vld [vmem:[%s4696_s22 + $0xb48] sm:$0xff]  ;;  %v4113_v16 = vld [vmem:[%s4696_s22 + $0xb58] sm:$0xff] }
 0x393   : > { %v5950_v53 = vpop.f32.mrf.mxu0  ;;  %v3110_v24 = vpop.f32.mrf.mxu2  ;;  %3452 = vmatpush.bf16.msrb.mxu3 %v2824_v52  ;;  %3428 = vmatpush.bf16.msrb.mxu2 %v2800_v4  ;;  %v6395_v52 = vld [vmem:[#allocation52_spill] sm:$0xff]  ;;  %v2772_v4 = vpack.c.bf16 %v4117_v61, %v4115_v57  ;;  %v2770_v12 = vpack.c.bf16 %v4113_v16, %v4111_v31  ;;  %v4107_v57 = vld [vmem:[%s4696_s22 + $0xb28] sm:$0xff]  ;;  %v4109_v61 = vld [vmem:[%s4696_s22 + $0xb38] sm:$0xff] }
 0x394   : > { %3369 = vmatpush.bf16.msrb.mxu0 %v2774_v37  ;;  %3397 = vmatpush.bf16.msrb.mxu1 %v2790_v56  ;;  %v3082_v37 = vpop.f32.mrf.mxu1  ;;  %v4145_v56 = vld [vmem:[%s4696_s22 + $0xc58] sm:$0xff]  ;;  %v4203_v39 = vld [vmem:[%s4696_s22 + $0xe28] sm:$0xff]  ;;  %v2768_v49 = vpack.c.bf16 %v4109_v61, %v4107_v57 }
 0x395   : > { %v3111_v45 = vadd.f32 %v3110_v24, %v3082_v37  ;;  %v4139_v24 = vld [vmem:[%s4696_s22 + $0xc28] sm:$0xff]  ;;  %v4141_v17 = vld [vmem:[%s4696_s22 + $0xc38] sm:$0xff] }
 0x396   : > { %3262 = vmatmul.bf16.vlgmr.msra.gmra.mxu0 %v6394_v11  ;;  %v4199_v31 = vld [vmem:[%s4696_s22 + $0xe08] sm:$0xff] }
 0x397   : > { %v3135_v10 = vpop.f32.mrf.mxu3  ;;  %3453 = vmatpush.bf16.msrb.mxu3 %v2822_v58  ;;  %3429 = vmatpush.bf16.msrb.mxu2 %v2798_v32  ;;  %v4143_v58 = vld [vmem:[%s4696_s22 + $0xc48] sm:$0xff] }
 0x398   : > { %v5976_v62 = vadd.f32 %v3135_v10, %v3108_v34  ;;  %v4207_v34 = vld [vmem:[%s4696_s22 + $0xe48] sm:$0xff]  ;;  %3370 = vmatpush.bf16.msrb.mxu0 %v2772_v4  ;;  %3398 = vmatpush.bf16.msrb.mxu1 %v2788_v21  ;;  %v2786_v10 = vpack.c.bf16 %v4145_v56, %v4143_v58  ;;  %v4105_v21 = vld [vmem:[%s4696_s22 + $0xb18] sm:$0xff] }
 0x399   : > { %v4137_v58 = vld [vmem:[%s4696_s22 + $0xc18] sm:$0xff] }
 0x39a   : > { %3305 = vmatmul.bf16.gmra.mxu1 %v6375_v60  ;;  %v2784_v60 = vpack.c.bf16 %v4141_v17, %v4139_v24 }
 0x39b   : > { %v2999_v2 = vpop.f32.mrf.mxu0  ;;  %v3112_v18 = vpop.f32.mrf.mxu2  ;;  %3454 = vmatpush.bf16.msrb.mxu3 %v2820_v33 }
 0x39c   : > { %3361 = vmatmul.bf16.gmra.mxu3 %v6374_v46  ;;  %v4209_v2 = vld [vmem:[%s4696_s22 + $0xe58] sm:$0xff]  ;;  %3371 = vmatpush.bf16.msrb.mxu0 %v2770_v12  ;;  %v3084_v33 = vpop.f32.mrf.mxu1 }
 0x39d   : > { %v2818_v32 = vpack.c.bf16 %v4209_v2, %v4207_v34  ;;  %v4205_v18 = vld [vmem:[%s4696_s22 + $0xe38] sm:$0xff]  ;;  %3399 = vmatpush.bf16.msrb.mxu1 %v2786_v10  ;;  %v4135_v2 = vld [vmem:[%s4696_s22 + $0xc08] sm:$0xff] }
 0x39e   : > { %v2816_v48 = vpack.c.bf16 %v4205_v18, %v4203_v39  ;;  %v4201_v34 = vld [vmem:[%s4696_s22 + $0xe18] sm:$0xff]  ;;  %v2782_v56 = vpack.c.bf16 %v4137_v58, %v4135_v2  ;;  %v4247_v2 = vld [vmem:[%s4696_s22 + $0xf88] sm:$0xff] }
 0x39f   : > { %v3138_v46 = vpop.f32.mrf.mxu3  ;;  %3455 = vmatpush.bf16.msrb.mxu3 %v2818_v32  ;;  %v2814_v12 = vpack.c.bf16 %v4201_v34, %v4199_v31  ;;  %v6396_v32 = vld [vmem:[#allocation56_spill] sm:$0xff]  ;;  %v4249_v58 = vld [vmem:[%s4696_s22 + $0xf98] sm:$0xff] }
 0x3a0   : > { %v6000_v4 = vadd.f32 %v3138_v46, %v3111_v45  ;;  %3372 = vmatpush.bf16.msrb.mxu0 %v2768_v49  ;;  %v6397_v49 = vld [vmem:[#allocation64_spill] sm:$0xff] }
 0x3a1   : > { %3430 = vmatmul.bf16.vlgmr.msrb.gmra.mxu2 %v6376_v55  ;;  %3400 = vmatpush.bf16.msrb.mxu1 %v2784_v60  ;;  %v4103_v55 = vld [vmem:[%s4696_s22 + $0xb08] sm:$0xff] }
 0x3a2   : > { %v2766_v16 = vpack.c.bf16 %v4105_v21, %v4103_v55  ;;  %v4255_v55 = vld [vmem:[%s4696_s22 + $0xfc8] sm:$0xff]  ;;  %v4257_v21 = vld [vmem:[%s4696_s22 + $0xfd8] sm:$0xff] }
 0x3a3   : > { %v6002_v37 = vpop.f32.mrf.mxu2  ;;  %3456 = vmatpush.bf16.msrb.mxu3 %v2816_v48  ;;  %v2842_v31 = vpack.c.bf16 %v4257_v21, %v4255_v55  ;;  %v4243_v55 = vld [vmem:[%s4696_s22 + $0xf68] sm:$0xff]  ;;  %v4245_v21 = vld [vmem:[%s4696_s22 + $0xf78] sm:$0xff] }
 0x3a4   : > { %3373 = vmatpush.bf16.msrb.mxu0 %v2766_v16 }
 0x3a5   : > { %3401 = vmatpush.bf16.msrb.mxu1 %v2782_v56 }
 0x3a6   : > { %3267 = vmatmul.bf16.gmra.mxu0 %v6395_v52  ;;  %v3179_v61 = vpop.f32.mrf.mxu1 }
 0x3a7   : > { %v3140_v45 = vpop.f32.mrf.mxu3  ;;  %3457 = vmatpush.bf16.msrb.mxu3 %v2814_v12 }
 0x3a8   : > { %v4253_v45 = vld [vmem:[%s4696_s22 + $0xfb8] sm:$0xff] }
 0x3aa   : > { %3402 = vmatmul.bf16.vlgmr.msrb.gmra.mxu1 %v6379_v20  ;;  %v4261_v20 = vld [vmem:[%s4696_s22 + $0xff8] sm:$0xff] }
 0x3ab   : > { %v6013_v57 = vpop.f32.mrf.mxu2 }
 0x3ac   : > { %3458 = vmatmul.bf16.vlgmr.msrb.gmra.mxu3 %v6377_v35  ;;  %v4259_v35 = vld [vmem:[%s4696_s22 + $0xfe8] sm:$0xff] }
 0x3ae   : > { %v3181_v17 = vpop.f32.mrf.mxu1 }
 0x3af   : > { %v3235_v39 = vpop.f32.mrf.mxu3 }
 0x3b1   : > { %3435 = vmatmul.bf16.gmra.mxu2 %v6380_v15  ;;  %v2844_v15 = vpack.c.bf16 %v4261_v20, %v4259_v35 }
 0x3b3   : > { %v6011_v10 = vpop.f32.mrf.mxu0  ;;  %v6018_v24 = vpop.f32.mrf.mxu2  ;;  %4295 = vmatpush.bf16.msra.mxu2 %v2844_v15  ;;  %3478 = vmatpush.bf16.msra.mxu0 %v2844_v15 }
 0x3b6   : > { %3272 = vmatmul.bf16.gmra.mxu0 %v6396_v32  ;;  %v6023_v60 = vpop.f32.mrf.mxu1 }
 0x3b7   : > { %v3237_v46 = vpop.f32.mrf.mxu3  ;;  %4296 = vmatpush.bf16.msra.mxu2 %v2842_v31  ;;  %3479 = vmatpush.bf16.msra.mxu0 %v2842_v31 }
 0x3ba   : > { %3407 = vmatmul.bf16.gmra.mxu1 %v6382_v7 }
 0x3bb   : > { %v3051_v18 = vpop.f32.mrf.mxu0  ;;  %v6021_v48 = vpop.f32.mrf.mxu2 }
 0x3bc   : > { %3463 = vmatmul.bf16.gmra.mxu3 %v6381_v47  ;;  %v4251_v47 = vld [vmem:[%s4696_s22 + $0xfa8] sm:$0xff]  ;;  %v2838_v18 = vpack.c.bf16 %v4249_v58, %v4247_v2 }
 0x3bd   : > { %v2840_v7 = vpack.c.bf16 %v4253_v45, %v4251_v47  ;;  %v2836_v47 = vpack.c.bf16 %v4245_v21, %v4243_v55  ;;  %v4239_v45 = vld [vmem:[%s4696_s22 + $0xf48] sm:$0xff] }
 0x3be   : > { %v6036_v34 = vpop.f32.mrf.mxu1  ;;  %v4235_v58 = vld [vmem:[%s4696_s22 + $0xf28] sm:$0xff] }
 0x3bf   : > { %v6030_v33 = vpop.f32.mrf.mxu3  ;;  %4297 = vmatpush.bf16.msra.mxu2 %v2840_v7  ;;  %3480 = vmatpush.bf16.msra.mxu0 %v2840_v7  ;;  %v4241_v7 = vld [vmem:[%s4696_s22 + $0xf58] sm:$0xff]  ;;  %v4231_v21 = vld [vmem:[%s4696_s22 + $0xf08] sm:$0xff] }
 0x3c1   : > { %3440 = vmatmul.bf16.gmra.mxu2 %v6383_v0 }
 0x3c3   : > { %v6034_v16 = vpop.f32.mrf.mxu2  ;;  %4298 = vmatpush.bf16.msra.mxu2 %v2838_v18  ;;  %3481 = vmatpush.bf16.msra.mxu0 %v2838_v18 }
 0x3c6   : > { %3277 = vmatmul.bf16.gmra.mxu0 %v6397_v49 }
 0x3c7   : > { %v6040_v12 = vpop.f32.mrf.mxu3  ;;  %v3189_v15 = vpop.f32.mrf.mxu1  ;;  %4299 = vmatpush.bf16.msra.mxu2 %v2836_v47  ;;  %3482 = vmatpush.bf16.msra.mxu0 %v2836_v47 }
 0x3ca   : > { %3412 = vmatmul.bf16.gmra.mxu1 %v6387_v6  ;;  %v4237_v6 = vld [vmem:[%s4696_s22 + $0xf38] sm:$0xff] }
 0x3cb   : > { %v6046_v20 = vpop.f32.mrf.mxu2 }
 0x3cc   : > { %3468 = vmatmul.bf16.gmra.mxu3 %v6386_v38  ;;  %v2834_v38 = vpack.c.bf16 %v4241_v7, %v4239_v45 }
 0x3ce   : > { %4300 = vmatpush.bf16.msra.mxu2 %v2834_v38  ;;  %3483 = vmatpush.bf16.msra.mxu0 %v2834_v38 }
 0x3d1   : > { %3445 = vmatmul.bf16.gmra.mxu2 %v6388_v27  ;;  %v2832_v27 = vpack.c.bf16 %v4237_v6, %v4235_v58 }
 0x3d3   : > { %v3151_v0 = vpop.f32.mrf.mxu0  ;;  %v6059_v2 = vpop.f32.mrf.mxu2  ;;  %4301 = vmatpush.bf16.msra.mxu2 %v2832_v27  ;;  %3484 = vmatpush.bf16.msra.mxu0 %v2832_v27 }
 0x3d4   : > { %v3152_v56 = vadd.f32 %v3151_v0, %v5916_v28 }
 0x3d6   : > { %v3180_v35 = vadd.f32 %v3179_v61, %v3152_v56  ;;  %3374 = vmatmul.bf16.vlgmr.msrb.gmra.mxu0 %v6385_v36  ;;  %v3245_v61 = vpop.f32.mrf.mxu3 }
 0x3d8   : > { %v3208_v31 = vadd.f32 %v6002_v37, %v3180_v35 }
 0x3da   : > { %v6052_v28 = vadd.f32 %v3235_v39, %v3208_v31  ;;  %v3191_v39 = vpop.f32.mrf.mxu1  ;;  %3417 = vmatmul.bf16.gmra.mxu1 %v6391_v51 }
 0x3db   : > { %v3153_v36 = vpop.f32.mrf.mxu0 }
 0x3dc   : > { %v3154_v37 = vadd.f32 %v3153_v36, %v5918_v14  ;;  %v4233_v14 = vld [vmem:[%s4696_s22 + $0xf18] sm:$0xff]  ;;  %v3224_v36 = vpop.f32.mrf.mxu2  ;;  %3473 = vmatmul.bf16.gmra.mxu3 %v6390_v1 }
 0x3dd   : > { %v2830_v31 = vpack.c.bf16 %v4233_v14, %v4231_v21 }
 0x3de   : > { %v3182_v0 = vadd.f32 %v3181_v17, %v3154_v37  ;;  %v3247_v55 = vpop.f32.mrf.mxu3 }
 0x3df   : > { %4302 = vmatpush.bf16.msra.mxu2 %v2830_v31  ;;  %3485 = vmatpush.bf16.msra.mxu0 %v2830_v31 }
 0x3e0   : > { %v3210_v56 = vadd.f32 %v6013_v57, %v3182_v0 }
 0x3e2   : > { %v6064_v18 = vadd.f32 %v3237_v46, %v3210_v56  ;;  %v3194_v45 = vpop.f32.mrf.mxu1  ;;  %3501 = vmatmul.bf16.vlgmr.msra.gmra.mxu2 %v6397_v49 }
 0x3e3   : > { %v3156_v35 = vpop.f32.mrf.mxu0 }
 0x3e4   : > { %v3157_v17 = vadd.f32 %v3156_v35, %v5930_v54  ;;  %v3319_v37 = vpop.f32.mrf.mxu2 }
 0x3e6   : > { %v3185_v47 = vadd.f32 %v6023_v60, %v3157_v17  ;;  %3379 = vmatmul.bf16.gmra.mxu0 %v6389_v19  ;;  %v3250_v54 = vpop.f32.mrf.mxu3 }
 0x3e8   : > { %v3213_v57 = vadd.f32 %v6018_v24, %v3185_v47 }
 0x3ea   : > { %v6074_v46 = vadd.f32 %v6030_v33, %v3213_v57  ;;  %v3196_v38 = vpop.f32.mrf.mxu1 }
 0x3eb   : > { %v3158_v7 = vpop.f32.mrf.mxu0 }
 0x3ec   : > { %v3159_v60 = vadd.f32 %v3158_v7, %v5934_v22  ;;  %v3321_v49 = vpop.f32.mrf.mxu2 }
 0x3ee   : > { %v3187_v19 = vadd.f32 %v6036_v34, %v3159_v60  ;;  %v3252_v33 = vpop.f32.mrf.mxu3 }
 0x3f0   : > { %v3215_v0 = vadd.f32 %v6021_v48, %v3187_v19 }
 0x3f2   : > { %v6082_v24 = vadd.f32 %v6040_v12, %v3215_v0  ;;  %v3291_v6 = vpop.f32.mrf.mxu1 }
 0x3f3   : > { %v3161_v1 = vpop.f32.mrf.mxu0  ;;  %v3320_v56 = vadd.f32 %v3319_v37, %v3291_v6 }
 0x3f4   : > { %v3162_v58 = vadd.f32 %v3161_v1, %v5963_v63  ;;  %v3324_v14 = vpop.f32.mrf.mxu2 }
 0x3f6   : > { %v3190_v51 = vadd.f32 %v3189_v15, %v3162_v58  ;;  %3384 = vmatmul.bf16.gmra.mxu0 %v6392_v42  ;;  %v3347_v35 = vpop.f32.mrf.mxu3 }
 0x3f7   : > { %v6088_v21 = vadd.f32 %v3347_v35, %v3320_v56 }
 0x3f8   : > { %v3218_v22 = vadd.f32 %v6034_v16, %v3190_v51 }
 0x3fa   : > { %v3246_v34 = vadd.f32 %v3245_v61, %v3218_v22  ;;  %v3293_v17 = vpop.f32.mrf.mxu1 }
 0x3fb   : > { %v3163_v27 = vpop.f32.mrf.mxu0  ;;  %v3322_v15 = vadd.f32 %v3321_v49, %v3293_v17 }
 0x3fc   : > { %v3164_v48 = vadd.f32 %v3163_v27, %v5976_v62  ;;  %v3326_v57 = vpop.f32.mrf.mxu2 }
 0x3fe   : > { %v3192_v12 = vadd.f32 %v3191_v39, %v3164_v48  ;;  %v3349_v47 = vpop.f32.mrf.mxu3 }
 0x3ff   : > { %v6092_v16 = vadd.f32 %v3349_v47, %v3322_v15 }
 0x400   : > { %v3220_v63 = vadd.f32 %v6046_v20, %v3192_v12 }
 0x402   : > { %v3248_v31 = vadd.f32 %v3247_v55, %v3220_v63  ;;  %v3296_v62 = vpop.f32.mrf.mxu1 }
 0x403   : > { %v3166_v42 = vpop.f32.mrf.mxu0  ;;  %v3325_v39 = vadd.f32 %v3324_v14, %v3296_v62 }
 0x404   : > { %v3167_v36 = vadd.f32 %v3166_v42, %v6000_v4  ;;  %v3329_v55 = vpop.f32.mrf.mxu2 }
 0x406   : > { %v3195_v61 = vadd.f32 %v3194_v45, %v3167_v36  ;;  %3389 = vmatmul.bf16.gmra.mxu0 %v6393_v3  ;;  %v3352_v37 = vpop.f32.mrf.mxu3 }
 0x407   : > { %v6096_v20 = vadd.f32 %v3352_v37, %v3325_v39 }
 0x408   : > { %v3223_v7 = vadd.f32 %v6059_v2, %v3195_v61 }
 0x40a   : > { %v3251_v60 = vadd.f32 %v3250_v54, %v3223_v7  ;;  %v3298_v38 = vpop.f32.mrf.mxu1 }
 0x40b   : > { %v3168_v19 = vpop.f32.mrf.mxu0  ;;  %v3327_v0 = vadd.f32 %v3326_v57, %v3298_v38 }
 0x40c   : > { %v3331_v3 = vpop.f32.mrf.mxu2 }
 0x40e   : > { %v3354_v4 = vpop.f32.mrf.mxu3 }
 0x40f   : > { %v6101_v45 = vadd.f32 %v3354_v4, %v3327_v0 }
 0x412   : > { %v3301_v2 = vpop.f32.mrf.mxu1 }
 0x413   : > { %v3263_v1 = vpop.f32.mrf.mxu0  ;;  %v3330_v58 = vadd.f32 %v3329_v55, %v3301_v2 }
 0x414   : > { %v6099_v33 = vadd.f32 %v3263_v1, %v6052_v28  ;;  %v3334_v22 = vpop.f32.mrf.mxu2 }
 0x416   : > { %3486 = vmatmul.bf16.vlgmr.msra.gmra.mxu0 %v6394_v11  ;;  %v3357_v51 = vpop.f32.mrf.mxu3 }
 0x417   : > { %v6107_v6 = vadd.f32 %v3357_v51, %v3330_v58 }
 0x41a   : > { %v3303_v56 = vpop.f32.mrf.mxu1 }
 0x41b   : > { %v3265_v54 = vpop.f32.mrf.mxu0  ;;  %v3332_v27 = vadd.f32 %v3331_v3, %v3303_v56 }
 0x41c   : > { %v6105_v49 = vadd.f32 %v3265_v54, %v6064_v18  ;;  %v3336_v11 = vpop.f32.mrf.mxu2 }
 0x41e   : > { %v3359_v28 = vpop.f32.mrf.mxu3 }
 0x41f   : > { %v6112_v12 = vadd.f32 %v3359_v28, %v3332_v27 }
 0x422   : > { %v3306_v14 = vpop.f32.mrf.mxu1 }
 0x423   : > { %v3268_v35 = vpop.f32.mrf.mxu0  ;;  %v3335_v17 = vadd.f32 %v3334_v22, %v3306_v14 }
 0x424   : > { %v6110_v48 = vadd.f32 %v3268_v35, %v6074_v46  ;;  %v3431_v47 = vpop.f32.mrf.mxu2 }
 0x426   : > { %3491 = vmatmul.bf16.gmra.mxu0 %v6395_v52  ;;  %v3362_v18 = vpop.f32.mrf.mxu3 }
 0x427   : > { %v6118_v42 = vadd.f32 %v3362_v18, %v3335_v17 }
 0x42a   : > { %v3308_v36 = vpop.f32.mrf.mxu1 }
 0x42b   : > { %v3270_v63 = vpop.f32.mrf.mxu0 }
 0x42c   : > { %v6116_v15 = vadd.f32 %v3270_v63, %v6082_v24  ;;  %v3433_v62 = vpop.f32.mrf.mxu2 }
 0x42e   : > { %v3364_v57 = vpop.f32.mrf.mxu3 }
 0x432   : > { %v3403_v52 = vpop.f32.mrf.mxu1 }
 0x433   : > { %v3273_v61 = vpop.f32.mrf.mxu0 }
 0x434   : > { %v6120_v46 = vadd.f32 %v3273_v61, %v3246_v34  ;;  %v3436_v37 = vpop.f32.mrf.mxu2 }
 0x436   : > { %3496 = vmatmul.bf16.gmra.mxu0 %v6396_v32  ;;  %v3459_v39 = vpop.f32.mrf.mxu3 }
 0x43a   : > { %v3405_v55 = vpop.f32.mrf.mxu1 }
 0x43b   : > { %v3275_v7 = vpop.f32.mrf.mxu0 }
 0x43c   : > { %v6123_v19 = vadd.f32 %v3275_v7, %v3248_v31  ;;  %v3438_v1 = vpop.f32.mrf.mxu2 }
 0x43e   : > { %v3461_v38 = vpop.f32.mrf.mxu3 }
 0x442   : > { %v3408_v4 = vpop.f32.mrf.mxu1 }
 0x443   : > { %v3278_v24 = vpop.f32.mrf.mxu0 }
 0x444   : > { %v3279_v0 = vadd.f32 %v3278_v24, %v3251_v60  ;;  %v3441_v58 = vpop.f32.mrf.mxu2 }
 0x446   : > { %v3464_v2 = vpop.f32.mrf.mxu3 }
 0x44a   : > { %v3410_v34 = vpop.f32.mrf.mxu1 }
 0x44b   : > { %v3280_v3 = vpop.f32.mrf.mxu0 }
 0x44c   : > { %v3443_v56 = vpop.f32.mrf.mxu2 }
 0x44e   : > { %v3466_v51 = vpop.f32.mrf.mxu3 }
 0x452   : > { %v3413_v27 = vpop.f32.mrf.mxu1 }
 0x453   : > { %v3375_v54 = vpop.f32.mrf.mxu0 }
 0x454   : > { %v3376_v32 = vadd.f32 %v3375_v54, %v6088_v21  ;;  %v3446_v17 = vpop.f32.mrf.mxu2 }
 0x456   : > { %v3404_v22 = vadd.f32 %v3403_v52, %v3376_v32  ;;  %v3469_v11 = vpop.f32.mrf.mxu3 }
 0x458   : > { %v3432_v31 = vadd.f32 %v3431_v47, %v3404_v22 }
 0x45a   : > { %v3460_v35 = vadd.f32 %v3459_v39, %v3432_v31  ;;  %v3415_v63 = vpop.f32.mrf.mxu1 }
 0x45b   : > { %v3377_v28 = vpop.f32.mrf.mxu0 }
 0x45c   : > { %v3378_v14 = vadd.f32 %v3377_v28, %v6092_v16  ;;  %v3448_v21 = vpop.f32.mrf.mxu2 }
 0x45e   : > { %v3406_v60 = vadd.f32 %v3405_v55, %v3378_v14  ;;  %v3471_v57 = vpop.f32.mrf.mxu3 }
 0x460   : > { %v3434_v18 = vadd.f32 %v3433_v62, %v3406_v60 }
 0x462   : > { %v3462_v36 = vadd.f32 %v3461_v38, %v3434_v18  ;;  %v3418_v52 = vpop.f32.mrf.mxu1 }
 0x463   : > { %v3380_v61 = vpop.f32.mrf.mxu0 }
 0x464   : > { %v3381_v7 = vadd.f32 %v3380_v61, %v6096_v20 }
 0x465   : > { %v3502_v16 = vpop.f32.mrf.mxu2 }
 0x466   : > { %v3409_v24 = vadd.f32 %v3408_v4, %v3381_v7  ;;  %v3474_v39 = vpop.f32.mrf.mxu3 }
 0x468   : > { %v3437_v3 = vadd.f32 %v3436_v37, %v3409_v24 }
 0x46a   : > { %v3465_v54 = vadd.f32 %v3464_v2, %v3437_v3  ;;  %v3420_v55 = vpop.f32.mrf.mxu1 }
 0x46b   : > { %v3382_v47 = vpop.f32.mrf.mxu0 }
 0x46c   : > { %v3383_v32 = vadd.f32 %v3382_v47, %v6101_v45 }
 0x46d   : > { %v3504_v20 = vpop.f32.mrf.mxu2 }
 0x46e   : > { %v3411_v22 = vadd.f32 %v3410_v34, %v3383_v32  ;;  %v3476_v38 = vpop.f32.mrf.mxu3 }
 0x470   : > { %v3439_v31 = vadd.f32 %v3438_v1, %v3411_v22 }
 0x472   : > { %v3467_v28 = vadd.f32 %v3466_v51, %v3439_v31 }
 0x473   : > { %v3385_v62 = vpop.f32.mrf.mxu0 }
 0x474   : > { %v3386_v14 = vadd.f32 %v3385_v62, %v6107_v6  ;;  %v4318_v62 = vld [vmem:[%s6205_s5] sm:$0xff] }
 0x476   : > { %v3414_v60 = vadd.f32 %v3413_v27, %v3386_v14  ;;  %v6398_v14 = vld [vmem:[#allocation25_spill] sm:$0xff] }
 0x478   : > { %v3442_v4 = vadd.f32 %v3441_v58, %v3414_v60 }
 0x47a   : > { %v3470_v18 = vadd.f32 %v3469_v11, %v3442_v4  ;;  %v6399_v4 = vld [vmem:[#allocation26_spill] sm:$0xff] }
 0x47b   : > { %v3387_v61 = vpop.f32.mrf.mxu0 }
 0x47c   : > { %v3388_v37 = vadd.f32 %v3387_v61, %v6112_v12 }
 0x47e   : > { %v3416_v2 = vadd.f32 %v3415_v63, %v3388_v37  ;;  %v6400_v37 = vld [vmem:[#allocation27_spill] sm:$0xff] }
 0x480   : > { %v3444_v7 = vadd.f32 %v3443_v56, %v3416_v2 }
 0x482   : > { %v3472_v24 = vadd.f32 %v3471_v57, %v3444_v7 }
 0x483   : > { %v3390_v45 = vpop.f32.mrf.mxu0 }
 0x484   : > { %v3391_v34 = vadd.f32 %v3390_v45, %v6118_v42  ;;  %v4328_v42 = vmov 0   ;;  %v6401_v45 = vld [vmem:[#allocation28_spill] sm:$0xff] }
 0x485   : > { %4313 = vset.pattern.permute.xlu2 %v4328_v42  ;;  %4314 = vset.pattern.permute.xlu0 %v4328_v42 }
 0x486   : > { %v3419_v21 = vadd.f32 %v3418_v52, %v3391_v34  ;;  %4315 = vset.pattern.permute.xlu1 %v4328_v42 }
 0x488   : > { %v3447_v1 = vadd.f32 %v3446_v17, %v3419_v21 }
 0x48a   : > { %v3475_v51 = vadd.f32 %v3474_v39, %v3447_v1  ;;  %v6402_v1 = vld [vmem:[#allocation33_spill] sm:$0xff] }
 0x48b   : > { %v3392_v3 = vpop.f32.mrf.mxu0 }
 0x48c   : > { %v3503_v47 = vadd.f32 %v3502_v16, %v3475_v51  ;;  %v6403_v3 = vld [vmem:[#allocation34_spill] sm:$0xff] }
 0x48e   : > { %v3524_v32 = vmax.f32 %v3279_v0, %v3503_v47 }
 0x490   : > { %3525 = vmax.xlane.f32.xlu1 %v3524_v32  ;;  %v6404_v32 = vld [vmem:[#allocation35_spill] sm:$0xff] }
 0x493   : > { %v3487_v6 = vpop.f32.mrf.mxu0 }
 0x494   : > { %v3488_v27 = vadd.f32 %v3487_v6, %v3460_v35 }
 0x496   : > { %v3506_v58 = vmax.f32 %v6099_v33, %v3488_v27  ;;  %v6405_v27 = vld [vmem:[#allocation36_spill] sm:$0xff] }
 0x49b   : > { %v3489_v11 = vpop.f32.mrf.mxu0 }
 0x49c   : > { %v3490_v22 = vadd.f32 %v3489_v11, %v3462_v36 }
 0x49e   : > { %v3509_v12 = vmax.f32 %v6105_v49, %v3490_v22  ;;  %v6406_v22 = vld [vmem:[#allocation45_spill] sm:$0xff] }
 0x4a3   : > { %v3492_v56 = vpop.f32.mrf.mxu0 }
 0x4a4   : > { %v3493_v63 = vadd.f32 %v3492_v56, %v3465_v54  ;;  %v6407_v56 = vld [vmem:[#allocation46_spill] sm:$0xff] }
 0x4a6   : > { %v3512_v57 = vmax.f32 %v6110_v48, %v3493_v63  ;;  %v318_v48 = vld [vmem:[%s6203_s3] sm:$0x7f] }
 0x4ab   : > { %v3494_v17 = vpop.f32.mrf.mxu0 }
 0x4ac   : > { %v3495_v52 = vadd.f32 %v3494_v17, %v3467_v28  ;;  %v6409_v17 = vld [vmem:[#allocation48_spill] sm:$0xff] }
 0x4ae   : > { %v3515_v0 = vmax.f32 %v6116_v15, %v3495_v52 }
 0x4b0   : > { %3516 = vmax.xlane.f32.xlu1 %v3515_v0  ;;  %v6410_v0 = vld [vmem:[#allocation57_spill] sm:$0xff] }
 0x4b3   : > { %v3497_v35 = vpop.f32.mrf.mxu0 }
 0x4b4   : > { %v3498_v39 = vadd.f32 %v3497_v35, %v3470_v18 }
 0x4b6   : > { %v3518_v33 = vmax.f32 %v6120_v46, %v3498_v39  ;;  %v6411_v39 = vld [vmem:[#allocation58_spill] sm:$0xff] }
 0x4b8   : > { %3519 = vmax.xlane.f32.xlu0 %v3518_v33  ;;  %3507 = vmax.xlane.f32.xlu1 %v3506_v58 }
 0x4bb   : > { %v3499_v49 = vpop.f32.mrf.mxu0 }
 0x4bc   : > { %v3500_v36 = vadd.f32 %v3499_v49, %v3472_v24  ;;  %v4319_v24 = vld [vmem:[%s6205_s5 + $0x8] sm:$0x3f] }
 0x4bd   : > { %v6412_v49 = vld [vmem:[#allocation59_spill] sm:$0xff] }
 0x4be   : > { %v3521_v54 = vmax.f32 %v6123_v19, %v3500_v36 }
 0x4c0   : > { %3522 = vmax.xlane.f32.xlu2 %v3521_v54  ;;  %3510 = vmax.xlane.f32.xlu0 %v3509_v12  ;;  %v6413_v54 = vld [vmem:[#allocation60_spill] sm:$0xff] }
 0x4c8   : > { %3513 = vmax.xlane.f32.xlu2 %v3512_v57  ;;  %v6408_v57 = vld [vmem:[#allocation47_spill] sm:$0xff] }
 0x4e0   : > { %1121 = vperm.xlu2 %4313, %v318_v48  }
 0x503   : > { %v3526_v15 = vpop.xlane.xlu1 %3525 }
 0x504   : > { %3536 = vmatpush.msra.mxu1 %v3526_v15 }
 0x523   : > { %v3517_v46 = vpop.xlane.xlu1 %3516 }
 0x52b   : > { %v3520_v16 = vpop.xlane.xlu0 %3519  ;;  %v3508_v19 = vpop.xlane.xlu1 %3507 }
 0x533   : > { %v3523_v55 = vpop.xlane.xlu2 %3522  ;;  %v3511_v28 = vpop.xlane.xlu0 %3510 }
 0x534   : > { %3537 = vmatpush.msra.mxu1 %v3523_v55 }
 0x536   : > { %3538 = vmatpush.msra.mxu1 %v3520_v16 }
 0x538   : > { %3539 = vmatpush.msra.mxu1 %v3517_v46  ;;  %v6414_v46 = vld [vmem:[#allocation2_spill] sm:$0xff] }
 0x53b   : > { %v3514_v31 = vpop.xlane.xlu2 %3513 }
 0x53c   : > { %3540 = vmatpush.msra.mxu1 %v3514_v31 }
 0x53e   : > { %3541 = vmatpush.msra.mxu1 %v3511_v28 }
 0x540   : > { %3542 = vmatpush.msra.mxu1 %v3508_v19  ;;  %v4329_v19 = vmov 64.0  }
 0x541   : > { %4262 = vmatmul.msk.f32.vlgmr.msra.gmra.mxu1 %vm2018_vm0, %v4318_v62  ;;  %4316 = vrcp.f32 %v4329_v19 }
 0x543   : > { %v1122_v38 = vpop.permute.xlu2 %1121 }
 0x544   : > { %v1190_v60 = vadd.f32 %v6398_v14, %v1122_v38  ;;  %v2855_v20 = vadd.f32 %v5787_v59, %v1122_v38 }
 0x546   : > { %v1203_v18 = vadd.f32 %v6399_v4, %v1190_v60  ;;  %v2868_v61 = vadd.f32 %v5766_v23, %v2855_v20 }
 0x547   : > { %v4317_v62 = vpop.eup %4316 }
 0x548   : > { %v1216_v2 = vadd.f32 %v6400_v37, %v1203_v18  ;;  %v2881_v7 = vadd.f32 %v5793_v30, %v2868_v61  ;;  %v1394_v60 = vmul.f32 64.0, %v4317_v62  ;;  %vm1398_vm2 = vweird.f32 %v4317_v62 }
 0x549   : > { %4263 = vmatmul.msk.f32.gmra.mxu1 %vm2018_vm0, %v4319_v24  ;;  %v2049_v18 = vlaneseq }
 0x54a   : > { %v1229_v34 = vadd.f32 %v6401_v45, %v1216_v2  ;;  %v2894_v21 = vadd.f32 %v5874_v41, %v2881_v7 }
 0x54b   : > { %v2050_v37 = vand.u32 127, %v2049_v18 }
 0x54c   : > { %v1242_v59 = vadd.f32 %v6402_v1, %v1229_v34  ;;  %v2907_v51 = vadd.f32 %v5807_v13, %v2894_v21 }
 0x54e   : > { %v1255_v23 = vadd.f32 %v6403_v3, %v1242_v59  ;;  %v2920_v47 = vadd.f32 %v5795_v44, %v2907_v51  ;;  %v2066_v51 = vadd.s32 7, %v2050_v37  ;;  %v2068_v3 = vadd.s32 4294967295, %v2050_v37 }
 0x550   : > { %v1268_v30 = vadd.f32 %v6404_v32, %v1255_v23  ;;  %v2933_v6 = vadd.f32 %v5811_v9, %v2920_v47 }
 0x552   : > { %v1281_v58 = vadd.f32 %v6405_v27, %v1268_v30  ;;  %v2946_v11 = vadd.f32 %v5914_v50, %v2933_v6 }
 0x554   : > { %v1294_v12 = vadd.f32 %v6406_v22, %v1281_v58  ;;  %v2959_v41 = vadd.f32 %v5832_v29, %v2946_v11 }
 0x556   : > { %v1307_v63 = vadd.f32 %v6407_v56, %v1294_v12  ;;  %v2972_v13 = vadd.f32 %v5815_v40, %v2959_v41 }
 0x558   : > { %v1320_v42 = vadd.f32 %v6408_v57, %v1307_v63  ;;  %v2985_v44 = vadd.f32 %v5841_v26, %v2972_v13 }
 0x55a   : > { %v1333_v52 = vadd.f32 %v6409_v17, %v1320_v42  ;;  %v2998_v9 = vadd.f32 %v5950_v53, %v2985_v44 }
 0x55c   : > { %v1346_v35 = vadd.f32 %v6410_v0, %v1333_v52  ;;  %v3011_v50 = vadd.f32 %v5878_v43, %v2998_v9  ;;  %v349_v43 = vld [vmem:[%s6206_s6] sm:$0xff] }
 0x55e   : > { %v1359_v33 = vadd.f32 %v6411_v39, %v1346_v35  ;;  %v3024_v29 = vadd.f32 %v5847_v25, %v3011_v50  ;;  %v2043_v25 = vadd.f32 %v5828_v5, %v349_v43  ;;  %v1395_v5 = vsub.f32 1.0, %v1394_v60 }
 0x560   : > { %v1372_v36 = vadd.f32 %v6412_v49, %v1359_v33  ;;  %v3037_v40 = vadd.f32 %v5885_v8, %v3024_v29  ;;  %v350_v8 = vld [vmem:[%s6206_s6 + $0x8] sm:$0x3f]  ;;  %v1396_v20 = vmul.f32 %v4317_v62, %v1395_v5 }
 0x562   : > { %v1385_v48 = vadd.f32 %v6413_v54, %v1372_v36  ;;  %v3050_v26 = vadd.f32 %v6011_v10, %v3037_v40  ;;  %v2046_v10 = vadd.f32 %v6414_v46, %v350_v8  ;;  %v1397_v4 = vadd.f32 %v4317_v62, %v1396_v20 }
 0x564   : > { %v1388_v15 = vmax.f32 %v1385_v48, 0.0  ;;  %v3053_v16 = vmax.f32 %v3050_v26, 0.0  ;;  %v1399_v61 = vsel %vm1398_vm2, %v4317_v62, %v1397_v4 }
 0x566   : > { %v1390_v53 = vsel %vm1389_vm1, %v1388_v15, 0.0  ;;  %v3054_v55 = vsel %vm1389_vm1, %v3053_v16, 0.0 }
 0x567   : > { %1391 = vadd.xlane.f32.xlu0 %v1390_v53  ;;  %3055 = vadd.xlane.f32.xlu1 %v3054_v55 }
 0x57b   : > { %2057 = vperm.xlu0 %4314, %v2043_v25  }
 0x580   : > { %2064 = vperm.xlu1 %4315, %v2046_v10  }
 0x5be   : > { %v3544_v31 = vpop.f32.mrf.mxu1 }
 0x5bf   : > { %v3545_v28 = vadd.f32 %v3544_v31, %v349_v43 }
 0x5c1   : > { %3557 = vperm.xlu2 %4313, %v3545_v28  }
 0x5c6   : > { %v3547_v38 = vpop.f32.mrf.mxu1 }
 0x5c7   : > { %v3548_v14 = vadd.f32 %v3547_v38, %v350_v8 }
 0x5c9   : > { %3564 = vperm.xlu2 %4313, %v3548_v14  }
 0x5da   : > { %v1392_v2 = vpop.xlane.xlu0 %1391  ;;  %v3056_v7 = vpop.xlane.xlu1 %3055 }
 0x5db   : > { %v1400_v24 = vmul.f32 %v1399_v61, %v1392_v2  ;;  %v3057_v45 = vmul.f32 %v3056_v7, %v1399_v61 }
 0x5dd   : > { %v2051_v34 = vperm.slane %v1400_v24, %v2050_v37  ;;  %v3551_v21 = vperm.slane %v3057_v45, %v2050_v37 }
 0x5df   : > { %2054 = vst.msk [vmem:[%s308_s12] sm:$0x1] %vm2053_vm3, %v2051_v34 }
 0x5e0   : > { %4264 = vst.msk [vmem:[%s308_s12 + $0x4] sm:$0x1] %vm2053_vm3, %v3551_v21 }
 0x5ed   : > { %v2058_v1 = vpop.permute.xlu0 %2057 }
 0x5ee   : > { %v2059_v59 = vperm.slane %v2058_v1, %v2050_v37  ;;  %v2067_v47 = vperm.slane %v2058_v1, %v2066_v51 }
 0x5f0   : > { %2061 = vst.msk [vmem:[%s308_s12 + $0x1] sm:$0x1] %vm2053_vm3, %v2059_v59 }
 0x5f2   : > { %v2065_v23 = vpop.permute.xlu1 %2064 }
 0x5f3   : > { %v2069_v32 = vperm.slane %v2065_v23, %v2068_v3 }
 0x5f5   : > { %v2071_v30 = vsel %vm2070_vm4, %v2069_v32, %v2067_v47 }
 0x5f6   : > { %2074 = vst.msk [vmem:[%s308_s12 - $0x5] sm:$0x80] %vm2073_vm5, %v2071_v30 }
 0x61b   : > { %v3558_v6 = vpop.permute.xlu2 %3557 }
 0x61c   : > { %v3559_v27 = vperm.slane %v3558_v6, %v2050_v37  ;;  %v3566_v11 = vperm.slane %v3558_v6, %v2066_v51 }
 0x61e   : > { %4265 = vst.msk [vmem:[%s308_s12 + $0x5] sm:$0x1] %vm2053_vm3, %v3559_v27 }
 0x623   : > { %v3565_v58 = vpop.permute.xlu2 %3564 }
 0x624   : > { %v3567_v22 = vperm.slane %v3565_v58, %v2068_v3 }
 0x626   : > { %v3568_v12 = vsel %vm2070_vm4, %v3567_v22, %v3566_v11 }
 0x627   : > { %4266 = vst.msk [vmem:[%s308_s12 - $0x1] sm:$0x80] %vm2073_vm5, %v3568_v12 }
 0x628 PF: > { %s17_s24 = sadd.s32 1, %s4326_s24  }
 0x629   : > { %p14_p4 = scmp.ge.s32.totalorder %s17_s24, 4  }
 0x62b   :  { %16 = sbr.rel (!%p14_p4) target bundleno = 1 (0x1), region = 84 }

</bundles_post_ra>
